<compile_context>
chip_gen: v7x
topology: tpu7x:2x2x1
jax: 0.10.0
libtpu: 0.0.40
codegen_flags: <defaults>
</compile_context>

<pallas_src>
import functools

import jax
import jax.numpy as jnp
from jax.experimental import pallas as pl
from jax.experimental.pallas import tpu as pltpu


def _pick_tile(dim, candidates):
    """Largest MXU-friendly tile that divides `dim` (full extent as fallback)."""
    for t in candidates:
        if dim % t == 0:
            return t
    return dim


@functools.lru_cache(maxsize=None)
def _compiler_params():
    """Per-generation VMEM cap: ~3/4 of physical VMEM, capped at 100 MiB."""
    vmem_bytes = 48 * 1024 * 1024  # safe default (fits v7x's 64 MiB physical)
    try:
        info_fn = getattr(pltpu, "get_tpu_info", None)
        if info_fn is not None:
            cap = getattr(info_fn(), "vmem_capacity_bytes", None)
            if cap:
                vmem_bytes = min(int(cap) * 3 // 4, 100 * 1024 * 1024)
    except Exception:
        pass
    return pltpu.CompilerParams(
        dimension_semantics=("parallel", "arbitrary"),
        vmem_limit_bytes=vmem_bytes,
    )


def _linear_bn_relu_kernel(x_ref, w_ref, g_ref, b_ref, o_ref, acc_ref, *,
                           tk, inv_b, eps):
    """out[B, tn] = ReLU(BatchNorm(x @ w)); x resident, K tiled via pl.ds."""
    k = pl.program_id(1)

    @pl.when(k == 0)
    def _():
        acc_ref[...] = jnp.zeros_like(acc_ref)

    # x_ref holds the full (B, K) activation slab; slice the current K chunk.
    x_blk = x_ref[:, pl.ds(pl.multiple_of(k * tk, tk), tk)]
    acc_ref[...] += jnp.dot(x_blk, w_ref[...],
                            preferred_element_type=jnp.float32)

    @pl.when(k == pl.num_programs(1) - 1)
    def _():
        acc = acc_ref[...]                                       # (B, tn) f32
        # Single-pass batch statistics (f32 accumulator keeps this stable).
        s1 = jnp.sum(acc, axis=0, keepdims=True)
        s2 = jnp.sum(acc * acc, axis=0, keepdims=True)
        mean = s1 * jnp.float32(inv_b)
        var = s2 * jnp.float32(inv_b) - mean * mean              # biased var
        scale = g_ref[...] * jax.lax.rsqrt(var + jnp.float32(eps))  # (1, tn)
        shift = b_ref[...] - mean * scale
        # folded BN + ReLU: one broadcasted FMA + max
        o_ref[...] = jnp.maximum(acc * scale + shift, 0.0).astype(o_ref.dtype)


def _linear_kernel(x_ref, w_ref, o_ref, acc_ref, *, tk):
    """out[B, tn] = x @ w (no BN / ReLU); x resident, K tiled via pl.ds."""
    k = pl.program_id(1)

    @pl.when(k == 0)
    def _():
        acc_ref[...] = jnp.zeros_like(acc_ref)

    x_blk = x_ref[:, pl.ds(pl.multiple_of(k * tk, tk), tk)]
    acc_ref[...] += jnp.dot(x_blk, w_ref[...],
                            preferred_element_type=jnp.float32)

    @pl.when(k == pl.num_programs(1) - 1)
    def _():
        o_ref[...] = acc_ref[...].astype(o_ref.dtype)


def _tiled_linear(x, w, g=None, b=None, *, out_dtype, eps=1e-5):
    """One projector layer: tiled (x @ w) with optional fused BN+ReLU epilogue."""
    bsz, kdim = x.shape
    assert w.shape[0] == kdim
    ndim = w.shape[1]
    assert bsz % 8 == 0, "batch must be a multiple of 8 (f32 sublane tile)"

    tn = _pick_tile(ndim, (1024, 512, 256, 128))
    tk = _pick_tile(kdim, (512, 256, 128))
    grid = (ndim // tn, kdim // tk)

    # x is resident: full (B, K) block, constant index -> DMA'd once per call.
    x_spec = pl.BlockSpec((bsz, kdim), lambda n, k: (0, 0))
    w_spec = pl.BlockSpec((tk, tn), lambda n, k: (k, n))
    o_spec = pl.BlockSpec((bsz, tn), lambda n, k: (0, n))
    scratch = [pltpu.VMEM((bsz, tn), jnp.float32)]

    if g is None:
        kernel = functools.partial(_linear_kernel, tk=tk)
        return pl.pallas_call(
            kernel,
            out_shape=jax.ShapeDtypeStruct((bsz, ndim), out_dtype),
            grid_spec=pltpu.PrefetchScalarGridSpec(
                num_scalar_prefetch=0, grid=grid,
                in_specs=[x_spec, w_spec],
                out_specs=o_spec,
                scratch_shapes=scratch),
            compiler_params=_compiler_params(),
        )(x, w)

    gb_spec = pl.BlockSpec((1, tn), lambda n, k: (0, n))
    kernel = functools.partial(_linear_bn_relu_kernel,
                               tk=tk, inv_b=float(1.0 / bsz), eps=float(eps))
    return pl.pallas_call(
        kernel,
        out_shape=jax.ShapeDtypeStruct((bsz, ndim), out_dtype),
        grid_spec=pltpu.PrefetchScalarGridSpec(
            num_scalar_prefetch=0, grid=grid,
            in_specs=[x_spec, w_spec, gb_spec, gb_spec],
            out_specs=o_spec,
            scratch_shapes=scratch),
        compiler_params=_compiler_params(),
    )(x, w, g, b)


@jax.jit
def projector_forward(x, w1_bf16, g1, b1, w2_bf16, g2, b2, w3_bf16):
    """Linear->BN->ReLU, Linear->BN->ReLU, Linear.

    Weights are stored as (in, out) and already in bf16 (cast done once at
    setup time, NOT per forward).  Activations flow in bf16 between layers,
    matmuls accumulate in f32 inside the kernels.
    """
    xb = x.astype(jnp.bfloat16)
    h1 = _tiled_linear(xb, w1_bf16, g1, b1, out_dtype=jnp.bfloat16)   # layer1
    h2 = _tiled_linear(h1, w2_bf16, g2, b2, out_dtype=jnp.bfloat16)   # layer2
    out = _tiled_linear(h2, w3_bf16, out_dtype=jnp.float32)           # layer3
    return out


def reference_forward(x, w1, g1, b1, w2, g2, b2, w3):
    """Pure-JAX reference with the same bf16-operand / f32-accumulate numerics."""
    eps = 1e-5

    def bn_relu(h, g, b):
        mean = jnp.mean(h, axis=0, keepdims=True)
        var = jnp.mean((h - mean) ** 2, axis=0, keepdims=True)   # biased var
        return jnp.maximum((h - mean) / jnp.sqrt(var + eps) * g + b, 0.0)

    def mm(a, w):
        return jnp.dot(a.astype(jnp.bfloat16), w.astype(jnp.bfloat16),
                       preferred_element_type=jnp.float32)

    h = bn_relu(mm(x, w1), g1, b1)
    h = bn_relu(mm(h.astype(jnp.bfloat16).astype(jnp.float32), w2), g2, b2)
    return mm(h, w3)


if __name__ == "__main__":
    # Small but MXU/lane-friendly shapes (features multiples of 128, batch
    # multiple of 8 so BatchNorm statistics and sublane tiling line up).
    B, in_dim, hidden_dim, out_dim = 128, 256, 512, 128

    key = jax.random.PRNGKey(0)
    kx, k1, k2, k3 = jax.random.split(key, 4)

    x = jax.random.normal(kx, (B, in_dim), dtype=jnp.float32)

    # Linear weights stored as (in, out) = W.T relative to PyTorch's (out, in).
    w1 = jax.random.normal(k1, (in_dim, hidden_dim), dtype=jnp.float32) * 0.05
    w2 = jax.random.normal(k2, (hidden_dim, hidden_dim), dtype=jnp.float32) * 0.05
    w3 = jax.random.normal(k3, (hidden_dim, out_dim), dtype=jnp.float32) * 0.05

    # BatchNorm affine params (PyTorch default init: gamma=1, beta=0), kept (1, H).
    g1 = jnp.ones((1, hidden_dim), dtype=jnp.float32)
    b1 = jnp.zeros((1, hidden_dim), dtype=jnp.float32)
    g2 = jnp.ones((1, hidden_dim), dtype=jnp.float32)
    b2 = jnp.zeros((1, hidden_dim), dtype=jnp.float32)

    # Persistent bf16 weights (one-time cast, outside the jitted forward).
    w1b = jnp.asarray(w1, dtype=jnp.bfloat16)
    w2b = jnp.asarray(w2, dtype=jnp.bfloat16)
    w3b = jnp.asarray(w3, dtype=jnp.bfloat16)

    out = projector_forward(x, w1b, g1, b1, w2b, g2, b2, w3b)
    out = jax.block_until_ready(out)

    ref = reference_forward(x, w1, g1, b1, w2, g2, b2, w3)
    assert out.shape == (B, out_dim)
    assert jnp.allclose(out, ref, atol=2e-2, rtol=2e-2), "mismatch vs reference"

    print("KERNEL_OK")
</pallas_src>

<mosaic_0001>
module attributes {stable_mosaic.version = 11 : i64} {
  func.func @_linear_bn_relu_kernel(%arg0: i32, %arg1: i32, %arg2: memref<128x512xbf16, #tpu.memory_space<vmem>>, %arg3: memref<512x512xbf16, #tpu.memory_space<vmem>>, %arg4: memref<1x512xf32, #tpu.memory_space<vmem>>, %arg5: memref<1x512xf32, #tpu.memory_space<vmem>>, %arg6: memref<128x512xbf16, #tpu.memory_space<vmem>>, %arg7: memref<128x512xf32, #tpu.memory_space<vmem>>) attributes {dimension_semantics = [#tpu.dimension_semantics<parallel>, #tpu.dimension_semantics<arbitrary>], iteration_bounds = array<i64: 1, 1>, scalar_prefetch = 0 : i64, scratch_operands = 1 : i64, tpu.core_type = #tpu.core_type<tc>, window_params = [{pipeline_mode = #tpu.pipeline_mode<synchronous>, transform_indices = @transform_0, window_bounds = array<i64: 128, 512>}, {transform_indices = @transform_1, window_bounds = array<i64: 512, 512>}, {transform_indices = @transform_2, window_bounds = array<i64: 1, 512>}, {transform_indices = @transform_3, window_bounds = array<i64: 1, 512>}, {transform_indices = @transform_4, window_bounds = array<i64: 128, 512>}]} {
    %c0_i32 = arith.constant 0 : i32
    %0 = arith.cmpi eq, %arg1, %c0_i32 : i32
    %1 = arith.extui %0 : i1 to i32
    %c0_i32_0 = arith.constant 0 : i32
    %2 = arith.cmpi ne, %1, %c0_i32_0 : i32
    scf.if %2 {
      %cst_9 = arith.constant 0.000000e+00 : f32
      %15 = vector.broadcast %cst_9 : f32 to vector<128x512xf32>
      %c0_10 = arith.constant 0 : index
      %c0_11 = arith.constant 0 : index
      %16 = vector.load %arg7[%c0_10, %c0_11] : memref<128x512xf32, #tpu.memory_space<vmem>>, vector<128x512xf32>
      tpu.vector_store %arg7[%c0_10, %c0_11], %15 {strides = array<i32>} : memref<128x512xf32, #tpu.memory_space<vmem>>, vector<128x512xf32>,
    } else {
    }
    %c512_i32 = arith.constant 512 : i32
    %3 = arith.muli %arg1, %c512_i32 : i32
    %4 = tpu.assume_multiple %3, 512 : i32
    %c0 = arith.constant 0 : index
    %5 = arith.index_cast %4 : i32 to index
    %6 = vector.load %arg2[%c0, %5] : memref<128x512xbf16, #tpu.memory_space<vmem>>, vector<128x512xbf16>
    %c0_1 = arith.constant 0 : index
    %c0_2 = arith.constant 0 : index
    %7 = vector.load %arg7[%c0_1, %c0_2] : memref<128x512xf32, #tpu.memory_space<vmem>>, vector<128x512xf32>
    %c0_3 = arith.constant 0 : index
    %c0_4 = arith.constant 0 : index
    %8 = vector.load %arg3[%c0_3, %c0_4] : memref<512x512xbf16, #tpu.memory_space<vmem>>, vector<512x512xbf16>
    %cst = arith.constant dense<0.000000e+00> : vector<128x512xf32>
    %9 = tpu.matmul %6, %8, %cst {dimension_numbers = #tpu.dot_dimension_numbers<[1], [0], [0], [1], [0, 0, 1, 1], [], []>} : vector<128x512xbf16>, vector<512x512xbf16>, vector<128x512xf32> -> vector<128x512xf32>
    %10 = arith.addf %7, %9 : vector<128x512xf32>
    %c0_5 = arith.constant 0 : index
    %c0_6 = arith.constant 0 : index
    %11 = vector.load %arg7[%c0_5, %c0_6] : memref<128x512xf32, #tpu.memory_space<vmem>>, vector<128x512xf32>
    tpu.vector_store %arg7[%c0_5, %c0_6], %10 {strides = array<i32>} : memref<128x512xf32, #tpu.memory_space<vmem>>, vector<128x512xf32>,
    %c0_i32_7 = arith.constant 0 : i32
    %12 = arith.cmpi eq, %arg1, %c0_i32_7 : i32
    %13 = arith.extui %12 : i1 to i32
    %c0_i32_8 = arith.constant 0 : i32
    %14 = arith.cmpi ne, %13, %c0_i32_8 : i32
    scf.if %14 {
      %c0_9 = arith.constant 0 : index
      %c0_10 = arith.constant 0 : index
      %15 = vector.load %arg7[%c0_9, %c0_10] : memref<128x512xf32, #tpu.memory_space<vmem>>, vector<128x512xf32>
      %cst_11 = arith.constant dense<0.000000e+00> : vector<512xf32>
      %16 = vector.multi_reduction <add>, %15, %cst_11 [0] : vector<128x512xf32> to vector<512xf32>
      %17 = vector.shape_cast %16 : vector<512xf32> to vector<1x512xf32>
      %18 = arith.mulf %15, %15 : vector<128x512xf32>
      %cst_12 = arith.constant dense<0.000000e+00> : vector<512xf32>
      %19 = vector.multi_reduction <add>, %18, %cst_12 [0] : vector<128x512xf32> to vector<512xf32>
      %20 = vector.shape_cast %19 : vector<512xf32> to vector<1x512xf32>
      %cst_13 = arith.constant 7.812500e-03 : f32
      %21 = vector.broadcast %cst_13 : f32 to vector<1x512xf32>
      %22 = arith.mulf %17, %21 : vector<1x512xf32>
      %cst_14 = arith.constant 7.812500e-03 : f32
      %23 = vector.broadcast %cst_14 : f32 to vector<1x512xf32>
      %24 = arith.mulf %20, %23 : vector<1x512xf32>
      %25 = arith.mulf %22, %22 : vector<1x512xf32>
      %26 = arith.subf %24, %25 : vector<1x512xf32>
      %c0_15 = arith.constant 0 : index
      %c0_16 = arith.constant 0 : index
      %27 = vector.load %arg4[%c0_15, %c0_16] : memref<1x512xf32, #tpu.memory_space<vmem>>, vector<1x512xf32>
      %cst_17 = arith.constant 9.99999974E-6 : f32
      %28 = vector.broadcast %cst_17 : f32 to vector<1x512xf32>
      %29 = arith.addf %26, %28 : vector<1x512xf32>
      %30 = math.rsqrt %29 : vector<1x512xf32>
      %31 = arith.mulf %27, %30 : vector<1x512xf32>
      %c0_18 = arith.constant 0 : index
      %c0_19 = arith.constant 0 : index
      %32 = vector.load %arg5[%c0_18, %c0_19] : memref<1x512xf32, #tpu.memory_space<vmem>>, vector<1x512xf32>
      %33 = arith.mulf %22, %31 : vector<1x512xf32>
      %34 = arith.subf %32, %33 : vector<1x512xf32>
      %35 = vector.broadcast %31 : vector<1x512xf32> to vector<128x512xf32>
      %36 = arith.mulf %15, %35 : vector<128x512xf32>
      %37 = vector.broadcast %34 : vector<1x512xf32> to vector<128x512xf32>
      %38 = arith.addf %36, %37 : vector<128x512xf32>
      %cst_20 = arith.constant 0.000000e+00 : f32
      %39 = vector.broadcast %cst_20 : f32 to vector<128x512xf32>
      %40 = arith.maximumf %38, %39 : vector<128x512xf32>
      %41 = arith.truncf %40 : vector<128x512xf32> to vector<128x512xbf16>
      %c0_21 = arith.constant 0 : index
      %c0_22 = arith.constant 0 : index
      %42 = vector.load %arg6[%c0_21, %c0_22] : memref<128x512xbf16, #tpu.memory_space<vmem>>, vector<128x512xbf16>
      tpu.vector_store %arg6[%c0_21, %c0_22], %41 {strides = array<i32>} : memref<128x512xbf16, #tpu.memory_space<vmem>>, vector<128x512xbf16>,
    } else {
    }
    return
  }
  func.func @transform_0(%arg0: i32, %arg1: i32) -> (i32, i32) {
    %c0_i32 = arith.constant 0 : i32
    %c0_i32_0 = arith.constant 0 : i32
    %c0_i32_1 = arith.constant 0 : i32
    return %c0_i32, %c0_i32_0 : i32, i32
  }
  func.func @transform_1(%arg0: i32, %arg1: i32) -> (i32, i32) {
    %c0_i32 = arith.constant 0 : i32
    return %arg1, %arg0 : i32, i32
  }
  func.func @transform_2(%arg0: i32, %arg1: i32) -> (i32, i32) {
    %c0_i32 = arith.constant 0 : i32
    %c0_i32_0 = arith.constant 0 : i32
    return %c0_i32, %arg0 : i32, i32
  }
  func.func @transform_3(%arg0: i32, %arg1: i32) -> (i32, i32) {
    %c0_i32 = arith.constant 0 : i32
    %c0_i32_0 = arith.constant 0 : i32
    return %c0_i32, %arg0 : i32, i32
  }
  func.func @transform_4(%arg0: i32, %arg1: i32) -> (i32, i32) {
    %c0_i32 = arith.constant 0 : i32
    %c0_i32_0 = arith.constant 0 : i32
    return %c0_i32, %arg0 : i32, i32
  }
}

module attributes {stable_mosaic.version = 11 : i64} {
  func.func @_linear_bn_relu_kernel(%arg0: i32, %arg1: i32, %arg2: memref<128x256xbf16, #tpu.memory_space<vmem>>, %arg3: memref<256x512xbf16, #tpu.memory_space<vmem>>, %arg4: memref<1x512xf32, #tpu.memory_space<vmem>>, %arg5: memref<1x512xf32, #tpu.memory_space<vmem>>, %arg6: memref<128x512xbf16, #tpu.memory_space<vmem>>, %arg7: memref<128x512xf32, #tpu.memory_space<vmem>>) attributes {dimension_semantics = [#tpu.dimension_semantics<parallel>, #tpu.dimension_semantics<arbitrary>], iteration_bounds = array<i64: 1, 1>, scalar_prefetch = 0 : i64, scratch_operands = 1 : i64, tpu.core_type = #tpu.core_type<tc>, window_params = [{pipeline_mode = #tpu.pipeline_mode<synchronous>, transform_indices = @transform_0, window_bounds = array<i64: 128, 256>}, {transform_indices = @transform_1, window_bounds = array<i64: 256, 512>}, {transform_indices = @transform_2, window_bounds = array<i64: 1, 512>}, {transform_indices = @transform_3, window_bounds = array<i64: 1, 512>}, {transform_indices = @transform_4, window_bounds = array<i64: 128, 512>}]} {
    %c0_i32 = arith.constant 0 : i32
    %0 = arith.cmpi eq, %arg1, %c0_i32 : i32
    %1 = arith.extui %0 : i1 to i32
    %c0_i32_0 = arith.constant 0 : i32
    %2 = arith.cmpi ne, %1, %c0_i32_0 : i32
    scf.if %2 {
      %cst_9 = arith.constant 0.000000e+00 : f32
      %15 = vector.broadcast %cst_9 : f32 to vector<128x512xf32>
      %c0_10 = arith.constant 0 : index
      %c0_11 = arith.constant 0 : index
      %16 = vector.load %arg7[%c0_10, %c0_11] : memref<128x512xf32, #tpu.memory_space<vmem>>, vector<128x512xf32>
      tpu.vector_store %arg7[%c0_10, %c0_11], %15 {strides = array<i32>} : memref<128x512xf32, #tpu.memory_space<vmem>>, vector<128x512xf32>,
    } else {
    }
    %c256_i32 = arith.constant 256 : i32
    %3 = arith.muli %arg1, %c256_i32 : i32
    %4 = tpu.assume_multiple %3, 256 : i32
    %c0 = arith.constant 0 : index
    %5 = arith.index_cast %4 : i32 to index
    %6 = vector.load %arg2[%c0, %5] : memref<128x256xbf16, #tpu.memory_space<vmem>>, vector<128x256xbf16>
    %c0_1 = arith.constant 0 : index
    %c0_2 = arith.constant 0 : index
    %7 = vector.load %arg7[%c0_1, %c0_2] : memref<128x512xf32, #tpu.memory_space<vmem>>, vector<128x512xf32>
    %c0_3 = arith.constant 0 : index
    %c0_4 = arith.constant 0 : index
    %8 = vector.load %arg3[%c0_3, %c0_4] : memref<256x512xbf16, #tpu.memory_space<vmem>>, vector<256x512xbf16>
    %cst = arith.constant dense<0.000000e+00> : vector<128x512xf32>
    %9 = tpu.matmul %6, %8, %cst {dimension_numbers = #tpu.dot_dimension_numbers<[1], [0], [0], [1], [0, 0, 1, 1], [], []>} : vector<128x256xbf16>, vector<256x512xbf16>, vector<128x512xf32> -> vector<128x512xf32>
    %10 = arith.addf %7, %9 : vector<128x512xf32>
    %c0_5 = arith.constant 0 : index
    %c0_6 = arith.constant 0 : index
    %11 = vector.load %arg7[%c0_5, %c0_6] : memref<128x512xf32, #tpu.memory_space<vmem>>, vector<128x512xf32>
    tpu.vector_store %arg7[%c0_5, %c0_6], %10 {strides = array<i32>} : memref<128x512xf32, #tpu.memory_space<vmem>>, vector<128x512xf32>,
    %c0_i32_7 = arith.constant 0 : i32
    %12 = arith.cmpi eq, %arg1, %c0_i32_7 : i32
    %13 = arith.extui %12 : i1 to i32
    %c0_i32_8 = arith.constant 0 : i32
    %14 = arith.cmpi ne, %13, %c0_i32_8 : i32
    scf.if %14 {
      %c0_9 = arith.constant 0 : index
      %c0_10 = arith.constant 0 : index
      %15 = vector.load %arg7[%c0_9, %c0_10] : memref<128x512xf32, #tpu.memory_space<vmem>>, vector<128x512xf32>
      %cst_11 = arith.constant dense<0.000000e+00> : vector<512xf32>
      %16 = vector.multi_reduction <add>, %15, %cst_11 [0] : vector<128x512xf32> to vector<512xf32>
      %17 = vector.shape_cast %16 : vector<512xf32> to vector<1x512xf32>
      %18 = arith.mulf %15, %15 : vector<128x512xf32>
      %cst_12 = arith.constant dense<0.000000e+00> : vector<512xf32>
      %19 = vector.multi_reduction <add>, %18, %cst_12 [0] : vector<128x512xf32> to vector<512xf32>
      %20 = vector.shape_cast %19 : vector<512xf32> to vector<1x512xf32>
      %cst_13 = arith.constant 7.812500e-03 : f32
      %21 = vector.broadcast %cst_13 : f32 to vector<1x512xf32>
      %22 = arith.mulf %17, %21 : vector<1x512xf32>
      %cst_14 = arith.constant 7.812500e-03 : f32
      %23 = vector.broadcast %cst_14 : f32 to vector<1x512xf32>
      %24 = arith.mulf %20, %23 : vector<1x512xf32>
      %25 = arith.mulf %22, %22 : vector<1x512xf32>
      %26 = arith.subf %24, %25 : vector<1x512xf32>
      %c0_15 = arith.constant 0 : index
      %c0_16 = arith.constant 0 : index
      %27 = vector.load %arg4[%c0_15, %c0_16] : memref<1x512xf32, #tpu.memory_space<vmem>>, vector<1x512xf32>
      %cst_17 = arith.constant 9.99999974E-6 : f32
      %28 = vector.broadcast %cst_17 : f32 to vector<1x512xf32>
      %29 = arith.addf %26, %28 : vector<1x512xf32>
      %30 = math.rsqrt %29 : vector<1x512xf32>
      %31 = arith.mulf %27, %30 : vector<1x512xf32>
      %c0_18 = arith.constant 0 : index
      %c0_19 = arith.constant 0 : index
      %32 = vector.load %arg5[%c0_18, %c0_19] : memref<1x512xf32, #tpu.memory_space<vmem>>, vector<1x512xf32>
      %33 = arith.mulf %22, %31 : vector<1x512xf32>
      %34 = arith.subf %32, %33 : vector<1x512xf32>
      %35 = vector.broadcast %31 : vector<1x512xf32> to vector<128x512xf32>
      %36 = arith.mulf %15, %35 : vector<128x512xf32>
      %37 = vector.broadcast %34 : vector<1x512xf32> to vector<128x512xf32>
      %38 = arith.addf %36, %37 : vector<128x512xf32>
      %cst_20 = arith.constant 0.000000e+00 : f32
      %39 = vector.broadcast %cst_20 : f32 to vector<128x512xf32>
      %40 = arith.maximumf %38, %39 : vector<128x512xf32>
      %41 = arith.truncf %40 : vector<128x512xf32> to vector<128x512xbf16>
      %c0_21 = arith.constant 0 : index
      %c0_22 = arith.constant 0 : index
      %42 = vector.load %arg6[%c0_21, %c0_22] : memref<128x512xbf16, #tpu.memory_space<vmem>>, vector<128x512xbf16>
      tpu.vector_store %arg6[%c0_21, %c0_22], %41 {strides = array<i32>} : memref<128x512xbf16, #tpu.memory_space<vmem>>, vector<128x512xbf16>,
    } else {
    }
    return
  }
  func.func @transform_0(%arg0: i32, %arg1: i32) -> (i32, i32) {
    %c0_i32 = arith.constant 0 : i32
    %c0_i32_0 = arith.constant 0 : i32
    %c0_i32_1 = arith.constant 0 : i32
    return %c0_i32, %c0_i32_0 : i32, i32
  }
  func.func @transform_1(%arg0: i32, %arg1: i32) -> (i32, i32) {
    %c0_i32 = arith.constant 0 : i32
    return %arg1, %arg0 : i32, i32
  }
  func.func @transform_2(%arg0: i32, %arg1: i32) -> (i32, i32) {
    %c0_i32 = arith.constant 0 : i32
    %c0_i32_0 = arith.constant 0 : i32
    return %c0_i32, %arg0 : i32, i32
  }
  func.func @transform_3(%arg0: i32, %arg1: i32) -> (i32, i32) {
    %c0_i32 = arith.constant 0 : i32
    %c0_i32_0 = arith.constant 0 : i32
    return %c0_i32, %arg0 : i32, i32
  }
  func.func @transform_4(%arg0: i32, %arg1: i32) -> (i32, i32) {
    %c0_i32 = arith.constant 0 : i32
    %c0_i32_0 = arith.constant 0 : i32
    return %c0_i32, %arg0 : i32, i32
  }
}

module attributes {stable_mosaic.version = 11 : i64} {
  func.func @_linear_kernel(%arg0: i32, %arg1: i32, %arg2: memref<128x512xbf16, #tpu.memory_space<vmem>>, %arg3: memref<512x128xbf16, #tpu.memory_space<vmem>>, %arg4: memref<128x128xf32, #tpu.memory_space<vmem>>, %arg5: memref<128x128xf32, #tpu.memory_space<vmem>>) attributes {dimension_semantics = [#tpu.dimension_semantics<parallel>, #tpu.dimension_semantics<arbitrary>], iteration_bounds = array<i64: 1, 1>, scalar_prefetch = 0 : i64, scratch_operands = 1 : i64, tpu.core_type = #tpu.core_type<tc>, window_params = [{pipeline_mode = #tpu.pipeline_mode<synchronous>, transform_indices = @transform_0, window_bounds = array<i64: 128, 512>}, {transform_indices = @transform_1, window_bounds = array<i64: 512, 128>}, {transform_indices = @transform_2, window_bounds = array<i64: 128, 128>}]} {
    %c0_i32 = arith.constant 0 : i32
    %0 = arith.cmpi eq, %arg1, %c0_i32 : i32
    %1 = arith.extui %0 : i1 to i32
    %c0_i32_0 = arith.constant 0 : i32
    %2 = arith.cmpi ne, %1, %c0_i32_0 : i32
    scf.if %2 {
      %cst_9 = arith.constant 0.000000e+00 : f32
      %15 = vector.broadcast %cst_9 : f32 to vector<128x128xf32>
      %c0_10 = arith.constant 0 : index
      %c0_11 = arith.constant 0 : index
      %16 = vector.load %arg5[%c0_10, %c0_11] : memref<128x128xf32, #tpu.memory_space<vmem>>, vector<128x128xf32>
      tpu.vector_store %arg5[%c0_10, %c0_11], %15 {strides = array<i32>} : memref<128x128xf32, #tpu.memory_space<vmem>>, vector<128x128xf32>,
    } else {
    }
    %c512_i32 = arith.constant 512 : i32
    %3 = arith.muli %arg1, %c512_i32 : i32
    %4 = tpu.assume_multiple %3, 512 : i32
    %c0 = arith.constant 0 : index
    %5 = arith.index_cast %4 : i32 to index
    %6 = vector.load %arg2[%c0, %5] : memref<128x512xbf16, #tpu.memory_space<vmem>>, vector<128x512xbf16>
    %c0_1 = arith.constant 0 : index
    %c0_2 = arith.constant 0 : index
    %7 = vector.load %arg5[%c0_1, %c0_2] : memref<128x128xf32, #tpu.memory_space<vmem>>, vector<128x128xf32>
    %c0_3 = arith.constant 0 : index
    %c0_4 = arith.constant 0 : index
    %8 = vector.load %arg3[%c0_3, %c0_4] : memref<512x128xbf16, #tpu.memory_space<vmem>>, vector<512x128xbf16>
    %cst = arith.constant dense<0.000000e+00> : vector<128x128xf32>
    %9 = tpu.matmul %6, %8, %cst {dimension_numbers = #tpu.dot_dimension_numbers<[1], [0], [0], [1], [0, 0, 1, 1], [], []>} : vector<128x512xbf16>, vector<512x128xbf16>, vector<128x128xf32> -> vector<128x128xf32>
    %10 = arith.addf %7, %9 : vector<128x128xf32>
    %c0_5 = arith.constant 0 : index
    %c0_6 = arith.constant 0 : index
    %11 = vector.load %arg5[%c0_5, %c0_6] : memref<128x128xf32, #tpu.memory_space<vmem>>, vector<128x128xf32>
    tpu.vector_store %arg5[%c0_5, %c0_6], %10 {strides = array<i32>} : memref<128x128xf32, #tpu.memory_space<vmem>>, vector<128x128xf32>,
    %c0_i32_7 = arith.constant 0 : i32
    %12 = arith.cmpi eq, %arg1, %c0_i32_7 : i32
    %13 = arith.extui %12 : i1 to i32
    %c0_i32_8 = arith.constant 0 : i32
    %14 = arith.cmpi ne, %13, %c0_i32_8 : i32
    scf.if %14 {
      %c0_9 = arith.constant 0 : index
      %c0_10 = arith.constant 0 : index
      %15 = vector.load %arg5[%c0_9, %c0_10] : memref<128x128xf32, #tpu.memory_space<vmem>>, vector<128x128xf32>
      %c0_11 = arith.constant 0 : index
      %c0_12 = arith.constant 0 : index
      %16 = vector.load %arg4[%c0_11, %c0_12] : memref<128x128xf32, #tpu.memory_space<vmem>>, vector<128x128xf32>
      tpu.vector_store %arg4[%c0_11, %c0_12], %15 {strides = array<i32>} : memref<128x128xf32, #tpu.memory_space<vmem>>, vector<128x128xf32>,
    } else {
    }
    return
  }
  func.func @transform_0(%arg0: i32, %arg1: i32) -> (i32, i32) {
    %c0_i32 = arith.constant 0 : i32
    %c0_i32_0 = arith.constant 0 : i32
    %c0_i32_1 = arith.constant 0 : i32
    return %c0_i32, %c0_i32_0 : i32, i32
  }
  func.func @transform_1(%arg0: i32, %arg1: i32) -> (i32, i32) {
    %c0_i32 = arith.constant 0 : i32
    return %arg1, %arg0 : i32, i32
  }
  func.func @transform_2(%arg0: i32, %arg1: i32) -> (i32, i32) {
    %c0_i32 = arith.constant 0 : i32
    %c0_i32_0 = arith.constant 0 : i32
    return %c0_i32, %arg0 : i32, i32
  }
}

</mosaic_0001>

<bundles_post_ra>
// kernel: projector_forward.5
= control target key start
LH: loop header
LB: loop body
LE: loop exit
PB: predicated region body
PF: predicated region fallthrough
CT: control target
= control target key end

     0   :  { %s1302_s0 = inlined_call_operand.vmem [shape: bf16[128,512], index: 0, kind: input, shape index: {}]   ;;  %s1303_s1 = inlined_call_operand.vmem [shape: bf16[512,128], index: 1, kind: input, shape index: {}]   ;;  %s1304_s2 = inlined_call_operand.hbm [shape: f32[128,128], index: 2, kind: output, shape index: {}]  }
   0x1   :  { %v976_v0 = vld [vmem:[%s1303_s1 + $0x40] sm:$0xff]   ;;  %v980_v4 = vld [vmem:[%s1303_s1 + $0x48] sm:$0xff]   ;;  %v984_v8 = vld [vmem:[%s1303_s1 + $0x50] sm:$0xff]  }
   0x2   :  { %v977_v1 = vld [vmem:[%s1303_s1 + $0xc0] sm:$0xff]   ;;  %845 = vmatprep.subr.bf16.mxu0 %v976_v0  ;;  %v981_v5 = vld [vmem:[%s1303_s1 + $0xc8] sm:$0xff]   ;;  %v985_v9 = vld [vmem:[%s1303_s1 + $0xd0] sm:$0xff]  }
   0x3   :  { %v978_v2 = vld [vmem:[%s1303_s1] sm:$0xff]   ;;  %909 = vmatprep.subr.bf16.mxu1 %v977_v1  ;;  %v982_v6 = vld [vmem:[%s1303_s1 + $0x8] sm:$0xff]   ;;  %v986_v10 = vld [vmem:[%s1303_s1 + $0x10] sm:$0xff]  }
   0x4   :  { %v979_v3 = vld [vmem:[%s1303_s1 + $0x80] sm:$0xff]   ;;  %846 = vmatpush3.bf16.msra.mxu0 %v978_v2  ;;  %v983_v7 = vld [vmem:[%s1303_s1 + $0x88] sm:$0xff]   ;;  %v987_v11 = vld [vmem:[%s1303_s1 + $0x90] sm:$0xff]  }
   0x5   :  { %910 = vmatpush3.bf16.msra.mxu1 %v979_v3  ;;  %847 = vmatprep.subr.bf16.mxu0 %v980_v4  ;;  %v988_v12 = vld [vmem:[%s1303_s1 + $0x58] sm:$0xff]   ;;  %v992_v16 = vld [vmem:[%s1303_s1 + $0x60] sm:$0xff]   ;;  %v996_v20 = vld [vmem:[%s1303_s1 + $0x68] sm:$0xff]  }
   0x6   :  { %911 = vmatprep.subr.bf16.mxu1 %v981_v5  ;;  %v989_v13 = vld [vmem:[%s1303_s1 + $0xd8] sm:$0xff]   ;;  %v993_v17 = vld [vmem:[%s1303_s1 + $0xe0] sm:$0xff]   ;;  %v997_v21 = vld [vmem:[%s1303_s1 + $0xe8] sm:$0xff]  }
   0x7   :  { %v990_v14 = vld [vmem:[%s1303_s1 + $0x18] sm:$0xff]   ;;  %v994_v18 = vld [vmem:[%s1303_s1 + $0x20] sm:$0xff]   ;;  %v998_v22 = vld [vmem:[%s1303_s1 + $0x28] sm:$0xff]  }
   0x8   :  { %848 = vmatpush3.bf16.msra.mxu0 %v982_v6  ;;  %v991_v15 = vld [vmem:[%s1303_s1 + $0x98] sm:$0xff]   ;;  %v995_v19 = vld [vmem:[%s1303_s1 + $0xa0] sm:$0xff]   ;;  %v999_v23 = vld [vmem:[%s1303_s1 + $0xa8] sm:$0xff]  }
   0x9   :  { %912 = vmatpush3.bf16.msra.mxu1 %v983_v7  ;;  %849 = vmatprep.subr.bf16.mxu0 %v984_v8  ;;  %v1000_v24 = vld [vmem:[%s1303_s1 + $0x70] sm:$0xff]   ;;  %v1004_v28 = vld [vmem:[%s1303_s1 + $0x78] sm:$0xff]  }
   0xa   :  { %913 = vmatprep.subr.bf16.mxu1 %v985_v9  ;;  %v1001_v25 = vld [vmem:[%s1303_s1 + $0xf0] sm:$0xff]   ;;  %v1005_v29 = vld [vmem:[%s1303_s1 + $0xf8] sm:$0xff]  }
   0xb   :  { %v1002_v26 = vld [vmem:[%s1303_s1 + $0x30] sm:$0xff]   ;;  %v1006_v30 = vld [vmem:[%s1303_s1 + $0x38] sm:$0xff]  }
   0xc   :  { %850 = vmatpush3.bf16.msra.mxu0 %v986_v10  ;;  %v1003_v27 = vld [vmem:[%s1303_s1 + $0xb0] sm:$0xff]   ;;  %v1007_v31 = vld [vmem:[%s1303_s1 + $0xb8] sm:$0xff]  }
   0xd   :  { %914 = vmatpush3.bf16.msra.mxu1 %v987_v11  ;;  %851 = vmatprep.subr.bf16.mxu0 %v988_v12  ;;  %v1008_v32 = vld [vmem:[%s1302_s0] ss:$16 sps:$4 sm:$0xff]   ;;  %v1010_v33 = vld [vmem:[%s1302_s0 + $0x4] ss:$16 sps:$4 sm:$0xff]   ;;  %v1011_v34 = vld [vmem:[%s1302_s0 + $0x8] ss:$16 sps:$4 sm:$0xff]  }
   0xe   :  { %915 = vmatprep.subr.bf16.mxu1 %v989_v13  ;;  %v1013_v35 = vld [vmem:[%s1302_s0 + $0xc] ss:$16 sps:$4 sm:$0xff]   ;;  %534 = vmatprep.mubr.bf16.mxu0 %v1010_v33  ;;  %v1014_v36 = vld [vmem:[%s1302_s0 + $0x24] ss:$16 sps:$4 sm:$0xff]   ;;  %v1018_v38 = vld [vmem:[%s1302_s0 + $0x20] ss:$16 sps:$4 sm:$0xff]  }
   0xf   :  { %631 = vmatprep.mubr.bf16.mxu1 %v1013_v35  ;;  %v1016_v37 = vld [vmem:[%s1302_s0 + $0x2c] ss:$16 sps:$4 sm:$0xff]   ;;  %v1019_v39 = vld [vmem:[%s1302_s0 + $0x28] ss:$16 sps:$4 sm:$0xff]   ;;  %v1020_v40 = vld [vmem:[%s1302_s0 + $0x44] ss:$16 sps:$4 sm:$0xff]  }
  0x10   :  { %852 = vmatpush3.bf16.msra.mxu0 %v990_v14  ;;  %v1022_v41 = vld [vmem:[%s1302_s0 + $0x4c] ss:$16 sps:$4 sm:$0xff]   ;;  %v1024_v42 = vld [vmem:[%s1302_s0 + $0x40] ss:$16 sps:$4 sm:$0xff]   ;;  %v1025_v43 = vld [vmem:[%s1302_s0 + $0x48] ss:$16 sps:$4 sm:$0xff]  }
  0x11   :  { %916 = vmatpush3.bf16.msra.mxu1 %v991_v15  ;;  %853 = vmatprep.subr.bf16.mxu0 %v992_v16  ;;  %v1026_v44 = vld [vmem:[%s1302_s0 + $0x64] ss:$16 sps:$4 sm:$0xff]   ;;  %v1028_v45 = vld [vmem:[%s1302_s0 + $0x6c] ss:$16 sps:$4 sm:$0xff]  }
  0x12   :  { %917 = vmatprep.subr.bf16.mxu1 %v993_v17 }
  0x14   :  { %854 = vmatpush3.bf16.msra.mxu0 %v994_v18 }
  0x15   :  { %918 = vmatpush3.bf16.msra.mxu1 %v995_v19  ;;  %855 = vmatprep.subr.bf16.mxu0 %v996_v20 }
  0x16   :  { %919 = vmatprep.subr.bf16.mxu1 %v997_v21 }
  0x18   :  { %856 = vmatpush3.bf16.msra.mxu0 %v998_v22 }
  0x19   :  { %920 = vmatpush3.bf16.msra.mxu1 %v999_v23  ;;  %857 = vmatprep.subr.bf16.mxu0 %v1000_v24 }
  0x1a   :  { %921 = vmatprep.subr.bf16.mxu1 %v1001_v25 }
  0x1c   :  { %858 = vmatpush3.bf16.msra.mxu0 %v1002_v26 }
  0x1d   :  { %922 = vmatpush3.bf16.msra.mxu1 %v1003_v27  ;;  %859 = vmatprep.subr.bf16.mxu0 %v1004_v28 }
  0x1e   :  { %923 = vmatprep.subr.bf16.mxu1 %v1005_v29 }
  0x20   :  { %860 = vmatpush3.bf16.msra.mxu0 %v1006_v30 }
  0x21   :  { %924 = vmatpush3.bf16.msra.mxu1 %v1007_v31 }
  0x23   :  { %535 = vmatmul.mubr.bf16.vlgmr.msra.gmra.mrb[0].mxu0 %v1008_v32 }
  0x24   :  { %632 = vmatmul.mubr.bf16.vlgmr.msra.gmra.mrb[0].mxu1 %v1011_v34  ;;  %542 = vmatprep.mubr.bf16.mxu0 %v1014_v36 }
  0x25   :  { %639 = vmatprep.mubr.bf16.mxu1 %v1016_v37 }
  0x2b   :  { %543 = vmatmul.mubr.bf16.gmra.mrb[4].mxu0 %v1018_v38 }
  0x2c   :  { %640 = vmatmul.mubr.bf16.gmra.mrb[4].mxu1 %v1019_v39  ;;  %550 = vmatprep.mubr.bf16.mxu0 %v1020_v40 }
  0x2d   :  { %647 = vmatprep.mubr.bf16.mxu1 %v1022_v41 }
  0x33   :  { %551 = vmatmul.mubr.bf16.gmra.mrb[8].mxu0 %v1024_v42 }
  0x34   :  { %648 = vmatmul.mubr.bf16.gmra.mrb[8].mxu1 %v1025_v43  ;;  %558 = vmatprep.mubr.bf16.mxu0 %v1026_v44 }
  0x35   :  { %7 = vsyncpa [#allocation4], 0  ;;  %655 = vmatprep.mubr.bf16.mxu1 %v1028_v45  ;;  %v1030_v46 = vld [vmem:[%s1302_s0 + $0x60] ss:$16 sps:$4 sm:$0xff]   ;;  %v1031_v47 = vld [vmem:[%s1302_s0 + $0x68] ss:$16 sps:$4 sm:$0xff]  }
  0x36   :  { %v1032_v48 = vld [vmem:[%s1302_s0 + $0x84] ss:$16 sps:$4 sm:$0xff]   ;;  %v1034_v49 = vld [vmem:[%s1302_s0 + $0x8c] ss:$16 sps:$4 sm:$0xff]   ;;  %v1036_v50 = vld [vmem:[%s1302_s0 + $0x80] ss:$16 sps:$4 sm:$0xff]  }
  0x37   :  { %v1037_v51 = vld [vmem:[%s1302_s0 + $0x88] ss:$16 sps:$4 sm:$0xff]   ;;  %v1038_v52 = vld [vmem:[%s1302_s0 + $0xa4] ss:$16 sps:$4 sm:$0xff]   ;;  %v1040_v53 = vld [vmem:[%s1302_s0 + $0xac] ss:$16 sps:$4 sm:$0xff]  }
  0x38   :  { %v1042_v54 = vld [vmem:[%s1302_s0 + $0xa0] ss:$16 sps:$4 sm:$0xff]   ;;  %v1043_v55 = vld [vmem:[%s1302_s0 + $0xa8] ss:$16 sps:$4 sm:$0xff]   ;;  %v1044_v56 = vld [vmem:[%s1302_s0 + $0xc4] ss:$16 sps:$4 sm:$0xff]  }
  0x39   :  { %v1046_v57 = vld [vmem:[%s1302_s0 + $0xcc] ss:$16 sps:$4 sm:$0xff]   ;;  %v1048_v58 = vld [vmem:[%s1302_s0 + $0xc0] ss:$16 sps:$4 sm:$0xff]   ;;  %v1049_v59 = vld [vmem:[%s1302_s0 + $0xc8] ss:$16 sps:$4 sm:$0xff]  }
  0x3a   :  { %v1050_v60 = vld [vmem:[%s1302_s0 + $0xe4] ss:$16 sps:$4 sm:$0xff]   ;;  %v1052_v61 = vld [vmem:[%s1302_s0 + $0xec] ss:$16 sps:$4 sm:$0xff]   ;;  %v1054_v62 = vld [vmem:[%s1302_s0 + $0xe0] ss:$16 sps:$4 sm:$0xff]  }
  0x3b   :  { %559 = vmatmul.mubr.bf16.gmra.mrb[12].mxu0 %v1030_v46  ;;  %v1055_v63 = vld [vmem:[%s1302_s0 + $0xe8] ss:$16 sps:$4 sm:$0xff]   ;;  %s1080_s0 = smov [#allocation3]  }
  0x3c   :  { %656 = vmatmul.mubr.bf16.gmra.mrb[12].mxu1 %v1031_v47  ;;  %566 = vmatprep.mubr.bf16.mxu0 %v1032_v48  ;;  %s768_s23 = sshll.u32 %s1080_s0, 4  ;;  %s769_s23 = int_to_ptr.vmem [resolvable:$true] %s768_s23 }
  0x3d   :  { %663 = vmatprep.mubr.bf16.mxu1 %v1034_v49  ;;  %s1056_s24 = scalar_lea.vmem %s769_s23, 2048  ;;  %p1061_p1 = scmp.lt.s32.totalorder %s769_s23, %s769_s23 }
  0x3e   :  { %p1057_p0 = scmp.ne.s32.totalorder %s769_s23, %s1056_s24  ;;  %p1062_p2 = scmp.lt.s32.totalorder %s1056_s24, %s1056_s24 }
  0x40   :  { %p1063_p3 = por %p1062_p2, %p1061_p1 }
  0x42   :  { %p1064_p4 = pnand %p1063_p3, %p1057_p0 }
  0x43   :  { %567 = vmatmul.mubr.bf16.gmra.mrb[16].mxu0 %v1036_v50 }
  0x44   :  { %664 = vmatmul.mubr.bf16.gmra.mrb[16].mxu1 %v1037_v51  ;;  %574 = vmatprep.mubr.bf16.mxu0 %v1038_v52 }
  0x45   :  { %671 = vmatprep.mubr.bf16.mxu1 %v1040_v53 }
  0x4b   :  { %575 = vmatmul.mubr.bf16.gmra.mrb[20].mxu0 %v1042_v54 }
  0x4c   :  { %672 = vmatmul.mubr.bf16.gmra.mrb[20].mxu1 %v1043_v55  ;;  %582 = vmatprep.mubr.bf16.mxu0 %v1044_v56 }
  0x4d   :  { %679 = vmatprep.mubr.bf16.mxu1 %v1046_v57 }
  0x53   :  { %583 = vmatmul.mubr.bf16.gmra.mrb[24].mxu0 %v1048_v58 }
  0x54   :  { %680 = vmatmul.mubr.bf16.gmra.mrb[24].mxu1 %v1049_v59  ;;  %590 = vmatprep.mubr.bf16.mxu0 %v1050_v60 }
  0x55   :  { %687 = vmatprep.mubr.bf16.mxu1 %v1052_v61 }
  0x5b   :  { %591 = vmatmul.mubr.bf16.gmra.mrb[28].mxu0 %v1054_v62 }
  0x5c   :  { %688 = vmatmul.mubr.bf16.gmra.mrb[28].mxu1 %v1055_v63 }
  0xf6   :  { %v861_v0 = vpop.f32.mrb[0].mxu0 }
  0xf7   :  { %v925_v1 = vpop.f32.mrb[0].mxu1  ;;  %v862_v2 = vpop.f32.mrb[1].mxu0 }
  0xf8   :  { %v863_v3 = vadd.f32 %v862_v2, %v861_v0  ;;  %v926_v4 = vpop.f32.mrb[1].mxu1  ;;  %v864_v5 = vpop.f32.mrb[2].mxu0 }
  0xf9   :  { %v927_v6 = vadd.f32 %v926_v4, %v925_v1  ;;  %v928_v7 = vpop.f32.mrb[2].mxu1  ;;  %v865_v8 = vpop.f32.mrb[3].mxu0 }
  0xfa   :  { %v866_v9 = vadd.f32 %v865_v8, %v864_v5  ;;  %v929_v10 = vpop.f32.mrb[3].mxu1 }
  0xfb   :  { %v634_v11 = vadd.f32 %v927_v6, %v863_v3  ;;  %v930_v12 = vadd.f32 %v929_v10, %v928_v7 }
  0xfd   :  { %747 = vst [vmem:[#allocation3] sm:$0xff] %v634_v11  ;;  %v637_v13 = vadd.f32 %v930_v12, %v866_v9 }
  0xfe   :  { %v867_v14 = vpop.f32.mrb[4].mxu0 }
  0xff   :  { %748 = vst [vmem:[#allocation3 + $0x8] sm:$0xff] %v637_v13  ;;  %v931_v15 = vpop.f32.mrb[4].mxu1  ;;  %v868_v16 = vpop.f32.mrb[5].mxu0 }
 0x100   :  { %v869_v17 = vadd.f32 %v868_v16, %v867_v14  ;;  %v932_v18 = vpop.f32.mrb[5].mxu1  ;;  %v870_v19 = vpop.f32.mrb[6].mxu0 }
 0x101   :  { %v933_v20 = vadd.f32 %v932_v18, %v931_v15  ;;  %v934_v21 = vpop.f32.mrb[6].mxu1  ;;  %v871_v22 = vpop.f32.mrb[7].mxu0 }
 0x102   :  { %v872_v23 = vadd.f32 %v871_v22, %v870_v19  ;;  %v935_v24 = vpop.f32.mrb[7].mxu1 }
 0x103   :  { %v642_v25 = vadd.f32 %v933_v20, %v869_v17  ;;  %v936_v26 = vadd.f32 %v935_v24, %v934_v21 }
 0x105   :  { %749 = vst [vmem:[#allocation3 + $0x10] sm:$0xff] %v642_v25  ;;  %v645_v27 = vadd.f32 %v936_v26, %v872_v23 }
 0x106   :  { %v873_v28 = vpop.f32.mrb[8].mxu0 }
 0x107   :  { %750 = vst [vmem:[#allocation3 + $0x18] sm:$0xff] %v645_v27  ;;  %v937_v29 = vpop.f32.mrb[8].mxu1  ;;  %v874_v30 = vpop.f32.mrb[9].mxu0 }
 0x108   :  { %v875_v31 = vadd.f32 %v874_v30, %v873_v28  ;;  %v938_v32 = vpop.f32.mrb[9].mxu1  ;;  %v876_v33 = vpop.f32.mrb[10].mxu0 }
 0x109   :  { %v939_v34 = vadd.f32 %v938_v32, %v937_v29  ;;  %v940_v35 = vpop.f32.mrb[10].mxu1  ;;  %v877_v36 = vpop.f32.mrb[11].mxu0 }
 0x10a   :  { %v878_v37 = vadd.f32 %v877_v36, %v876_v33  ;;  %v941_v38 = vpop.f32.mrb[11].mxu1 }
 0x10b   :  { %v650_v39 = vadd.f32 %v939_v34, %v875_v31  ;;  %v942_v40 = vadd.f32 %v941_v38, %v940_v35 }
 0x10d   :  { %751 = vst [vmem:[#allocation3 + $0x20] sm:$0xff] %v650_v39  ;;  %v653_v41 = vadd.f32 %v942_v40, %v878_v37 }
 0x10e   :  { %v879_v42 = vpop.f32.mrb[12].mxu0 }
 0x10f   :  { %752 = vst [vmem:[#allocation3 + $0x28] sm:$0xff] %v653_v41  ;;  %v943_v43 = vpop.f32.mrb[12].mxu1  ;;  %v880_v44 = vpop.f32.mrb[13].mxu0 }
 0x110   :  { %v881_v45 = vadd.f32 %v880_v44, %v879_v42  ;;  %v944_v46 = vpop.f32.mrb[13].mxu1  ;;  %v882_v47 = vpop.f32.mrb[14].mxu0 }
 0x111   :  { %v945_v48 = vadd.f32 %v944_v46, %v943_v43  ;;  %v946_v49 = vpop.f32.mrb[14].mxu1  ;;  %v883_v50 = vpop.f32.mrb[15].mxu0 }
 0x112   :  { %v884_v51 = vadd.f32 %v883_v50, %v882_v47  ;;  %v947_v52 = vpop.f32.mrb[15].mxu1 }
 0x113   :  { %v658_v53 = vadd.f32 %v945_v48, %v881_v45  ;;  %v948_v54 = vadd.f32 %v947_v52, %v946_v49 }
 0x115   :  { %753 = vst [vmem:[#allocation3 + $0x30] sm:$0xff] %v658_v53  ;;  %v661_v55 = vadd.f32 %v948_v54, %v884_v51 }
 0x116   :  { %v885_v56 = vpop.f32.mrb[16].mxu0 }
 0x117   :  { %754 = vst [vmem:[#allocation3 + $0x38] sm:$0xff] %v661_v55  ;;  %v949_v57 = vpop.f32.mrb[16].mxu1  ;;  %v886_v58 = vpop.f32.mrb[17].mxu0 }
 0x118   :  { %v887_v59 = vadd.f32 %v886_v58, %v885_v56  ;;  %v950_v60 = vpop.f32.mrb[17].mxu1  ;;  %v888_v61 = vpop.f32.mrb[18].mxu0 }
 0x119   :  { %v951_v62 = vadd.f32 %v950_v60, %v949_v57  ;;  %v952_v63 = vpop.f32.mrb[18].mxu1  ;;  %v889_v0 = vpop.f32.mrb[19].mxu0 }
 0x11a   :  { %v890_v1 = vadd.f32 %v889_v0, %v888_v61  ;;  %v953_v2 = vpop.f32.mrb[19].mxu1 }
 0x11b   :  { %v666_v3 = vadd.f32 %v951_v62, %v887_v59  ;;  %v954_v4 = vadd.f32 %v953_v2, %v952_v63 }
 0x11d   :  { %755 = vst [vmem:[#allocation3 + $0x40] sm:$0xff] %v666_v3  ;;  %v669_v5 = vadd.f32 %v954_v4, %v890_v1 }
 0x11e   :  { %v891_v6 = vpop.f32.mrb[20].mxu0 }
 0x11f   :  { %756 = vst [vmem:[#allocation3 + $0x48] sm:$0xff] %v669_v5  ;;  %v955_v7 = vpop.f32.mrb[20].mxu1  ;;  %v892_v8 = vpop.f32.mrb[21].mxu0 }
 0x120   :  { %v893_v9 = vadd.f32 %v892_v8, %v891_v6  ;;  %v956_v10 = vpop.f32.mrb[21].mxu1  ;;  %v894_v11 = vpop.f32.mrb[22].mxu0 }
 0x121   :  { %v957_v12 = vadd.f32 %v956_v10, %v955_v7  ;;  %v958_v13 = vpop.f32.mrb[22].mxu1  ;;  %v895_v14 = vpop.f32.mrb[23].mxu0 }
 0x122   :  { %v896_v15 = vadd.f32 %v895_v14, %v894_v11  ;;  %v959_v16 = vpop.f32.mrb[23].mxu1 }
 0x123   :  { %v674_v17 = vadd.f32 %v957_v12, %v893_v9  ;;  %v960_v18 = vadd.f32 %v959_v16, %v958_v13 }
 0x125   :  { %757 = vst [vmem:[#allocation3 + $0x50] sm:$0xff] %v674_v17  ;;  %v677_v19 = vadd.f32 %v960_v18, %v896_v15 }
 0x126   :  { %v897_v20 = vpop.f32.mrb[24].mxu0 }
 0x127   :  { %758 = vst [vmem:[#allocation3 + $0x58] sm:$0xff] %v677_v19  ;;  %v961_v21 = vpop.f32.mrb[24].mxu1  ;;  %v898_v22 = vpop.f32.mrb[25].mxu0 }
 0x128   :  { %v899_v23 = vadd.f32 %v898_v22, %v897_v20  ;;  %v962_v24 = vpop.f32.mrb[25].mxu1  ;;  %v900_v25 = vpop.f32.mrb[26].mxu0 }
 0x129   :  { %v963_v26 = vadd.f32 %v962_v24, %v961_v21  ;;  %v964_v27 = vpop.f32.mrb[26].mxu1  ;;  %v901_v28 = vpop.f32.mrb[27].mxu0 }
 0x12a   :  { %v902_v29 = vadd.f32 %v901_v28, %v900_v25  ;;  %v965_v30 = vpop.f32.mrb[27].mxu1 }
 0x12b   :  { %v682_v31 = vadd.f32 %v963_v26, %v899_v23  ;;  %v966_v32 = vadd.f32 %v965_v30, %v964_v27 }
 0x12d   :  { %759 = vst [vmem:[#allocation3 + $0x60] sm:$0xff] %v682_v31  ;;  %v685_v33 = vadd.f32 %v966_v32, %v902_v29 }
 0x12e   :  { %v903_v34 = vpop.f32.mrb[28].mxu0 }
 0x12f   :  { %760 = vst [vmem:[#allocation3 + $0x68] sm:$0xff] %v685_v33  ;;  %v967_v35 = vpop.f32.mrb[28].mxu1  ;;  %v904_v36 = vpop.f32.mrb[29].mxu0 }
 0x130   :  { %v905_v37 = vadd.f32 %v904_v36, %v903_v34  ;;  %v968_v38 = vpop.f32.mrb[29].mxu1  ;;  %v906_v39 = vpop.f32.mrb[30].mxu0 }
 0x131   :  { %v969_v40 = vadd.f32 %v968_v38, %v967_v35  ;;  %v970_v41 = vpop.f32.mrb[30].mxu1  ;;  %v907_v42 = vpop.f32.mrb[31].mxu0 }
 0x132   :  { %v908_v43 = vadd.f32 %v907_v42, %v906_v39  ;;  %v971_v44 = vpop.f32.mrb[31].mxu1 }
 0x133   :  { %v690_v45 = vadd.f32 %v969_v40, %v905_v37  ;;  %v972_v46 = vadd.f32 %v971_v44, %v970_v41 }
 0x135   :  { %761 = vst [vmem:[#allocation3 + $0x70] sm:$0xff] %v690_v45  ;;  %v693_v47 = vadd.f32 %v972_v46, %v908_v43 }
 0x137   :  { %762 = vst [vmem:[#allocation3 + $0x78] sm:$0xff] %v693_v47 }
 0x138   :  { %1067 = shalt.err (!%p1064_p4)
}
 0x139   :  { %s1068_s26 = scalar_lea.hbm %s1304_s2, 2048 }
 0x13a   :  { %p1069_p5 = scmp.ne.s32.totalorder %s1304_s2, %s1068_s26  ;;  %p1072_p6 = scmp.lt.u32.totalorder %s1068_s26, %s1304_s2 }
 0x13c   :  { %p1074_p7 = pnand %p1072_p6, %p1069_p5 }
 0x13e   :  { %1077 = shalt.err (!%p1074_p7)
}
 0x13f   :  { %s1081_s3 = smov 128   ;;  %s1082_s4 = smov 8  }
 0x140   :  { %774 = dma.vmem_to_hbm [thread:$0]  %s769_s23, 2048, %s1304_s2, [#allocation4], %s1081_s3, %s1081_s3, %s1082_s4  }
 0x141   :  { %1078 = dma.done.wait [#allocation4], 2048  }
 0x142   :  { %1079 = vsyncadd [#allocation4], 4294965248 }
 0x143   :  { %778 = vsyncpa [#allocation4], 1 }

// kernel: projector_forward.3
= control target key start
LH: loop header
LB: loop body
LE: loop exit
PB: predicated region body
PF: predicated region fallthrough
CT: control target
= control target key end

     0   :  { %9 = vsyncpa [#allocation4], 0  ;;  %s3391_s0 = inlined_call_operand.vmem [shape: bf16[128,256], index: 0, kind: input, shape index: {}]   ;;  %s3392_s1 = inlined_call_operand.hbm [shape: bf16[256,512], index: 1, kind: input, shape index: {}]   ;;  %s3393_s2 = inlined_call_operand.hbm [shape: f32[1,512], index: 2, kind: input, shape index: {}]   ;;  %s3394_s3 = inlined_call_operand.hbm [shape: f32[1,512], index: 3, kind: input, shape index: {}]   ;;  %s3395_s4 = inlined_call_operand.vmem [shape: bf16[128,512], index: 4, kind: output, shape index: {}]  }
   0x1   :  { %10 = vsyncpa [#allocation6], 0  ;;  %s2228_s15 = smov [#allocation5]   ;;  %s2229_s17 = smov [#allocation3]  }
   0x2   :  { %s31_s16 = sshll.u32 %s2228_s15, 4  ;;  %s18_s18 = sshll.u32 %s2229_s17, 4  ;;  %s32_s16 = int_to_ptr.vmem [resolvable:$true] %s31_s16  ;;  %s2259_s18 = int_to_ptr.vmem [resolvable:$true] %s18_s18 }
   0x3   :  { %s2158_s21 = scalar_lea.hbm %s3393_s2, 64 }
   0x4   :  { %p2159_p0 = scmp.ne.s32.totalorder %s3393_s2, %s2158_s21  ;;  %p2162_p1 = scmp.lt.u32.totalorder %s2158_s21, %s3393_s2 }
   0x6   :  { %p2164_p2 = pnand %p2162_p1, %p2159_p0 }
   0x8   :  { %2167 = shalt.err (!%p2164_p2)
}
   0x9   :  { %s2168_s26 = scalar_lea.vmem %s32_s16, 64  ;;  %p2173_p4 = scmp.lt.s32.totalorder %s32_s16, %s32_s16 }
   0xa   :  { %p2169_p3 = scmp.ne.s32.totalorder %s32_s16, %s2168_s26  ;;  %p2174_p5 = scmp.lt.s32.totalorder %s2168_s26, %s2168_s26 }
   0xc   :  { %p2175_p6 = por %p2174_p5, %p2173_p4 }
   0xe   :  { %p2176_p7 = pnand %p2175_p6, %p2169_p3 }
  0x10   :  { %2179 = shalt.err (!%p2176_p7)
}
  0x11   :  { %34 = dma.hbm_to_vmem [thread:$0]  %s3393_s2, 64, %s32_s16, [#allocation6]  }
  0x12   :  { %s2180_s5 = scalar_lea.hbm %s3392_s1, 8192 }
  0x13   :  { %p2181_p8 = scmp.ne.s32.totalorder %s3392_s1, %s2180_s5  ;;  %p2184_p9 = scmp.lt.u32.totalorder %s2180_s5, %s3392_s1 }
  0x15   :  { %p2186_p10 = pnand %p2184_p9, %p2181_p8 }
  0x17   :  { %2189 = shalt.err (!%p2186_p10)
}
  0x18   :  { %s2190_s10 = scalar_lea.vmem %s2259_s18, 8192  ;;  %p2195_p12 = scmp.lt.s32.totalorder %s2259_s18, %s2259_s18 }
  0x19   :  { %p2191_p11 = scmp.ne.s32.totalorder %s2259_s18, %s2190_s10  ;;  %p2196_p13 = scmp.lt.s32.totalorder %s2190_s10, %s2190_s10 }
  0x1b   :  { %p2197_p0 = por %p2196_p13, %p2195_p12 }
  0x1d   :  { %p2198_p1 = pnand %p2197_p0, %p2191_p11 }
  0x1f   :  { %2201 = shalt.err (!%p2198_p1)
}
  0x20   :  { %s2230_s2 = smov 256   ;;  %s2231_s11 = smov 16  }
  0x21   :  { %24 = dma.hbm_to_vmem [thread:$0]  %s3392_s1, 8192, %s2259_s18, [#allocation4], %s2230_s2, %s2230_s2, %s2231_s11  }
  0x22   :  { %s2232_s14 = smov [#allocation7]   ;;  %s2202_s19 = scalar_lea.hbm %s3394_s3, 64 }
  0x23   :  { %s41_s15 = sshll.u32 %s2232_s14, 4  ;;  %p2203_p2 = scmp.ne.s32.totalorder %s3394_s3, %s2202_s19  ;;  %s42_s15 = int_to_ptr.vmem [resolvable:$true] %s41_s15 }
  0x24   :  { %p2206_p3 = scmp.lt.u32.totalorder %s2202_s19, %s3394_s3 }
  0x26   :  { %p2208_p4 = pnand %p2206_p3, %p2203_p2 }
  0x28   :  { %2211 = shalt.err (!%p2208_p4)
}
  0x29   :  { %s2212_s24 = scalar_lea.vmem %s42_s15, 64  ;;  %p2217_p6 = scmp.lt.s32.totalorder %s42_s15, %s42_s15 }
  0x2a   :  { %p2213_p5 = scmp.ne.s32.totalorder %s42_s15, %s2212_s24  ;;  %p2218_p7 = scmp.lt.s32.totalorder %s2212_s24, %s2212_s24 }
  0x2c   :  { %p2219_p8 = por %p2218_p7, %p2217_p6 }
  0x2e   :  { %p2220_p9 = pnand %p2219_p8, %p2213_p5 }
  0x30   :  { %2223 = shalt.err (!%p2220_p9)
}
  0x31   :  { %44 = dma.hbm_to_vmem [thread:$0]  %s3394_s3, 64, %s42_s15, [#allocation6]  }
  0x32   :  { %2224 = dma.done.wait [#allocation4], 8192  }
  0x33   :  { %2225 = vsyncadd [#allocation4], 4294959104 }
  0x34   :  { %2226 = dma.done.wait [#allocation6], 128  }
  0x35   :  { %2227 = vsyncadd [#allocation6], 4294967168  ;;  %v2030_v0 = vld [vmem:[#allocation3 + $0x4] ss:$16 sps:$4 sm:$0xff]   ;;  %v2032_v1 = vld [vmem:[#allocation3 + $0xc] ss:$16 sps:$4 sm:$0xff]  }
  0x36   :  { %671 = vmatprep.subr.bf16.mxu0 %v2030_v0  ;;  %v2034_v2 = vld [vmem:[#allocation3] ss:$16 sps:$4 sm:$0xff]   ;;  %v2035_v3 = vld [vmem:[#allocation3 + $0x8] ss:$16 sps:$4 sm:$0xff]   ;;  %784 = vmatprep.subr.bf16.mxu1 %v2032_v1  ;;  %v2036_v4 = vld [vmem:[#allocation3 + $0x24] ss:$16 sps:$4 sm:$0xff]  }
  0x37   :  { %672 = vmatpush1.bf16.msra.mxu0 %v2034_v2  ;;  %785 = vmatpush1.bf16.msra.mxu1 %v2035_v3  ;;  %v2038_v5 = vld [vmem:[#allocation3 + $0x2c] ss:$16 sps:$4 sm:$0xff]   ;;  %v2040_v6 = vld [vmem:[#allocation3 + $0x20] ss:$16 sps:$4 sm:$0xff]   ;;  %v2041_v7 = vld [vmem:[#allocation3 + $0x28] ss:$16 sps:$4 sm:$0xff]  }
  0x38   :  { %673 = vmatprep.subr.bf16.mxu0 %v2036_v4  ;;  %786 = vmatprep.subr.bf16.mxu1 %v2038_v5  ;;  %v2042_v8 = vld [vmem:[#allocation3 + $0x44] ss:$16 sps:$4 sm:$0xff]   ;;  %v2044_v9 = vld [vmem:[#allocation3 + $0x4c] ss:$16 sps:$4 sm:$0xff]   ;;  %v2046_v10 = vld [vmem:[#allocation3 + $0x40] ss:$16 sps:$4 sm:$0xff]  }
  0x39   :  { %v2047_v11 = vld [vmem:[#allocation3 + $0x48] ss:$16 sps:$4 sm:$0xff]   ;;  %v2048_v12 = vld [vmem:[#allocation3 + $0x64] ss:$16 sps:$4 sm:$0xff]   ;;  %v2050_v13 = vld [vmem:[#allocation3 + $0x6c] ss:$16 sps:$4 sm:$0xff]  }
  0x3a   :  { %v2052_v14 = vld [vmem:[#allocation3 + $0x60] ss:$16 sps:$4 sm:$0xff]   ;;  %v2053_v15 = vld [vmem:[#allocation3 + $0x68] ss:$16 sps:$4 sm:$0xff]   ;;  %v2054_v16 = vld [vmem:[#allocation3 + $0x84] ss:$16 sps:$4 sm:$0xff]  }
  0x3b   :  { %674 = vmatpush1.bf16.msra.mxu0 %v2040_v6  ;;  %787 = vmatpush1.bf16.msra.mxu1 %v2041_v7  ;;  %v2056_v17 = vld [vmem:[#allocation3 + $0x8c] ss:$16 sps:$4 sm:$0xff]   ;;  %v2058_v18 = vld [vmem:[#allocation3 + $0x80] ss:$16 sps:$4 sm:$0xff]   ;;  %v2059_v19 = vld [vmem:[#allocation3 + $0x88] ss:$16 sps:$4 sm:$0xff]  }
  0x3c   :  { %675 = vmatprep.subr.bf16.mxu0 %v2042_v8  ;;  %788 = vmatprep.subr.bf16.mxu1 %v2044_v9  ;;  %v2060_v20 = vld [vmem:[#allocation3 + $0xa4] ss:$16 sps:$4 sm:$0xff]   ;;  %v2062_v21 = vld [vmem:[#allocation3 + $0xac] ss:$16 sps:$4 sm:$0xff]   ;;  %v2064_v22 = vld [vmem:[#allocation3 + $0xa0] ss:$16 sps:$4 sm:$0xff]  }
  0x3d   :  { %v2065_v23 = vld [vmem:[#allocation3 + $0xa8] ss:$16 sps:$4 sm:$0xff]   ;;  %v2066_v24 = vld [vmem:[#allocation3 + $0xc4] ss:$16 sps:$4 sm:$0xff]   ;;  %v2068_v25 = vld [vmem:[#allocation3 + $0xcc] ss:$16 sps:$4 sm:$0xff]  }
  0x3e   :  { %v2070_v26 = vld [vmem:[#allocation3 + $0xc0] ss:$16 sps:$4 sm:$0xff]   ;;  %v2071_v27 = vld [vmem:[#allocation3 + $0xc8] ss:$16 sps:$4 sm:$0xff]   ;;  %v2072_v28 = vld [vmem:[#allocation3 + $0xe4] ss:$16 sps:$4 sm:$0xff]  }
  0x3f   :  { %676 = vmatpush1.bf16.msra.mxu0 %v2046_v10  ;;  %789 = vmatpush1.bf16.msra.mxu1 %v2047_v11  ;;  %v2074_v29 = vld [vmem:[#allocation3 + $0xec] ss:$16 sps:$4 sm:$0xff]   ;;  %v2076_v30 = vld [vmem:[#allocation3 + $0xe0] ss:$16 sps:$4 sm:$0xff]   ;;  %v2077_v31 = vld [vmem:[#allocation3 + $0xe8] ss:$16 sps:$4 sm:$0xff]  }
  0x40   :  { %677 = vmatprep.subr.bf16.mxu0 %v2048_v12  ;;  %790 = vmatprep.subr.bf16.mxu1 %v2050_v13  ;;  %v2078_v32 = vld [vmem:[#allocation3 + $0x104] ss:$16 sps:$4 sm:$0xff]   ;;  %v2080_v33 = vld [vmem:[#allocation3 + $0x10c] ss:$16 sps:$4 sm:$0xff]   ;;  %v2082_v34 = vld [vmem:[#allocation3 + $0x100] ss:$16 sps:$4 sm:$0xff]  }
  0x41   :  { %v2083_v35 = vld [vmem:[#allocation3 + $0x108] ss:$16 sps:$4 sm:$0xff]   ;;  %v2084_v36 = vld [vmem:[#allocation3 + $0x124] ss:$16 sps:$4 sm:$0xff]   ;;  %v2086_v37 = vld [vmem:[#allocation3 + $0x12c] ss:$16 sps:$4 sm:$0xff]  }
  0x42   :  { %v2088_v38 = vld [vmem:[#allocation3 + $0x120] ss:$16 sps:$4 sm:$0xff]   ;;  %v2089_v39 = vld [vmem:[#allocation3 + $0x128] ss:$16 sps:$4 sm:$0xff]   ;;  %v2090_v40 = vld [vmem:[#allocation3 + $0x144] ss:$16 sps:$4 sm:$0xff]  }
  0x43   :  { %678 = vmatpush1.bf16.msra.mxu0 %v2052_v14  ;;  %791 = vmatpush1.bf16.msra.mxu1 %v2053_v15  ;;  %v2092_v41 = vld [vmem:[#allocation3 + $0x14c] ss:$16 sps:$4 sm:$0xff]   ;;  %v2094_v42 = vld [vmem:[#allocation3 + $0x140] ss:$16 sps:$4 sm:$0xff]   ;;  %v2095_v43 = vld [vmem:[#allocation3 + $0x148] ss:$16 sps:$4 sm:$0xff]  }
  0x44   :  { %679 = vmatprep.subr.bf16.mxu0 %v2054_v16  ;;  %792 = vmatprep.subr.bf16.mxu1 %v2056_v17  ;;  %v2096_v44 = vld [vmem:[#allocation3 + $0x164] ss:$16 sps:$4 sm:$0xff]   ;;  %v2098_v45 = vld [vmem:[#allocation3 + $0x16c] ss:$16 sps:$4 sm:$0xff]   ;;  %v2100_v46 = vld [vmem:[#allocation3 + $0x160] ss:$16 sps:$4 sm:$0xff]  }
  0x45   :  { %v2101_v47 = vld [vmem:[#allocation3 + $0x168] ss:$16 sps:$4 sm:$0xff]   ;;  %v2128_v48 = vld [vmem:[%s3391_s0 + $0x4] ss:$8 sps:$4 sm:$0xff]   ;;  %v2106_v51 = vld [vmem:[#allocation3 + $0x180] ss:$16 sps:$4 sm:$0xff]  }
  0x46   :  { %v2102_v49 = vld [vmem:[#allocation3 + $0x184] ss:$16 sps:$4 sm:$0xff]   ;;  %v2104_v50 = vld [vmem:[#allocation3 + $0x18c] ss:$16 sps:$4 sm:$0xff]   ;;  %703 = vmatprep.mubr.bf16.mxu0 %v2128_v48  ;;  %816 = vmatprep.mubr.bf16.mxu1 %v2128_v48  ;;  %v2107_v52 = vld [vmem:[#allocation3 + $0x188] ss:$16 sps:$4 sm:$0xff]  }
  0x47   :  { %680 = vmatpush1.bf16.msra.mxu0 %v2058_v18  ;;  %793 = vmatpush1.bf16.msra.mxu1 %v2059_v19  ;;  %v2108_v53 = vld [vmem:[#allocation3 + $0x1a4] ss:$16 sps:$4 sm:$0xff]   ;;  %v2110_v54 = vld [vmem:[#allocation3 + $0x1ac] ss:$16 sps:$4 sm:$0xff]   ;;  %v2112_v55 = vld [vmem:[#allocation3 + $0x1a0] ss:$16 sps:$4 sm:$0xff]  }
  0x48   :  { %681 = vmatprep.subr.bf16.mxu0 %v2060_v20  ;;  %794 = vmatprep.subr.bf16.mxu1 %v2062_v21  ;;  %v2113_v56 = vld [vmem:[#allocation3 + $0x1a8] ss:$16 sps:$4 sm:$0xff]   ;;  %v2114_v57 = vld [vmem:[#allocation3 + $0x1c4] ss:$16 sps:$4 sm:$0xff]   ;;  %v2116_v58 = vld [vmem:[#allocation3 + $0x1cc] ss:$16 sps:$4 sm:$0xff]  }
  0x49   :  { %v2118_v59 = vld [vmem:[#allocation3 + $0x1c0] ss:$16 sps:$4 sm:$0xff]   ;;  %v2119_v60 = vld [vmem:[#allocation3 + $0x1c8] ss:$16 sps:$4 sm:$0xff]   ;;  %v2120_v61 = vld [vmem:[#allocation3 + $0x1e4] ss:$16 sps:$4 sm:$0xff]  }
  0x4a   :  { %v2122_v62 = vld [vmem:[#allocation3 + $0x1ec] ss:$16 sps:$4 sm:$0xff]   ;;  %v2124_v63 = vld [vmem:[#allocation3 + $0x1e0] ss:$16 sps:$4 sm:$0xff]   ;;  %v2125_v0 = vld [vmem:[#allocation3 + $0x1e8] ss:$16 sps:$4 sm:$0xff]  }
  0x4b   :  { %682 = vmatpush1.bf16.msra.mxu0 %v2064_v22  ;;  %795 = vmatpush1.bf16.msra.mxu1 %v2065_v23  ;;  %v2126_v1 = vld [vmem:[%s3391_s0] ss:$8 sps:$4 sm:$0xff]   ;;  %v2129_v2 = vld [vmem:[%s3391_s0 + $0x14] ss:$8 sps:$4 sm:$0xff]   ;;  %v2131_v3 = vld [vmem:[%s3391_s0 + $0x10] ss:$8 sps:$4 sm:$0xff]  }
  0x4c   :  { %683 = vmatprep.subr.bf16.mxu0 %v2066_v24  ;;  %796 = vmatprep.subr.bf16.mxu1 %v2068_v25  ;;  %v2132_v4 = vld [vmem:[%s3391_s0 + $0x24] ss:$8 sps:$4 sm:$0xff]   ;;  %v2134_v5 = vld [vmem:[%s3391_s0 + $0x20] ss:$8 sps:$4 sm:$0xff]   ;;  %v2135_v6 = vld [vmem:[%s3391_s0 + $0x34] ss:$8 sps:$4 sm:$0xff]  }
  0x4d   :  { %v2137_v7 = vld [vmem:[%s3391_s0 + $0x30] ss:$8 sps:$4 sm:$0xff]   ;;  %v2138_v8 = vld [vmem:[%s3391_s0 + $0x44] ss:$8 sps:$4 sm:$0xff]   ;;  %v2140_v9 = vld [vmem:[%s3391_s0 + $0x40] ss:$8 sps:$4 sm:$0xff]  }
  0x4e   :  { %v2141_v10 = vld [vmem:[%s3391_s0 + $0x54] ss:$8 sps:$4 sm:$0xff]   ;;  %v2143_v11 = vld [vmem:[%s3391_s0 + $0x50] ss:$8 sps:$4 sm:$0xff]   ;;  %v2144_v12 = vld [vmem:[%s3391_s0 + $0x64] ss:$8 sps:$4 sm:$0xff]  }
  0x4f   :  { %684 = vmatpush1.bf16.msra.mxu0 %v2070_v26  ;;  %797 = vmatpush1.bf16.msra.mxu1 %v2071_v27  ;;  %v2146_v13 = vld [vmem:[%s3391_s0 + $0x60] ss:$8 sps:$4 sm:$0xff]   ;;  %v2147_v14 = vld [vmem:[%s3391_s0 + $0x74] ss:$8 sps:$4 sm:$0xff]   ;;  %v2149_v15 = vld [vmem:[%s3391_s0 + $0x70] ss:$8 sps:$4 sm:$0xff]  }
  0x50   :  { %685 = vmatprep.subr.bf16.mxu0 %v2072_v28  ;;  %798 = vmatprep.subr.bf16.mxu1 %v2074_v29 }
  0x53   :  { %686 = vmatpush1.bf16.msra.mxu0 %v2076_v30  ;;  %799 = vmatpush1.bf16.msra.mxu1 %v2077_v31 }
  0x54   :  { %687 = vmatprep.subr.bf16.mxu0 %v2078_v32  ;;  %800 = vmatprep.subr.bf16.mxu1 %v2080_v33 }
  0x57   :  { %688 = vmatpush1.bf16.msra.mxu0 %v2082_v34  ;;  %801 = vmatpush1.bf16.msra.mxu1 %v2083_v35 }
  0x58   :  { %689 = vmatprep.subr.bf16.mxu0 %v2084_v36  ;;  %802 = vmatprep.subr.bf16.mxu1 %v2086_v37 }
  0x5b   :  { %690 = vmatpush1.bf16.msra.mxu0 %v2088_v38  ;;  %803 = vmatpush1.bf16.msra.mxu1 %v2089_v39 }
  0x5c   :  { %691 = vmatprep.subr.bf16.mxu0 %v2090_v40  ;;  %804 = vmatprep.subr.bf16.mxu1 %v2092_v41 }
  0x5f   :  { %692 = vmatpush1.bf16.msra.mxu0 %v2094_v42  ;;  %805 = vmatpush1.bf16.msra.mxu1 %v2095_v43 }
  0x60   :  { %693 = vmatprep.subr.bf16.mxu0 %v2096_v44  ;;  %806 = vmatprep.subr.bf16.mxu1 %v2098_v45 }
  0x63   :  { %694 = vmatpush1.bf16.msra.mxu0 %v2100_v46  ;;  %807 = vmatpush1.bf16.msra.mxu1 %v2101_v47 }
  0x64   :  { %695 = vmatprep.subr.bf16.mxu0 %v2102_v49  ;;  %808 = vmatprep.subr.bf16.mxu1 %v2104_v50 }
  0x67   :  { %696 = vmatpush1.bf16.msra.mxu0 %v2106_v51  ;;  %809 = vmatpush1.bf16.msra.mxu1 %v2107_v52 }
  0x68   :  { %697 = vmatprep.subr.bf16.mxu0 %v2108_v53  ;;  %810 = vmatprep.subr.bf16.mxu1 %v2110_v54 }
  0x6b   :  { %698 = vmatpush1.bf16.msra.mxu0 %v2112_v55  ;;  %811 = vmatpush1.bf16.msra.mxu1 %v2113_v56 }
  0x6c   :  { %699 = vmatprep.subr.bf16.mxu0 %v2114_v57  ;;  %812 = vmatprep.subr.bf16.mxu1 %v2116_v58 }
  0x6f   :  { %700 = vmatpush1.bf16.msra.mxu0 %v2118_v59  ;;  %813 = vmatpush1.bf16.msra.mxu1 %v2119_v60 }
  0x70   :  { %701 = vmatprep.subr.bf16.mxu0 %v2120_v61  ;;  %814 = vmatprep.subr.bf16.mxu1 %v2122_v62 }
  0x73   :  { %702 = vmatpush1.bf16.msra.mxu0 %v2124_v63  ;;  %815 = vmatpush1.bf16.msra.mxu1 %v2125_v0 }
  0x76   :  { %704 = vmatmul.mubr.bf16.vlgmr.msra.gmra.mrb[0].mxu0 %v2126_v1  ;;  %817 = vmatmul.mubr.bf16.vlgmr.msra.gmra.mrb[0].mxu1 %v2126_v1 }
  0x77   :  { %713 = vmatprep.mubr.bf16.mxu0 %v2129_v2  ;;  %826 = vmatprep.mubr.bf16.mxu1 %v2129_v2 }
  0x7e   :  { %714 = vmatmul.mubr.bf16.gmra.mrb[4].mxu0 %v2131_v3  ;;  %827 = vmatmul.mubr.bf16.gmra.mrb[4].mxu1 %v2131_v3 }
  0x7f   :  { %723 = vmatprep.mubr.bf16.mxu0 %v2132_v4  ;;  %836 = vmatprep.mubr.bf16.mxu1 %v2132_v4 }
  0x86   :  { %724 = vmatmul.mubr.bf16.gmra.mrb[8].mxu0 %v2134_v5  ;;  %837 = vmatmul.mubr.bf16.gmra.mrb[8].mxu1 %v2134_v5 }
  0x87   :  { %733 = vmatprep.mubr.bf16.mxu0 %v2135_v6  ;;  %846 = vmatprep.mubr.bf16.mxu1 %v2135_v6 }
  0x8e   :  { %734 = vmatmul.mubr.bf16.gmra.mrb[12].mxu0 %v2137_v7  ;;  %847 = vmatmul.mubr.bf16.gmra.mrb[12].mxu1 %v2137_v7 }
  0x8f   :  { %743 = vmatprep.mubr.bf16.mxu0 %v2138_v8  ;;  %856 = vmatprep.mubr.bf16.mxu1 %v2138_v8 }
  0x96   :  { %744 = vmatmul.mubr.bf16.gmra.mrb[16].mxu0 %v2140_v9  ;;  %857 = vmatmul.mubr.bf16.gmra.mrb[16].mxu1 %v2140_v9 }
  0x97   :  { %753 = vmatprep.mubr.bf16.mxu0 %v2141_v10  ;;  %866 = vmatprep.mubr.bf16.mxu1 %v2141_v10 }
  0x9e   :  { %754 = vmatmul.mubr.bf16.gmra.mrb[20].mxu0 %v2143_v11  ;;  %867 = vmatmul.mubr.bf16.gmra.mrb[20].mxu1 %v2143_v11 }
  0x9f   :  { %763 = vmatprep.mubr.bf16.mxu0 %v2144_v12  ;;  %876 = vmatprep.mubr.bf16.mxu1 %v2144_v12 }
  0xa6   :  { %764 = vmatmul.mubr.bf16.gmra.mrb[24].mxu0 %v2146_v13  ;;  %877 = vmatmul.mubr.bf16.gmra.mrb[24].mxu1 %v2146_v13 }
  0xa7   :  { %773 = vmatprep.mubr.bf16.mxu0 %v2147_v14  ;;  %886 = vmatprep.mubr.bf16.mxu1 %v2147_v14 }
  0xae   :  { %774 = vmatmul.mubr.bf16.gmra.mrb[28].mxu0 %v2149_v15  ;;  %887 = vmatmul.mubr.bf16.gmra.mrb[28].mxu1 %v2149_v15 }
 0x149   :  { %v2350_v16 = vpop.f32.mrb[0].mxu0  ;;  %v2352_v17 = vpop.f32.mrb[0].mxu1 }
 0x14a   :  { %v2354_v18 = vpop.f32.mrb[1].mxu0  ;;  %v2356_v19 = vpop.f32.mrb[1].mxu1  ;;  %v1176_v20 = vmul.f32 %v2350_v16, %v2350_v16  ;;  %v1178_v21 = vmul.f32 %v2352_v17, %v2352_v17 }
 0x14b   :  { %v1177_v22 = vmul.f32 %v2354_v18, %v2354_v18  ;;  %v1179_v23 = vmul.f32 %v2356_v19, %v2356_v19  ;;  %v2366_v24 = vpop.f32.mrb[2].mxu0  ;;  %v2368_v25 = vpop.f32.mrb[2].mxu1 }
 0x14c   :  { %v1092_v26 = vadd.f32 %v2366_v24, %v2350_v16  ;;  %v1180_v27 = vmul.f32 %v2366_v24, %v2366_v24  ;;  %v1134_v28 = vadd.f32 %v2368_v25, %v2352_v17  ;;  %v1182_v29 = vmul.f32 %v2368_v25, %v2368_v25  ;;  %v2378_v30 = vpop.f32.mrb[3].mxu0  ;;  %v2380_v31 = vpop.f32.mrb[3].mxu1 }
 0x14d   :  { %v1113_v32 = vadd.f32 %v2378_v30, %v2354_v18  ;;  %v1181_v33 = vmul.f32 %v2378_v30, %v2378_v30  ;;  %v1155_v34 = vadd.f32 %v2380_v31, %v2356_v19  ;;  %v1183_v35 = vmul.f32 %v2380_v31, %v2380_v31 }
 0x14e   :  { %v1240_v36 = vadd.f32 %v1180_v27, %v1176_v20  ;;  %v1282_v37 = vadd.f32 %v1182_v29, %v1178_v21 }
 0x14f   :  { %v1261_v38 = vadd.f32 %v1181_v33, %v1177_v22  ;;  %v1303_v39 = vadd.f32 %v1183_v35, %v1179_v23 }
 0x151   :  { %v2390_v40 = vpop.f32.mrb[4].mxu0  ;;  %v2392_v41 = vpop.f32.mrb[4].mxu1 }
 0x152   :  { %v1093_v42 = vadd.f32 %v1092_v26, %v2390_v40  ;;  %v1184_v43 = vmul.f32 %v2390_v40, %v2390_v40  ;;  %v1135_v44 = vadd.f32 %v1134_v28, %v2392_v41  ;;  %v1186_v45 = vmul.f32 %v2392_v41, %v2392_v41  ;;  %v2400_v46 = vpop.f32.mrb[5].mxu0  ;;  %v2402_v47 = vpop.f32.mrb[5].mxu1 }
 0x153   :  { %v1114_v48 = vadd.f32 %v1113_v32, %v2400_v46  ;;  %v1185_v49 = vmul.f32 %v2400_v46, %v2400_v46  ;;  %v1156_v50 = vadd.f32 %v1155_v34, %v2402_v47  ;;  %v1187_v51 = vmul.f32 %v2402_v47, %v2402_v47  ;;  %v2410_v52 = vpop.f32.mrb[6].mxu0  ;;  %v2412_v53 = vpop.f32.mrb[6].mxu1 }
 0x154   :  { %v1241_v54 = vadd.f32 %v1240_v36, %v1184_v43  ;;  %v1283_v55 = vadd.f32 %v1282_v37, %v1186_v45  ;;  %v1094_v56 = vadd.f32 %v1093_v42, %v2410_v52  ;;  %v1188_v57 = vmul.f32 %v2410_v52, %v2410_v52  ;;  %v2417_v58 = vpop.f32.mrb[7].mxu0  ;;  %v2419_v59 = vpop.f32.mrb[7].mxu1 }
 0x155   :  { %v1262_v60 = vadd.f32 %v1261_v38, %v1185_v49  ;;  %v1304_v61 = vadd.f32 %v1303_v39, %v1187_v51  ;;  %v1136_v62 = vadd.f32 %v1135_v44, %v2412_v53  ;;  %v1190_v63 = vmul.f32 %v2412_v53, %v2412_v53 }
 0x156   :  { %v1242_v0 = vadd.f32 %v1241_v54, %v1188_v57  ;;  %v1115_v1 = vadd.f32 %v1114_v48, %v2417_v58  ;;  %v1189_v2 = vmul.f32 %v2417_v58, %v2417_v58  ;;  %v1157_v3 = vadd.f32 %v1156_v50, %v2419_v59 }
 0x157   :  { %v1284_v4 = vadd.f32 %v1283_v55, %v1190_v63  ;;  %v1191_v5 = vmul.f32 %v2419_v59, %v2419_v59 }
 0x158   :  { %v1263_v6 = vadd.f32 %v1262_v60, %v1189_v2 }
 0x159   :  { %v1305_v7 = vadd.f32 %v1304_v61, %v1191_v5  ;;  %v2430_v8 = vpop.f32.mrb[8].mxu0  ;;  %v2432_v9 = vpop.f32.mrb[8].mxu1 }
 0x15a   :  { %v1095_v10 = vadd.f32 %v1094_v56, %v2430_v8  ;;  %v1192_v11 = vmul.f32 %v2430_v8, %v2430_v8  ;;  %v1137_v12 = vadd.f32 %v1136_v62, %v2432_v9  ;;  %v1194_v13 = vmul.f32 %v2432_v9, %v2432_v9  ;;  %v2440_v14 = vpop.f32.mrb[9].mxu0  ;;  %v2442_v15 = vpop.f32.mrb[9].mxu1 }
 0x15b   :  { %v1116_v20 = vadd.f32 %v1115_v1, %v2440_v14  ;;  %v1193_v21 = vmul.f32 %v2440_v14, %v2440_v14  ;;  %v1158_v22 = vadd.f32 %v1157_v3, %v2442_v15  ;;  %v1195_v23 = vmul.f32 %v2442_v15, %v2442_v15  ;;  %v2450_v26 = vpop.f32.mrb[10].mxu0  ;;  %v2452_v27 = vpop.f32.mrb[10].mxu1 }
 0x15c   :  { %v1243_v28 = vadd.f32 %v1242_v0, %v1192_v11  ;;  %v1285_v29 = vadd.f32 %v1284_v4, %v1194_v13  ;;  %v1096_v32 = vadd.f32 %v1095_v10, %v2450_v26  ;;  %v1196_v33 = vmul.f32 %v2450_v26, %v2450_v26  ;;  %v2457_v34 = vpop.f32.mrb[11].mxu0  ;;  %v2459_v35 = vpop.f32.mrb[11].mxu1 }
 0x15d   :  { %v1264_v36 = vadd.f32 %v1263_v6, %v1193_v21  ;;  %v1306_v37 = vadd.f32 %v1305_v7, %v1195_v23  ;;  %v1138_v38 = vadd.f32 %v1137_v12, %v2452_v27  ;;  %v1198_v39 = vmul.f32 %v2452_v27, %v2452_v27 }
 0x15e   :  { %v1244_v42 = vadd.f32 %v1243_v28, %v1196_v33  ;;  %v1117_v43 = vadd.f32 %v1116_v20, %v2457_v34  ;;  %v1197_v44 = vmul.f32 %v2457_v34, %v2457_v34  ;;  %v1159_v45 = vadd.f32 %v1158_v22, %v2459_v35 }
 0x15f   :  { %v1286_v48 = vadd.f32 %v1285_v29, %v1198_v39  ;;  %v1199_v49 = vmul.f32 %v2459_v35, %v2459_v35 }
 0x160   :  { %v1265_v50 = vadd.f32 %v1264_v36, %v1197_v44 }
 0x161   :  { %v1307_v51 = vadd.f32 %v1306_v37, %v1199_v49  ;;  %v2470_v54 = vpop.f32.mrb[12].mxu0  ;;  %v2472_v55 = vpop.f32.mrb[12].mxu1 }
 0x162   :  { %v1097_v56 = vadd.f32 %v1096_v32, %v2470_v54  ;;  %v1200_v57 = vmul.f32 %v2470_v54, %v2470_v54  ;;  %v1139_v60 = vadd.f32 %v1138_v38, %v2472_v55  ;;  %v1202_v61 = vmul.f32 %v2472_v55, %v2472_v55  ;;  %v2480_v62 = vpop.f32.mrb[13].mxu0  ;;  %v2482_v63 = vpop.f32.mrb[13].mxu1 }
 0x163   :  { %v1118_v0 = vadd.f32 %v1117_v43, %v2480_v62  ;;  %v1201_v1 = vmul.f32 %v2480_v62, %v2480_v62  ;;  %v1160_v2 = vadd.f32 %v1159_v45, %v2482_v63  ;;  %v1203_v3 = vmul.f32 %v2482_v63, %v2482_v63  ;;  %v2490_v4 = vpop.f32.mrb[14].mxu0  ;;  %v2492_v5 = vpop.f32.mrb[14].mxu1 }
 0x164   :  { %v1245_v6 = vadd.f32 %v1244_v42, %v1200_v57  ;;  %v1287_v7 = vadd.f32 %v1286_v48, %v1202_v61  ;;  %v1098_v10 = vadd.f32 %v1097_v56, %v2490_v4  ;;  %v1204_v11 = vmul.f32 %v2490_v4, %v2490_v4  ;;  %v2497_v12 = vpop.f32.mrb[15].mxu0  ;;  %v2499_v13 = vpop.f32.mrb[15].mxu1 }
 0x165   :  { %3436 = vst [vmem:[#allocation10_spill] sm:$0xff] %v2499_v13  ;;  %v1266_v20 = vadd.f32 %v1265_v50, %v1201_v1  ;;  %v1308_v21 = vadd.f32 %v1307_v51, %v1203_v3  ;;  %v1140_v22 = vadd.f32 %v1139_v60, %v2492_v5  ;;  %v1206_v23 = vmul.f32 %v2492_v5, %v2492_v5 }
 0x166   :  { %v1246_v28 = vadd.f32 %v1245_v6, %v1204_v11  ;;  %v1119_v29 = vadd.f32 %v1118_v0, %v2497_v12  ;;  %v1205_v32 = vmul.f32 %v2497_v12, %v2497_v12  ;;  %v1161_v33 = vadd.f32 %v1160_v2, %v2499_v13 }
 0x167   :  { %v1288_v36 = vadd.f32 %v1287_v7, %v1206_v23  ;;  %v1207_v37 = vmul.f32 %v2499_v13, %v2499_v13 }
 0x168   :  { %v1267_v38 = vadd.f32 %v1266_v20, %v1205_v32 }
 0x169   :  { %v1309_v39 = vadd.f32 %v1308_v21, %v1207_v37  ;;  %v2510_v42 = vpop.f32.mrb[16].mxu0  ;;  %v2512_v43 = vpop.f32.mrb[16].mxu1 }
 0x16a   :  { %3437 = vst [vmem:[#allocation11_spill] sm:$0xff] %v2510_v42  ;;  %3438 = vst [vmem:[#allocation12_spill] sm:$0xff] %v2512_v43  ;;  %v1099_v44 = vadd.f32 %v1098_v10, %v2510_v42  ;;  %v1208_v45 = vmul.f32 %v2510_v42, %v2510_v42  ;;  %v1141_v48 = vadd.f32 %v1140_v22, %v2512_v43  ;;  %v2520_v50 = vpop.f32.mrb[17].mxu0  ;;  %v2522_v51 = vpop.f32.mrb[17].mxu1 }
 0x16b   :  { %v1210_v49 = vmul.f32 %v2512_v43, %v2512_v43  ;;  %3439 = vst [vmem:[#allocation13_spill] sm:$0xff] %v2520_v50  ;;  %3440 = vst [vmem:[#allocation14_spill] sm:$0xff] %v2522_v51  ;;  %v1120_v56 = vadd.f32 %v1119_v29, %v2520_v50  ;;  %v1209_v57 = vmul.f32 %v2520_v50, %v2520_v50  ;;  %v2530_v0 = vpop.f32.mrb[18].mxu0  ;;  %v2532_v1 = vpop.f32.mrb[18].mxu1 }
 0x16c   :  { %v1162_v60 = vadd.f32 %v1161_v33, %v2522_v51  ;;  %v1211_v61 = vmul.f32 %v2522_v51, %v2522_v51  ;;  %3441 = vst [vmem:[#allocation15_spill] sm:$0xff] %v2530_v0  ;;  %3442 = vst [vmem:[#allocation16_spill] sm:$0xff] %v2532_v1  ;;  %v1247_v2 = vadd.f32 %v1246_v28, %v1208_v45  ;;  %v2537_v10 = vpop.f32.mrb[19].mxu0  ;;  %v2539_v11 = vpop.f32.mrb[19].mxu1 }
 0x16d   :  { %v1289_v3 = vadd.f32 %v1288_v36, %v1210_v49  ;;  %v1100_v6 = vadd.f32 %v1099_v44, %v2530_v0  ;;  %v1212_v7 = vmul.f32 %v2530_v0, %v2530_v0  ;;  %3443 = vst [vmem:[#allocation17_spill] sm:$0xff] %v2537_v10  ;;  %3444 = vst [vmem:[#allocation18_spill] sm:$0xff] %v2539_v11 }
 0x16e   :  { %v1268_v20 = vadd.f32 %v1267_v38, %v1209_v57  ;;  %v1310_v21 = vadd.f32 %v1309_v39, %v1211_v61  ;;  %v1142_v22 = vadd.f32 %v1141_v48, %v2532_v1  ;;  %v1214_v23 = vmul.f32 %v2532_v1, %v2532_v1 }
 0x16f   :  { %v1248_v29 = vadd.f32 %v1247_v2, %v1212_v7  ;;  %v1121_v28 = vadd.f32 %v1120_v56, %v2537_v10  ;;  %v1213_v32 = vmul.f32 %v2537_v10, %v2537_v10  ;;  %v1163_v33 = vadd.f32 %v1162_v60, %v2539_v11 }
 0x170   :  { %v1290_v36 = vadd.f32 %v1289_v3, %v1214_v23  ;;  %v1215_v37 = vmul.f32 %v2539_v11, %v2539_v11 }
 0x171   :  { %v1269_v44 = vadd.f32 %v1268_v20, %v1213_v32  ;;  %v2550_v39 = vpop.f32.mrb[20].mxu0  ;;  %v2552_v45 = vpop.f32.mrb[20].mxu1 }
 0x172   :  { %v1311_v38 = vadd.f32 %v1310_v21, %v1215_v37  ;;  %3445 = vst [vmem:[#allocation19_spill] sm:$0xff] %v2550_v39  ;;  %3446 = vst [vmem:[#allocation20_spill] sm:$0xff] %v2552_v45  ;;  %v1101_v48 = vadd.f32 %v1100_v6, %v2550_v39  ;;  %v1216_v49 = vmul.f32 %v2550_v39, %v2550_v39  ;;  %v2560_v60 = vpop.f32.mrb[21].mxu0  ;;  %v2562_v61 = vpop.f32.mrb[21].mxu1 }
 0x173   :  { %v1143_v56 = vadd.f32 %v1142_v22, %v2552_v45  ;;  %v1218_v57 = vmul.f32 %v2552_v45, %v2552_v45  ;;  %3447 = vst [vmem:[#allocation21_spill] sm:$0xff] %v2560_v60  ;;  %3448 = vst [vmem:[#allocation22_spill] sm:$0xff] %v2562_v61  ;;  %v1122_v2 = vadd.f32 %v1121_v28, %v2560_v60  ;;  %v2570_v20 = vpop.f32.mrb[22].mxu0  ;;  %v2572_v21 = vpop.f32.mrb[22].mxu1 }
 0x174   :  { %v1217_v3 = vmul.f32 %v2560_v60, %v2560_v60  ;;  %v1164_v7 = vadd.f32 %v1163_v33, %v2562_v61  ;;  %v1219_v6 = vmul.f32 %v2562_v61, %v2562_v61  ;;  %3449 = vst [vmem:[#allocation23_spill] sm:$0xff] %v2570_v20  ;;  %3450 = vst [vmem:[#allocation24_spill] sm:$0xff] %v2572_v21  ;;  %v2577_v28 = vpop.f32.mrb[23].mxu0  ;;  %v2579_v45 = vpop.f32.mrb[23].mxu1 }
 0x175   :  { %v1249_v22 = vadd.f32 %v1248_v29, %v1216_v49  ;;  %v1291_v23 = vadd.f32 %v1290_v36, %v1218_v57  ;;  %v1102_v32 = vadd.f32 %v1101_v48, %v2570_v20  ;;  %v1220_v37 = vmul.f32 %v2570_v20, %v2570_v20  ;;  %3451 = vst [vmem:[#allocation25_spill] sm:$0xff] %v2577_v28 }
 0x176   :  { %3452 = vst [vmem:[#allocation26_spill] sm:$0xff] %v2579_v45  ;;  %v1270_v60 = vadd.f32 %v1269_v44, %v1217_v3  ;;  %v1312_v33 = vadd.f32 %v1311_v38, %v1219_v6  ;;  %v1144_v39 = vadd.f32 %v1143_v56, %v2572_v21  ;;  %v1222_v61 = vmul.f32 %v2572_v21, %v2572_v21 }
 0x177   :  { %v1250_v11 = vadd.f32 %v1249_v22, %v1220_v37  ;;  %v1123_v29 = vadd.f32 %v1122_v2, %v2577_v28  ;;  %v1221_v36 = vmul.f32 %v2577_v28, %v2577_v28  ;;  %v1165_v48 = vadd.f32 %v1164_v7, %v2579_v45 }
 0x178   :  { %v1292_v49 = vadd.f32 %v1291_v23, %v1222_v61  ;;  %v1223_v57 = vmul.f32 %v2579_v45, %v2579_v45 }
 0x179   :  { %v1271_v20 = vadd.f32 %v1270_v60, %v1221_v36  ;;  %v2590_v38 = vpop.f32.mrb[24].mxu0  ;;  %v2592_v56 = vpop.f32.mrb[24].mxu1 }
 0x17a   :  { %v1313_v44 = vadd.f32 %v1312_v33, %v1223_v57  ;;  %3453 = vst [vmem:[#allocation27_spill] sm:$0xff] %v2590_v38  ;;  %3454 = vst [vmem:[#allocation28_spill] sm:$0xff] %v2592_v56  ;;  %v1103_v3 = vadd.f32 %v1102_v32, %v2590_v38  ;;  %v1224_v2 = vmul.f32 %v2590_v38, %v2590_v38  ;;  %v2600_v61 = vpop.f32.mrb[25].mxu0  ;;  %v2602_v22 = vpop.f32.mrb[25].mxu1 }
 0x17b   :  { %v1145_v6 = vadd.f32 %v1144_v39, %v2592_v56  ;;  %v1226_v7 = vmul.f32 %v2592_v56, %v2592_v56  ;;  %3455 = vst [vmem:[#allocation29_spill] sm:$0xff] %v2600_v61  ;;  %3456 = vst [vmem:[#allocation30_spill] sm:$0xff] %v2602_v22  ;;  %v1124_v60 = vadd.f32 %v1123_v29, %v2600_v61  ;;  %v2610_v33 = vpop.f32.mrb[26].mxu0  ;;  %v2612_v39 = vpop.f32.mrb[26].mxu1 }
 0x17c   :  { %v1225_v23 = vmul.f32 %v2600_v61, %v2600_v61  ;;  %v1166_v37 = vadd.f32 %v1165_v48, %v2602_v22  ;;  %v1227_v32 = vmul.f32 %v2602_v22, %v2602_v22  ;;  %3457 = vst [vmem:[#allocation31_spill] sm:$0xff] %v2610_v33  ;;  %3458 = vst [vmem:[#allocation32_spill] sm:$0xff] %v2612_v39  ;;  %v2617_v29 = vpop.f32.mrb[27].mxu0  ;;  %v2619_v45 = vpop.f32.mrb[27].mxu1 }
 0x17d   :  { %v1251_v36 = vadd.f32 %v1250_v11, %v1224_v2  ;;  %v1293_v57 = vadd.f32 %v1292_v49, %v1226_v7  ;;  %v1104_v56 = vadd.f32 %v1103_v3, %v2610_v33  ;;  %v1228_v38 = vmul.f32 %v2610_v33, %v2610_v33  ;;  %3459 = vst [vmem:[#allocation33_spill] sm:$0xff] %v2617_v29 }
 0x17e   :  { %3460 = vst [vmem:[#allocation34_spill] sm:$0xff] %v2619_v45  ;;  %v1272_v61 = vadd.f32 %v1271_v20, %v1225_v23  ;;  %v1314_v48 = vadd.f32 %v1313_v44, %v1227_v32  ;;  %v1146_v21 = vadd.f32 %v1145_v6, %v2612_v39  ;;  %v1230_v22 = vmul.f32 %v2612_v39, %v2612_v39 }
 0x17f   :  { %v1252_v28 = vadd.f32 %v1251_v36, %v1228_v38  ;;  %v1125_v11 = vadd.f32 %v1124_v60, %v2617_v29  ;;  %v1229_v49 = vmul.f32 %v2617_v29, %v2617_v29  ;;  %v1167_v3 = vadd.f32 %v1166_v37, %v2619_v45 }
 0x180   :  { %v1294_v2 = vadd.f32 %v1293_v57, %v1230_v22  ;;  %v1231_v7 = vmul.f32 %v2619_v45, %v2619_v45 }
 0x181   :  { %v1273_v33 = vadd.f32 %v1272_v61, %v1229_v49  ;;  %v2630_v44 = vpop.f32.mrb[28].mxu0  ;;  %v2632_v6 = vpop.f32.mrb[28].mxu1 }
 0x182   :  { %v1315_v20 = vadd.f32 %v1314_v48, %v1231_v7  ;;  %3461 = vst [vmem:[#allocation35_spill] sm:$0xff] %v2630_v44  ;;  %3462 = vst [vmem:[#allocation36_spill] sm:$0xff] %v2632_v6  ;;  %v1105_v23 = vadd.f32 %v1104_v56, %v2630_v44  ;;  %v1232_v38 = vmul.f32 %v2630_v44, %v2630_v44  ;;  %v2640_v22 = vpop.f32.mrb[29].mxu0  ;;  %v2642_v32 = vpop.f32.mrb[29].mxu1 }
 0x183   :  { %v1147_v60 = vadd.f32 %v1146_v21, %v2632_v6  ;;  %v1234_v37 = vmul.f32 %v2632_v6, %v2632_v6  ;;  %3463 = vst [vmem:[#allocation37_spill] sm:$0xff] %v2640_v22  ;;  %3464 = vst [vmem:[#allocation38_spill] sm:$0xff] %v2642_v32  ;;  %v1126_v61 = vadd.f32 %v1125_v11, %v2640_v22  ;;  %v2650_v48 = vpop.f32.mrb[30].mxu0  ;;  %v2652_v21 = vpop.f32.mrb[30].mxu1 }
 0x184   :  { %v1233_v36 = vmul.f32 %v2640_v22, %v2640_v22  ;;  %v1168_v57 = vadd.f32 %v1167_v3, %v2642_v32  ;;  %v1235_v56 = vmul.f32 %v2642_v32, %v2642_v32  ;;  %3465 = vst [vmem:[#allocation39_spill] sm:$0xff] %v2650_v48  ;;  %3466 = vst [vmem:[#allocation40_spill] sm:$0xff] %v2652_v21  ;;  %v2657_v11 = vpop.f32.mrb[31].mxu0  ;;  %v2659_v45 = vpop.f32.mrb[31].mxu1 }
 0x185   :  { %v1253_v49 = vadd.f32 %v1252_v28, %v1232_v38  ;;  %v1295_v7 = vadd.f32 %v1294_v2, %v1234_v37  ;;  %v1106_v6 = vadd.f32 %v1105_v23, %v2650_v48  ;;  %v1236_v44 = vmul.f32 %v2650_v48, %v2650_v48  ;;  %3467 = vst [vmem:[#allocation41_spill] sm:$0xff] %v2657_v11 }
 0x186   :  { %3468 = vst [vmem:[#allocation42_spill] sm:$0xff] %v2659_v45  ;;  %v1274_v22 = vadd.f32 %v1273_v33, %v1233_v36  ;;  %v1316_v3 = vadd.f32 %v1315_v20, %v1235_v56  ;;  %v1148_v39 = vadd.f32 %v1147_v60, %v2652_v21  ;;  %v1238_v32 = vmul.f32 %v2652_v21, %v2652_v21 }
 0x187   :  { %v1107_v29 = vrot.slane %v1106_v6, 4  ;;  %v1254_v1 = vadd.f32 %v1253_v49, %v1236_v44  ;;  %v1127_v28 = vadd.f32 %v1126_v61, %v2657_v11  ;;  %v1237_v2 = vmul.f32 %v2657_v11, %v2657_v11 }
 0x188   :  { %v1149_v23 = vrot.slane %v1148_v39, 4  ;;  %v1296_v38 = vadd.f32 %v1295_v7, %v1238_v32  ;;  %v1169_v37 = vadd.f32 %v1168_v57, %v2659_v45  ;;  %v1239_v33 = vmul.f32 %v2659_v45, %v2659_v45 }
 0x189   :  { %v1108_v20 = vadd.f32 %v1107_v29, %v1106_v6  ;;  %v1255_v36 = vrot.slane %v1254_v1, 4  ;;  %v1128_v60 = vrot.slane %v1127_v28, 4  ;;  %v1275_v56 = vadd.f32 %v1274_v22, %v1237_v2 }
 0x18a   :  { %v1150_v48 = vadd.f32 %v1149_v23, %v1148_v39  ;;  %v1297_v21 = vrot.slane %v1296_v38, 4  ;;  %v1170_v10 = vrot.slane %v1169_v37, 4  ;;  %v1317_v44 = vadd.f32 %v1316_v3, %v1239_v33 }
 0x18b   :  { %v1109_v49 = vrot.slane %v1108_v20, 2  ;;  %v1256_v61 = vadd.f32 %v1255_v36, %v1254_v1  ;;  %v1129_v0 = vadd.f32 %v1128_v60, %v1127_v28  ;;  %v1276_v51 = vrot.slane %v1275_v56, 4 }
 0x18c   :  { %v1151_v11 = vrot.slane %v1150_v48, 2  ;;  %v1298_v43 = vadd.f32 %v1297_v21, %v1296_v38  ;;  %v1171_v32 = vadd.f32 %v1170_v10, %v1169_v37  ;;  %v1318_v7 = vrot.slane %v1317_v44, 4 }
 0x18d   :  { %v1110_v57 = vadd.f32 %v1109_v49, %v1108_v20  ;;  %v1257_v50 = vrot.slane %v1256_v61, 2  ;;  %v1130_v42 = vrot.slane %v1129_v0, 2  ;;  %v1277_v45 = vadd.f32 %v1276_v51, %v1275_v56 }
 0x18e   :  { %v1152_v29 = vadd.f32 %v1151_v11, %v1150_v48  ;;  %v1299_v6 = vrot.slane %v1298_v43, 2  ;;  %v1172_v13 = vrot.slane %v1171_v32, 2  ;;  %v1319_v22 = vadd.f32 %v1318_v7, %v1317_v44 }
 0x18f   :  { %v1111_v39 = vrot.slane %v1110_v57, 1  ;;  %v1258_v2 = vadd.f32 %v1257_v50, %v1256_v61  ;;  %v1131_v23 = vadd.f32 %v1130_v42, %v1129_v0  ;;  %v1278_v3 = vrot.slane %v1277_v45, 2 }
 0x190   :  { %v1153_v33 = vrot.slane %v1152_v29, 1  ;;  %v1300_v1 = vadd.f32 %v1299_v6, %v1298_v43  ;;  %v1173_v28 = vadd.f32 %v1172_v13, %v1171_v32  ;;  %v1320_v36 = vrot.slane %v1319_v22, 2 }
 0x191   :  { %v1112_v60 = vadd.f32 %v1111_v39, %v1110_v57  ;;  %v1259_v21 = vrot.slane %v1258_v2, 1  ;;  %v1132_v10 = vrot.slane %v1131_v23, 1  ;;  %v1279_v38 = vadd.f32 %v1278_v3, %v1277_v45 }
 0x192   :  { %v1154_v37 = vadd.f32 %v1153_v33, %v1152_v29  ;;  %v1301_v20 = vrot.slane %v1300_v1, 1  ;;  %v1174_v49 = vrot.slane %v1173_v28, 1  ;;  %v1321_v51 = vadd.f32 %v1320_v36, %v1319_v22 }
 0x193   :  { %v1260_v48 = vadd.f32 %v1259_v21, %v1258_v2  ;;  %v1324_v11 = vmul.f32 0.0078125, %v1112_v60  ;;  %v1133_v56 = vadd.f32 %v1132_v10, %v1131_v23  ;;  %v1280_v44 = vrot.slane %v1279_v38, 1 }
 0x194   :  { %v1302_v7 = vadd.f32 %v1301_v20, %v1300_v1  ;;  %v1326_v50 = vmul.f32 0.0078125, %v1154_v37  ;;  %v1175_v42 = vadd.f32 %v1174_v49, %v1173_v28  ;;  %v1322_v0 = vrot.slane %v1321_v51, 1 }
 0x195   :  { %v1328_v61 = vmul.f32 0.0078125, %v1260_v48  ;;  %v1332_v43 = vmul.f32 %v1324_v11, %v1324_v11  ;;  %v1281_v13 = vadd.f32 %v1280_v44, %v1279_v38  ;;  %v1325_v32 = vmul.f32 0.0078125, %v1133_v56 }
 0x196   :  { %v1330_v57 = vmul.f32 0.0078125, %v1302_v7  ;;  %v1334_v6 = vmul.f32 %v1326_v50, %v1326_v50  ;;  %v1323_v39 = vadd.f32 %v1322_v0, %v1321_v51  ;;  %v1327_v45 = vmul.f32 0.0078125, %v1175_v42 }
 0x197   :  { %v1336_v29 = vsub.f32 %v1328_v61, %v1332_v43  ;;  %v1329_v3 = vmul.f32 0.0078125, %v1281_v13  ;;  %v1333_v33 = vmul.f32 %v1325_v32, %v1325_v32  ;;  %v2233_v38 = vmov 1966171168  }
 0x198   :  { %v1338_v22 = vsub.f32 %v1330_v57, %v1334_v6  ;;  %v1331_v2 = vmul.f32 0.0078125, %v1323_v39  ;;  %v1335_v36 = vmul.f32 %v1327_v45, %v1327_v45  ;;  %v1356_v37 = vunpack.c.l.s4 %v2233_v38  ;;  %v1340_v6 = vld [vmem:[#allocation5] sm:$0xf] }
 0x199   :  { %v1341_v23 = vadd.f32 1e-05, %v1336_v29  ;;  %v1337_v60 = vsub.f32 %v1329_v3, %v1333_v33  ;;  %v1358_v20 = vlaneseq }
 0x19a   :  { %v1343_v1 = vadd.f32 1e-05, %v1338_v22  ;;  %v1339_v21 = vsub.f32 %v1331_v2, %v1335_v36  ;;  %v1357_v49 = vunpack.c.0.s8 %v1356_v37 }
 0x19b   :  { %2150 = vrsqrt.f32 %v1341_v23  ;;  %v1342_v28 = vadd.f32 1e-05, %v1337_v60  ;;  %v2670_v51 = vshrl.u32 %v1358_v20, 7 }
 0x19c   :  { %2152 = vrsqrt.f32 %v1343_v1  ;;  %v1344_v10 = vadd.f32 1e-05, %v1339_v21 }
 0x19d   :  { %2154 = vrsqrt.f32 %v1342_v28  ;;  %v1360_v44 = vsub.s32 %v1357_v49, %v2670_v51  ;;  %v3432_v39 = vsub.s32 0, %v2670_v51  ;;  %v3431_v3 = vsub.s32 1, %v2670_v51 }
 0x19e   :  { %2156 = vrsqrt.f32 %v1344_v10  ;;  %v3430_v33 = vsub.s32 2, %v2670_v51  ;;  %v3429_v22 = vsub.s32 3, %v2670_v51 }
 0x1a5   :  { %v2151_v48 = vpop.eup %2150 }
 0x1a6   :  { %v2153_v56 = vpop.eup %2152 }
 0x1a7   :  { %v2155_v7 = vpop.eup %2154 }
 0x1a8   :  { %v2157_v42 = vpop.eup %2156  ;;  %v1353_v0 = vcombine.low %v2151_v48, %v2155_v7 }
 0x1a9   :  { %v1354_v61 = vcombine.low %v2153_v56, %v2157_v42  ;;  %v1379_v42 = vld [vmem:[#allocation7] sm:$0xf] }
 0x1aa   :  { %v1361_v43 = vrot.slane %v1353_v0, %v1360_v44 }
 0x1ab   :  { %v1368_v13 = vrot.slane %v1354_v61, %v1360_v44  ;;  %v3469_v61 = vld [vmem:[#allocation10_spill] sm:$0xff] }
 0x1ad   :  { %v1369_v57 = vcombine.low %v1361_v43, %v1368_v13  ;;  %v3470_v43 = vld [vmem:[#allocation11_spill] sm:$0xff]  ;;  %v3471_v13 = vld [vmem:[#allocation13_spill] sm:$0xff] }
 0x1af   :  { %v1376_v29 = vrot.slane %v1369_v57, %v1360_v44  ;;  %v3472_v57 = vld [vmem:[#allocation12_spill] sm:$0xff] }
 0x1b1   :  { %v1378_v2 = vmul.f32 %v1376_v29, %v1340_v6  ;;  %v3473_v6 = vld [vmem:[#allocation14_spill] sm:$0xff]  ;;  %v3474_v29 = vld [vmem:[#allocation15_spill] sm:$0xff] }
 0x1b3   :  { %v2679_v36 = vrot.slane %v1378_v2, %v3432_v39  ;;  %v2683_v23 = vrot.slane %v1378_v2, %v3431_v3  ;;  %v2687_v60 = vrot.slane %v1378_v2, %v3430_v33  ;;  %v2691_v1 = vrot.slane %v1378_v2, %v3429_v22  ;;  %v3489_v22 = vld [vmem:[#allocation29_spill] sm:$0xff]  ;;  %v3491_v33 = vld [vmem:[#allocation28_spill] sm:$0xff]  ;;  %v3493_v3 = vld [vmem:[#allocation30_spill] sm:$0xff] }
 0x1b4   :  { %v3495_v39 = vld [vmem:[#allocation31_spill] sm:$0xff] }
 0x1b5   :  { %v1401_v21 = vmul.f32 %v2679_v36, %v1324_v11  ;;  %v1402_v28 = vmul.f32 %v2683_v23, %v1325_v32  ;;  %v1403_v10 = vmul.f32 %v2687_v60, %v1326_v50  ;;  %v1404_v38 = vmul.f32 %v2691_v1, %v1327_v45 }
 0x1b6   :  { %v2699_v37 = vmul.f32 %v2679_v36, %v2350_v16  ;;  %v2703_v20 = vmul.f32 %v2683_v23, %v2354_v18  ;;  %v2707_v49 = vmul.f32 %v2687_v60, %v2352_v17  ;;  %v2711_v11 = vmul.f32 %v2691_v1, %v2356_v19 }
 0x1b7   :  { %v1409_v32 = vcombine.low %v1401_v21, %v1402_v28  ;;  %v1410_v50 = vcombine.low %v1403_v10, %v1404_v38  ;;  %v2715_v45 = vmul.f32 %v2679_v36, %v2366_v24  ;;  %v2719_v16 = vmul.f32 %v2683_v23, %v2378_v30  ;;  %v3475_v21 = vld [vmem:[#allocation17_spill] sm:$0xff]  ;;  %v3476_v10 = vld [vmem:[#allocation16_spill] sm:$0xff] }
 0x1b8   :  { %v2723_v18 = vmul.f32 %v2687_v60, %v2368_v25  ;;  %v2727_v17 = vmul.f32 %v2691_v1, %v2380_v31  ;;  %v2731_v19 = vmul.f32 %v2679_v36, %v2390_v40  ;;  %v2735_v24 = vmul.f32 %v2683_v23, %v2400_v46 }
 0x1b9   :  { %v1417_v48 = vrot.slane %v1409_v32, %v1360_v44  ;;  %v1424_v56 = vrot.slane %v1410_v50, %v1360_v44  ;;  %v2739_v30 = vmul.f32 %v2687_v60, %v2392_v41  ;;  %v2743_v25 = vmul.f32 %v2691_v1, %v2402_v47  ;;  %v3477_v32 = vld [vmem:[#allocation18_spill] sm:$0xff] }
 0x1ba   :  { %v2747_v31 = vmul.f32 %v2679_v36, %v2410_v52  ;;  %v2751_v40 = vmul.f32 %v2683_v23, %v2417_v58  ;;  %v2755_v46 = vmul.f32 %v2687_v60, %v2412_v53  ;;  %v2759_v41 = vmul.f32 %v2691_v1, %v2419_v59 }
 0x1bb   :  { %v1425_v7 = vcombine.low %v1417_v48, %v1424_v56  ;;  %v2763_v47 = vmul.f32 %v2679_v36, %v2430_v8  ;;  %v2767_v52 = vmul.f32 %v2683_v23, %v2440_v14  ;;  %v2771_v58 = vmul.f32 %v2687_v60, %v2432_v9  ;;  %v3478_v48 = vld [vmem:[#allocation19_spill] sm:$0xff] }
 0x1bc   :  { %v2775_v53 = vmul.f32 %v2691_v1, %v2442_v15  ;;  %v2779_v59 = vmul.f32 %v2679_v36, %v2450_v26  ;;  %v2783_v8 = vmul.f32 %v2683_v23, %v2457_v34  ;;  %v2787_v14 = vmul.f32 %v2687_v60, %v2452_v27 }
 0x1bd   :  { %v1432_v0 = vrot.slane %v1425_v7, %v1360_v44  ;;  %v2791_v9 = vmul.f32 %v2691_v1, %v2459_v35  ;;  %v2795_v15 = vmul.f32 %v2679_v36, %v2470_v54  ;;  %v2799_v26 = vmul.f32 %v2683_v23, %v2480_v62  ;;  %v3479_v7 = vld [vmem:[#allocation21_spill] sm:$0xff] }
 0x1be   :  { %v2803_v34 = vmul.f32 %v2687_v60, %v2472_v55  ;;  %v2807_v27 = vmul.f32 %v2691_v1, %v2482_v63  ;;  %v2811_v35 = vmul.f32 %v2679_v36, %v2490_v4  ;;  %v2815_v54 = vmul.f32 %v2683_v23, %v2497_v12 }
 0x1bf   :  { %v1434_v44 = vsub.f32 %v1379_v42, %v1432_v0  ;;  %v2819_v62 = vmul.f32 %v2687_v60, %v2492_v5  ;;  %v2823_v55 = vmul.f32 %v2691_v1, %v3469_v61  ;;  %v2827_v63 = vmul.f32 %v2679_v36, %v3470_v43  ;;  %v3480_v0 = vld [vmem:[#allocation20_spill] sm:$0xff]  ;;  %v3481_v43 = vld [vmem:[#allocation22_spill] sm:$0xff] }
 0x1c0   :  { %v2831_v4 = vmul.f32 %v2683_v23, %v3471_v13  ;;  %v2835_v12 = vmul.f32 %v2687_v60, %v3472_v57  ;;  %v2839_v5 = vmul.f32 %v2691_v1, %v3473_v6  ;;  %v2843_v2 = vmul.f32 %v2679_v36, %v3474_v29  ;;  %v3482_v57 = vld [vmem:[#allocation23_spill] sm:$0xff]  ;;  %v3483_v29 = vld [vmem:[#allocation25_spill] sm:$0xff] }
 0x1c1   :  { %v2847_v28 = vmul.f32 %v2683_v23, %v3475_v21  ;;  %v2851_v38 = vmul.f32 %v2687_v60, %v3476_v10  ;;  %v2855_v50 = vmul.f32 %v2691_v1, %v3477_v32  ;;  %v2859_v56 = vmul.f32 %v2679_v36, %v3478_v48  ;;  %v3484_v10 = vld [vmem:[#allocation24_spill] sm:$0xff]  ;;  %v3485_v48 = vld [vmem:[#allocation26_spill] sm:$0xff] }
 0x1c2   :  { %v2863_v42 = vmul.f32 %v2683_v23, %v3479_v7  ;;  %v2867_v61 = vmul.f32 %v2687_v60, %v3480_v0  ;;  %v2871_v13 = vmul.f32 %v2691_v1, %v3481_v43  ;;  %v2875_v6 = vmul.f32 %v2679_v36, %v3482_v57  ;;  %v3487_v0 = vld [vmem:[#allocation27_spill] sm:$0xff] }
 0x1c3   :  { %v2879_v21 = vmul.f32 %v2683_v23, %v3483_v29  ;;  %v2883_v32 = vmul.f32 %v2687_v60, %v3484_v10  ;;  %v2887_v7 = vmul.f32 %v2691_v1, %v3485_v48  ;;  %v2891_v43 = vmul.f32 %v2679_v36, %v3487_v0 }
 0x1c4   :  { %v2895_v57 = vmul.f32 %v2683_v23, %v3489_v22  ;;  %v2899_v29 = vmul.f32 %v2687_v60, %v3491_v33  ;;  %v2903_v10 = vmul.f32 %v2691_v1, %v3493_v3  ;;  %v2907_v48 = vmul.f32 %v2679_v36, %v3495_v39 }
 0x1c5   :  { %3486 = vst [vmem:[#allocation10_spill] sm:$0xff] %v2887_v7  ;;  %3488 = vst [vmem:[#allocation11_spill] sm:$0xff] %v2891_v43  ;;  %v3497_v7 = vld [vmem:[#allocation33_spill] sm:$0xff]  ;;  %v3499_v43 = vld [vmem:[#allocation32_spill] sm:$0xff] }
 0x1c6   :  { %3490 = vst [vmem:[#allocation13_spill] sm:$0xff] %v2895_v57  ;;  %3492 = vst [vmem:[#allocation12_spill] sm:$0xff] %v2899_v29  ;;  %v2911_v0 = vmul.f32 %v2683_v23, %v3497_v7  ;;  %v2915_v22 = vmul.f32 %v2687_v60, %v3499_v43  ;;  %v3501_v57 = vld [vmem:[#allocation34_spill] sm:$0xff]  ;;  %v3503_v29 = vld [vmem:[#allocation35_spill] sm:$0xff] }
 0x1c7   :  { %3494 = vst [vmem:[#allocation14_spill] sm:$0xff] %v2903_v10  ;;  %3496 = vst [vmem:[#allocation15_spill] sm:$0xff] %v2907_v48  ;;  %v2919_v33 = vmul.f32 %v2691_v1, %v3501_v57  ;;  %v2923_v3 = vmul.f32 %v2679_v36, %v3503_v29  ;;  %v3505_v10 = vld [vmem:[#allocation37_spill] sm:$0xff]  ;;  %v3507_v48 = vld [vmem:[#allocation36_spill] sm:$0xff] }
 0x1c8   :  { %3498 = vst [vmem:[#allocation17_spill] sm:$0xff] %v2911_v0  ;;  %3500 = vst [vmem:[#allocation16_spill] sm:$0xff] %v2915_v22  ;;  %v2927_v39 = vmul.f32 %v2683_v23, %v3505_v10  ;;  %v2931_v7 = vmul.f32 %v2687_v60, %v3507_v48  ;;  %v3509_v0 = vld [vmem:[#allocation38_spill] sm:$0xff]  ;;  %v3511_v22 = vld [vmem:[#allocation39_spill] sm:$0xff] }
 0x1c9   :  { %3502 = vst [vmem:[#allocation18_spill] sm:$0xff] %v2919_v33  ;;  %3504 = vst [vmem:[#allocation19_spill] sm:$0xff] %v2923_v3  ;;  %v2935_v43 = vmul.f32 %v2691_v1, %v3509_v0  ;;  %v2939_v57 = vmul.f32 %v2679_v36, %v3511_v22  ;;  %v3512_v33 = vld [vmem:[#allocation41_spill] sm:$0xff]  ;;  %v3513_v3 = vld [vmem:[#allocation40_spill] sm:$0xff]  ;;  %v3517_v22 = vsub.s32 2, %v2670_v51 }
 0x1ca   :  { %3506 = vst [vmem:[#allocation21_spill] sm:$0xff] %v2927_v39  ;;  %3508 = vst [vmem:[#allocation20_spill] sm:$0xff] %v2931_v7  ;;  %v2943_v29 = vmul.f32 %v2683_v23, %v3512_v33  ;;  %v2947_v10 = vmul.f32 %v2687_v60, %v3513_v3  ;;  %v3514_v39 = vld [vmem:[#allocation42_spill] sm:$0xff]  ;;  %v3515_v7 = vsub.s32 0, %v2670_v51  ;;  %v3518_v33 = vsub.s32 3, %v2670_v51 }
 0x1cb   :  { %3510 = vst [vmem:[#allocation22_spill] sm:$0xff] %v2935_v43  ;;  %v2951_v48 = vmul.f32 %v2691_v1, %v3514_v39  ;;  %v3516_v43 = vsub.s32 1, %v2670_v51  ;;  %v2963_v23 = vrot.slane %v1434_v44, %v3517_v22 }
 0x1cc   :  { %v2955_v0 = vrot.slane %v1434_v44, %v3515_v7  ;;  %v2967_v60 = vrot.slane %v1434_v44, %v3518_v33 }
 0x1cd   :  { %v2959_v36 = vrot.slane %v1434_v44, %v3516_v43  ;;  %v3526_v43 = vld [vmem:[#allocation11_spill] sm:$0xff]  ;;  %v3528_v22 = vld [vmem:[#allocation13_spill] sm:$0xff]  ;;  %v3530_v33 = vld [vmem:[#allocation12_spill] sm:$0xff] }
 0x1ce   :  { %v2971_v1 = vadd.f32 %v2955_v0, %v2699_v37  ;;  %v2975_v3 = vadd.f32 %v2955_v0, %v2715_v45  ;;  %v2979_v39 = vadd.f32 %v2955_v0, %v2731_v19  ;;  %v2983_v7 = vadd.f32 %v2955_v0, %v2747_v31 }
 0x1cf   :  { %v2987_v51 = vadd.f32 %v2959_v36, %v2703_v20  ;;  %v2991_v37 = vadd.f32 %v2963_v23, %v2707_v49  ;;  %v2995_v45 = vadd.f32 %v2967_v60, %v2711_v11  ;;  %v2999_v19 = vadd.f32 %v2959_v36, %v2719_v16 }
 0x1d0   :  { %3519 = vst [vmem:[#allocation23_spill] sm:$0xff] %v2971_v1  ;;  %v3003_v31 = vadd.f32 %v2963_v23, %v2723_v18  ;;  %v3007_v20 = vadd.f32 %v2967_v60, %v2727_v17  ;;  %v3011_v49 = vadd.f32 %v2959_v36, %v2735_v24  ;;  %v3015_v11 = vadd.f32 %v2963_v23, %v2739_v30 }
 0x1d1   :  { %3520 = vst [vmem:[#allocation25_spill] sm:$0xff] %v2987_v51  ;;  %3521 = vst [vmem:[#allocation24_spill] sm:$0xff] %v2991_v37  ;;  %v3019_v16 = vadd.f32 %v2967_v60, %v2743_v25  ;;  %v3023_v18 = vadd.f32 %v2959_v36, %v2751_v40  ;;  %v3027_v17 = vadd.f32 %v2963_v23, %v2755_v46 }
 0x1d2   :  { %v3031_v24 = vadd.f32 %v2967_v60, %v2759_v41  ;;  %v3035_v30 = vadd.f32 %v2955_v0, %v2763_v47  ;;  %v3039_v25 = vadd.f32 %v2959_v36, %v2767_v52  ;;  %v3043_v40 = vadd.f32 %v2963_v23, %v2771_v58 }
 0x1d3   :  { %v3047_v46 = vadd.f32 %v2967_v60, %v2775_v53  ;;  %v3051_v41 = vadd.f32 %v2955_v0, %v2779_v59  ;;  %v3055_v47 = vadd.f32 %v2959_v36, %v2783_v8  ;;  %v3059_v52 = vadd.f32 %v2963_v23, %v2787_v14 }
 0x1d4   :  { %v3063_v58 = vadd.f32 %v2967_v60, %v2791_v9  ;;  %v3067_v53 = vadd.f32 %v2955_v0, %v2795_v15  ;;  %v3071_v59 = vadd.f32 %v2959_v36, %v2799_v26  ;;  %v3075_v8 = vadd.f32 %v2963_v23, %v2803_v34 }
 0x1d5   :  { %v3079_v14 = vadd.f32 %v2967_v60, %v2807_v27  ;;  %v3083_v9 = vadd.f32 %v2955_v0, %v2811_v35  ;;  %v3087_v15 = vadd.f32 %v2959_v36, %v2815_v54  ;;  %v3091_v26 = vadd.f32 %v2963_v23, %v2819_v62 }
 0x1d6   :  { %v3095_v34 = vadd.f32 %v2967_v60, %v2823_v55  ;;  %v3099_v27 = vadd.f32 %v2955_v0, %v2827_v63  ;;  %v3103_v35 = vadd.f32 %v2959_v36, %v2831_v4  ;;  %v3107_v54 = vadd.f32 %v2963_v23, %v2835_v12 }
 0x1d7   :  { %v3111_v44 = vadd.f32 %v2967_v60, %v2839_v5  ;;  %v3115_v62 = vadd.f32 %v2955_v0, %v2843_v2  ;;  %v3119_v55 = vadd.f32 %v2959_v36, %v2847_v28  ;;  %v3123_v63 = vadd.f32 %v2963_v23, %v2851_v38 }
 0x1d8   :  { %v3127_v4 = vadd.f32 %v2967_v60, %v2855_v50  ;;  %v3131_v12 = vadd.f32 %v2955_v0, %v2859_v56  ;;  %v3135_v5 = vadd.f32 %v2959_v36, %v2863_v42  ;;  %v3139_v2 = vadd.f32 %v2963_v23, %v2867_v61  ;;  %v3524_v42 = vld [vmem:[#allocation10_spill] sm:$0xff] }
 0x1d9   :  { %v3143_v28 = vadd.f32 %v2967_v60, %v2871_v13  ;;  %v3147_v38 = vadd.f32 %v2955_v0, %v2875_v6  ;;  %v3151_v50 = vadd.f32 %v2959_v36, %v2879_v21  ;;  %v3155_v56 = vadd.f32 %v2963_v23, %v2883_v32 }
 0x1da   :  { %v3159_v61 = vadd.f32 %v2967_v60, %v3524_v42  ;;  %v3163_v13 = vadd.f32 %v2955_v0, %v3526_v43  ;;  %v3167_v6 = vadd.f32 %v2959_v36, %v3528_v22  ;;  %v3171_v21 = vadd.f32 %v2963_v23, %v3530_v33 }
 0x1db   :  { %3522 = vst [vmem:[#allocation26_spill] sm:$0xff] %v3151_v50  ;;  %3523 = vst [vmem:[#allocation27_spill] sm:$0xff] %v3155_v56  ;;  %v3532_v50 = vld [vmem:[#allocation14_spill] sm:$0xff]  ;;  %v3534_v56 = vld [vmem:[#allocation15_spill] sm:$0xff] }
 0x1dc   :  { %3525 = vst [vmem:[#allocation29_spill] sm:$0xff] %v3159_v61  ;;  %3527 = vst [vmem:[#allocation28_spill] sm:$0xff] %v3163_v13  ;;  %v3175_v32 = vadd.f32 %v2967_v60, %v3532_v50  ;;  %v3179_v42 = vadd.f32 %v2955_v0, %v3534_v56  ;;  %v3536_v61 = vld [vmem:[#allocation17_spill] sm:$0xff]  ;;  %v3538_v13 = vld [vmem:[#allocation16_spill] sm:$0xff] }
 0x1dd   :  { %3529 = vst [vmem:[#allocation30_spill] sm:$0xff] %v3167_v6  ;;  %3531 = vst [vmem:[#allocation31_spill] sm:$0xff] %v3171_v21  ;;  %v3183_v43 = vadd.f32 %v2959_v36, %v3536_v61  ;;  %v3187_v22 = vadd.f32 %v2963_v23, %v3538_v13  ;;  %v3539_v6 = vld [vmem:[#allocation18_spill] sm:$0xff]  ;;  %v3540_v21 = vld [vmem:[#allocation19_spill] sm:$0xff] }
 0x1de   :  { %3533 = vst [vmem:[#allocation33_spill] sm:$0xff] %v3175_v32  ;;  %3535 = vst [vmem:[#allocation32_spill] sm:$0xff] %v3179_v42  ;;  %v3191_v33 = vadd.f32 %v2967_v60, %v3539_v6  ;;  %v3195_v50 = vadd.f32 %v2955_v0, %v3540_v21  ;;  %v3541_v32 = vld [vmem:[#allocation21_spill] sm:$0xff]  ;;  %v3543_v42 = vld [vmem:[#allocation20_spill] sm:$0xff]  ;;  %v3211_v6 = vadd.f32 %v2955_v0, %v2939_v57  ;;  %v1587_v57 = vmax.f32 %v2995_v45, 0.0 }
 0x1df   :  { %3537 = vst [vmem:[#allocation34_spill] sm:$0xff] %v3183_v43  ;;  %v3199_v56 = vadd.f32 %v2959_v36, %v3541_v32  ;;  %v3203_v61 = vadd.f32 %v2963_v23, %v3543_v42  ;;  %v3545_v43 = vld [vmem:[#allocation22_spill] sm:$0xff]  ;;  %v3215_v21 = vadd.f32 %v2959_v36, %v2943_v29  ;;  %v3219_v32 = vadd.f32 %v2963_v23, %v2947_v10 }
 0x1e0   :  { %v3207_v13 = vadd.f32 %v2967_v60, %v3545_v43  ;;  %3547 = vst [vmem:[#allocation38_spill] sm:$0xff] %v3211_v6  ;;  %v3223_v42 = vadd.f32 %v2967_v60, %v2951_v48  ;;  %v1588_v0 = vmax.f32 %v2975_v3, 0.0  ;;  %v1589_v29 = vmax.f32 %v2999_v19, 0.0 }
 0x1e1   :  { %3542 = vst [vmem:[#allocation35_spill] sm:$0xff] %v3199_v56  ;;  %3544 = vst [vmem:[#allocation37_spill] sm:$0xff] %v3203_v61  ;;  %v1590_v36 = vmax.f32 %v3003_v31, 0.0  ;;  %v1591_v10 = vmax.f32 %v3007_v20, 0.0  ;;  %v1592_v23 = vmax.f32 %v2979_v39, 0.0  ;;  %v1593_v48 = vmax.f32 %v3011_v49, 0.0 }
 0x1e2   :  { %3546 = vst [vmem:[#allocation36_spill] sm:$0xff] %v3207_v13  ;;  %3548 = vst [vmem:[#allocation39_spill] sm:$0xff] %v3215_v21  ;;  %v1594_v60 = vmax.f32 %v3015_v11, 0.0  ;;  %v1595_v43 = vmax.f32 %v3019_v16, 0.0  ;;  %v1596_v13 = vmax.f32 %v2983_v7, 0.0  ;;  %v1597_v45 = vmax.f32 %v3023_v18, 0.0 }
 0x1e3   :  { %3549 = vst [vmem:[#allocation41_spill] sm:$0xff] %v3219_v32  ;;  %3550 = vst [vmem:[#allocation40_spill] sm:$0xff] %v3223_v42  ;;  %v1598_v3 = vmax.f32 %v3027_v17, 0.0  ;;  %v1599_v19 = vmax.f32 %v3031_v24, 0.0  ;;  %v1600_v31 = vmax.f32 %v3035_v30, 0.0  ;;  %v1601_v20 = vmax.f32 %v3039_v25, 0.0 }
 0x1e4   :  { %v1602_v39 = vmax.f32 %v3043_v40, 0.0  ;;  %v1603_v49 = vmax.f32 %v3047_v46, 0.0  ;;  %v1604_v11 = vmax.f32 %v3051_v41, 0.0  ;;  %v1605_v16 = vmax.f32 %v3055_v47, 0.0  ;;  %v3551_v61 = vld [vmem:[#allocation26_spill] sm:$0xff]  ;;  %v3552_v37 = vld [vmem:[#allocation27_spill] sm:$0xff] }
 0x1e5   :  { %v1606_v7 = vmax.f32 %v3059_v52, 0.0  ;;  %v1607_v18 = vmax.f32 %v3063_v58, 0.0  ;;  %v1608_v17 = vmax.f32 %v3067_v53, 0.0  ;;  %v1609_v24 = vmax.f32 %v3071_v59, 0.0  ;;  %v3553_v51 = vld [vmem:[#allocation29_spill] sm:$0xff]  ;;  %v3554_v1 = vld [vmem:[#allocation28_spill] sm:$0xff] }
 0x1e6   :  { %v1610_v30 = vmax.f32 %v3075_v8, 0.0  ;;  %v1611_v25 = vmax.f32 %v3079_v14, 0.0  ;;  %v1612_v40 = vmax.f32 %v3083_v9, 0.0  ;;  %v1613_v46 = vmax.f32 %v3087_v15, 0.0  ;;  %v3555_v42 = vld [vmem:[#allocation30_spill] sm:$0xff]  ;;  %v3556_v32 = vld [vmem:[#allocation31_spill] sm:$0xff] }
 0x1e7   :  { %v1614_v41 = vmax.f32 %v3091_v26, 0.0  ;;  %v1615_v47 = vmax.f32 %v3095_v34, 0.0  ;;  %v1616_v52 = vmax.f32 %v3099_v27, 0.0  ;;  %v1617_v58 = vmax.f32 %v3103_v35, 0.0  ;;  %v3557_v21 = vld [vmem:[#allocation33_spill] sm:$0xff]  ;;  %v3558_v6 = vld [vmem:[#allocation32_spill] sm:$0xff] }
 0x1e8   :  { %v1618_v53 = vmax.f32 %v3107_v54, 0.0  ;;  %v1619_v59 = vmax.f32 %v3111_v44, 0.0  ;;  %v1620_v8 = vmax.f32 %v3115_v62, 0.0  ;;  %v1621_v14 = vmax.f32 %v3119_v55, 0.0  ;;  %v3559_v56 = vld [vmem:[#allocation34_spill] sm:$0xff] }
 0x1e9   :  { %v1622_v9 = vmax.f32 %v3123_v63, 0.0  ;;  %v1623_v15 = vmax.f32 %v3127_v4, 0.0  ;;  %v1624_v26 = vmax.f32 %v3131_v12, 0.0  ;;  %v1625_v34 = vmax.f32 %v3135_v5, 0.0 }
 0x1ea   :  { %v1626_v27 = vmax.f32 %v3139_v2, 0.0  ;;  %v1627_v35 = vmax.f32 %v3143_v28, 0.0  ;;  %v1628_v54 = vmax.f32 %v3147_v38, 0.0  ;;  %v1629_v44 = vmax.f32 %v3551_v61, 0.0 }
 0x1eb   :  { %v1630_v62 = vmax.f32 %v3552_v37, 0.0  ;;  %v1631_v55 = vmax.f32 %v3553_v51, 0.0  ;;  %v1632_v63 = vmax.f32 %v3554_v1, 0.0  ;;  %v1633_v4 = vmax.f32 %v3555_v42, 0.0  ;;  %v3560_v51 = vld [vmem:[#allocation35_spill] sm:$0xff]  ;;  %v3561_v42 = vld [vmem:[#allocation37_spill] sm:$0xff] }
 0x1ec   :  { %v1634_v12 = vmax.f32 %v3556_v32, 0.0  ;;  %v1635_v5 = vmax.f32 %v3557_v21, 0.0  ;;  %v1636_v2 = vmax.f32 %v3558_v6, 0.0  ;;  %v1637_v28 = vmax.f32 %v3559_v56, 0.0  ;;  %v3562_v21 = vld [vmem:[#allocation36_spill] sm:$0xff]  ;;  %v3563_v56 = vld [vmem:[#allocation38_spill] sm:$0xff] }
 0x1ed   :  { %v1638_v38 = vmax.f32 %v3187_v22, 0.0  ;;  %v1639_v61 = vmax.f32 %v3191_v33, 0.0  ;;  %v1640_v37 = vmax.f32 %v3195_v50, 0.0  ;;  %v1641_v1 = vmax.f32 %v3560_v51, 0.0  ;;  %v3564_v33 = vld [vmem:[#allocation39_spill] sm:$0xff]  ;;  %v3565_v51 = vld [vmem:[#allocation41_spill] sm:$0xff] }
 0x1ee   :  { %v1642_v32 = vmax.f32 %v3561_v42, 0.0  ;;  %v1643_v6 = vmax.f32 %v3562_v21, 0.0  ;;  %v1644_v22 = vmax.f32 %v3563_v56, 0.0  ;;  %v1645_v50 = vmax.f32 %v3564_v33, 0.0  ;;  %v3566_v21 = vld [vmem:[#allocation40_spill] sm:$0xff]  ;;  %v3567_v33 = vld [vmem:[#allocation23_spill] sm:$0xff] }
 0x1ef   :  { %v1646_v42 = vmax.f32 %v3565_v51, 0.0  ;;  %v1647_v56 = vmax.f32 %v3566_v21, 0.0  ;;  %v3568_v51 = vmax.f32 %v3567_v33, 0.0  ;;  %v3569_v21 = vld [vmem:[#allocation25_spill] sm:$0xff] }
 0x1f0   :  { %v3570_v33 = vmax.f32 %v3569_v21, 0.0 }
 0x1f2   :  { %v1992_v21 = vpack.c.bf16 %v3570_v33, %v3568_v51  ;;  %v3571_v33 = vld [vmem:[#allocation24_spill] sm:$0xff] }
 0x1f3   :  { %v3572_v51 = vmax.f32 %v3571_v33, 0.0 }
 0x1f4   :  { %1840 = vst [vmem:[%s3395_s4] sm:$0xff] %v1992_v21 }
 0x1f5   :  { %v1993_v33 = vpack.c.bf16 %v1587_v57, %v3572_v51  ;;  %v1994_v51 = vpack.c.bf16 %v1589_v29, %v1588_v0  ;;  %v1995_v57 = vpack.c.bf16 %v1591_v10, %v1590_v36  ;;  %v1996_v0 = vpack.c.bf16 %v1593_v48, %v1592_v23 }
 0x1f6   :  { %v1997_v29 = vpack.c.bf16 %v1595_v43, %v1594_v60  ;;  %v1998_v10 = vpack.c.bf16 %v1597_v45, %v1596_v13  ;;  %v1999_v36 = vpack.c.bf16 %v1599_v19, %v1598_v3  ;;  %v2000_v23 = vpack.c.bf16 %v1601_v20, %v1600_v31 }
 0x1f7   :  { %v2001_v48 = vpack.c.bf16 %v1603_v49, %v1602_v39  ;;  %v2002_v43 = vpack.c.bf16 %v1605_v16, %v1604_v11  ;;  %v2003_v60 = vpack.c.bf16 %v1607_v18, %v1606_v7  ;;  %1841 = vst [vmem:[%s3395_s4 + $0x8] sm:$0xff] %v1993_v33  ;;  %1842 = vst [vmem:[%s3395_s4 + $0x10] sm:$0xff] %v1994_v51 }
 0x1f8   :  { %1843 = vst [vmem:[%s3395_s4 + $0x18] sm:$0xff] %v1995_v57  ;;  %v2004_v13 = vpack.c.bf16 %v1609_v24, %v1608_v17  ;;  %v2005_v45 = vpack.c.bf16 %v1611_v25, %v1610_v30  ;;  %v2006_v3 = vpack.c.bf16 %v1613_v46, %v1612_v40  ;;  %v2007_v19 = vpack.c.bf16 %v1615_v47, %v1614_v41 }
 0x1f9   :  { %1844 = vst [vmem:[%s3395_s4 + $0x20] sm:$0xff] %v1996_v0  ;;  %1845 = vst [vmem:[%s3395_s4 + $0x28] sm:$0xff] %v1997_v29  ;;  %v2008_v31 = vpack.c.bf16 %v1617_v58, %v1616_v52  ;;  %v2009_v20 = vpack.c.bf16 %v1619_v59, %v1618_v53  ;;  %v2010_v39 = vpack.c.bf16 %v1621_v14, %v1620_v8 }
 0x1fa   :  { %1846 = vst [vmem:[%s3395_s4 + $0x30] sm:$0xff] %v1998_v10  ;;  %1847 = vst [vmem:[%s3395_s4 + $0x38] sm:$0xff] %v1999_v36  ;;  %v2011_v49 = vpack.c.bf16 %v1623_v15, %v1622_v9  ;;  %v2012_v11 = vpack.c.bf16 %v1625_v34, %v1624_v26  ;;  %v2013_v16 = vpack.c.bf16 %v1627_v35, %v1626_v27 }
 0x1fb   :  { %1848 = vst [vmem:[%s3395_s4 + $0x40] sm:$0xff] %v2000_v23  ;;  %1849 = vst [vmem:[%s3395_s4 + $0x48] sm:$0xff] %v2001_v48  ;;  %v2014_v7 = vpack.c.bf16 %v1629_v44, %v1628_v54  ;;  %v2015_v18 = vpack.c.bf16 %v1631_v55, %v1630_v62  ;;  %v2016_v17 = vpack.c.bf16 %v1633_v4, %v1632_v63 }
 0x1fc   :  { %1850 = vst [vmem:[%s3395_s4 + $0x50] sm:$0xff] %v2002_v43  ;;  %1851 = vst [vmem:[%s3395_s4 + $0x58] sm:$0xff] %v2003_v60  ;;  %v2017_v24 = vpack.c.bf16 %v1635_v5, %v1634_v12  ;;  %v2018_v30 = vpack.c.bf16 %v1637_v28, %v1636_v2  ;;  %v2019_v25 = vpack.c.bf16 %v1639_v61, %v1638_v38 }
 0x1fd   :  { %1852 = vst [vmem:[%s3395_s4 + $0x60] sm:$0xff] %v2004_v13  ;;  %1853 = vst [vmem:[%s3395_s4 + $0x68] sm:$0xff] %v2005_v45  ;;  %v2020_v40 = vpack.c.bf16 %v1641_v1, %v1640_v37  ;;  %v2021_v46 = vpack.c.bf16 %v1643_v6, %v1642_v32  ;;  %v2022_v41 = vpack.c.bf16 %v1645_v50, %v1644_v22 }
 0x1fe   :  { %1854 = vst [vmem:[%s3395_s4 + $0x70] sm:$0xff] %v2006_v3  ;;  %1855 = vst [vmem:[%s3395_s4 + $0x78] sm:$0xff] %v2007_v19  ;;  %v2023_v47 = vpack.c.bf16 %v1647_v56, %v1646_v42 }
 0x1ff   :  { %1856 = vst [vmem:[%s3395_s4 + $0x80] sm:$0xff] %v2008_v31  ;;  %1857 = vst [vmem:[%s3395_s4 + $0x88] sm:$0xff] %v2009_v20 }
 0x200   :  { %1858 = vst [vmem:[%s3395_s4 + $0x90] sm:$0xff] %v2010_v39  ;;  %1859 = vst [vmem:[%s3395_s4 + $0x98] sm:$0xff] %v2011_v49 }
 0x201   :  { %1860 = vst [vmem:[%s3395_s4 + $0xa0] sm:$0xff] %v2012_v11  ;;  %1861 = vst [vmem:[%s3395_s4 + $0xa8] sm:$0xff] %v2013_v16 }
 0x202   :  { %1862 = vst [vmem:[%s3395_s4 + $0xb0] sm:$0xff] %v2014_v7  ;;  %1863 = vst [vmem:[%s3395_s4 + $0xb8] sm:$0xff] %v2015_v18 }
 0x203   :  { %1864 = vst [vmem:[%s3395_s4 + $0xc0] sm:$0xff] %v2016_v17  ;;  %1865 = vst [vmem:[%s3395_s4 + $0xc8] sm:$0xff] %v2017_v24 }
 0x204   :  { %1866 = vst [vmem:[%s3395_s4 + $0xd0] sm:$0xff] %v2018_v30  ;;  %1867 = vst [vmem:[%s3395_s4 + $0xd8] sm:$0xff] %v2019_v25 }
 0x205   :  { %1868 = vst [vmem:[%s3395_s4 + $0xe0] sm:$0xff] %v2020_v40  ;;  %1869 = vst [vmem:[%s3395_s4 + $0xe8] sm:$0xff] %v2021_v46 }
 0x206   :  { %1870 = vst [vmem:[%s3395_s4 + $0xf0] sm:$0xff] %v2022_v41  ;;  %1871 = vst [vmem:[%s3395_s4 + $0xf8] sm:$0xff] %v2023_v47 }
 0x207   :  { %1876 = vsyncpa [#allocation4], 1 }
 0x208   :  { %1877 = vsyncpa [#allocation6], 1 }

// kernel: projector_forward.4
= control target key start
LH: loop header
LB: loop body
LE: loop exit
PB: predicated region body
PF: predicated region fallthrough
CT: control target
= control target key end

     0   :  { %s4641_s1 = inlined_call_operand.vmem [shape: bf16[512,512], index: 1, kind: input, shape index: {}]   ;;  %s4642_s0 = inlined_call_operand.vmem [shape: bf16[128,512], index: 0, kind: input, shape index: {}]   ;;  %s4643_s2 = inlined_call_operand.vmem [shape: f32[1,512], index: 2, kind: input, shape index: {}]   ;;  %s4644_s3 = inlined_call_operand.vmem [shape: f32[1,512], index: 3, kind: input, shape index: {}]   ;;  %s4645_s4 = inlined_call_operand.vmem [shape: bf16[128,512], index: 4, kind: output, shape index: {}]  }
   0x1   :  { %v2836_v0 = vld [vmem:[%s4641_s1 + $0x4] ss:$16 sps:$4 sm:$0xff]   ;;  %v2838_v1 = vld [vmem:[%s4641_s1 + $0xc] ss:$16 sps:$4 sm:$0xff]   ;;  %v2840_v2 = vld [vmem:[%s4641_s1] ss:$16 sps:$4 sm:$0xff]  }
   0x2   :  { %1114 = vmatprep.subr.bf16.mxu0 %v2836_v0  ;;  %v2841_v3 = vld [vmem:[%s4641_s1 + $0x8] ss:$16 sps:$4 sm:$0xff]   ;;  %1340 = vmatprep.subr.bf16.mxu1 %v2838_v1  ;;  %v2842_v4 = vld [vmem:[%s4641_s1 + $0x24] ss:$16 sps:$4 sm:$0xff]   ;;  %v2844_v5 = vld [vmem:[%s4641_s1 + $0x2c] ss:$16 sps:$4 sm:$0xff]  }
   0x3   :  { %1115 = vmatpush1.bf16.msra.mxu0 %v2840_v2  ;;  %1341 = vmatpush1.bf16.msra.mxu1 %v2841_v3  ;;  %v2846_v6 = vld [vmem:[%s4641_s1 + $0x20] ss:$16 sps:$4 sm:$0xff]   ;;  %v2847_v7 = vld [vmem:[%s4641_s1 + $0x28] ss:$16 sps:$4 sm:$0xff]   ;;  %v2848_v8 = vld [vmem:[%s4641_s1 + $0x44] ss:$16 sps:$4 sm:$0xff]  }
   0x4   :  { %1116 = vmatprep.subr.bf16.mxu0 %v2842_v4  ;;  %1342 = vmatprep.subr.bf16.mxu1 %v2844_v5  ;;  %v2850_v9 = vld [vmem:[%s4641_s1 + $0x4c] ss:$16 sps:$4 sm:$0xff]   ;;  %v2852_v10 = vld [vmem:[%s4641_s1 + $0x40] ss:$16 sps:$4 sm:$0xff]   ;;  %v2853_v11 = vld [vmem:[%s4641_s1 + $0x48] ss:$16 sps:$4 sm:$0xff]  }
   0x5   :  { %v2854_v12 = vld [vmem:[%s4641_s1 + $0x64] ss:$16 sps:$4 sm:$0xff]   ;;  %v2856_v13 = vld [vmem:[%s4641_s1 + $0x6c] ss:$16 sps:$4 sm:$0xff]   ;;  %v2858_v14 = vld [vmem:[%s4641_s1 + $0x60] ss:$16 sps:$4 sm:$0xff]  }
   0x6   :  { %v2859_v15 = vld [vmem:[%s4641_s1 + $0x68] ss:$16 sps:$4 sm:$0xff]   ;;  %v2860_v16 = vld [vmem:[%s4641_s1 + $0x84] ss:$16 sps:$4 sm:$0xff]   ;;  %v2862_v17 = vld [vmem:[%s4641_s1 + $0x8c] ss:$16 sps:$4 sm:$0xff]  }
   0x7   :  { %1117 = vmatpush1.bf16.msra.mxu0 %v2846_v6  ;;  %1343 = vmatpush1.bf16.msra.mxu1 %v2847_v7  ;;  %v2864_v18 = vld [vmem:[%s4641_s1 + $0x80] ss:$16 sps:$4 sm:$0xff]   ;;  %v2865_v19 = vld [vmem:[%s4641_s1 + $0x88] ss:$16 sps:$4 sm:$0xff]   ;;  %v2866_v20 = vld [vmem:[%s4641_s1 + $0xa4] ss:$16 sps:$4 sm:$0xff]  }
   0x8   :  { %1118 = vmatprep.subr.bf16.mxu0 %v2848_v8  ;;  %1344 = vmatprep.subr.bf16.mxu1 %v2850_v9  ;;  %v2868_v21 = vld [vmem:[%s4641_s1 + $0xac] ss:$16 sps:$4 sm:$0xff]   ;;  %v2870_v22 = vld [vmem:[%s4641_s1 + $0xa0] ss:$16 sps:$4 sm:$0xff]   ;;  %v2871_v23 = vld [vmem:[%s4641_s1 + $0xa8] ss:$16 sps:$4 sm:$0xff]  }
   0x9   :  { %v2872_v24 = vld [vmem:[%s4641_s1 + $0xc4] ss:$16 sps:$4 sm:$0xff]   ;;  %v2874_v25 = vld [vmem:[%s4641_s1 + $0xcc] ss:$16 sps:$4 sm:$0xff]   ;;  %v2876_v26 = vld [vmem:[%s4641_s1 + $0xc0] ss:$16 sps:$4 sm:$0xff]  }
   0xa   :  { %v2877_v27 = vld [vmem:[%s4641_s1 + $0xc8] ss:$16 sps:$4 sm:$0xff]   ;;  %v2878_v28 = vld [vmem:[%s4641_s1 + $0xe4] ss:$16 sps:$4 sm:$0xff]   ;;  %v2880_v29 = vld [vmem:[%s4641_s1 + $0xec] ss:$16 sps:$4 sm:$0xff]  }
   0xb   :  { %1119 = vmatpush1.bf16.msra.mxu0 %v2852_v10  ;;  %1345 = vmatpush1.bf16.msra.mxu1 %v2853_v11  ;;  %v2882_v30 = vld [vmem:[%s4641_s1 + $0xe0] ss:$16 sps:$4 sm:$0xff]   ;;  %v2883_v31 = vld [vmem:[%s4641_s1 + $0xe8] ss:$16 sps:$4 sm:$0xff]   ;;  %v2884_v32 = vld [vmem:[%s4641_s1 + $0x104] ss:$16 sps:$4 sm:$0xff]  }
   0xc   :  { %1120 = vmatprep.subr.bf16.mxu0 %v2854_v12  ;;  %1346 = vmatprep.subr.bf16.mxu1 %v2856_v13  ;;  %v2886_v33 = vld [vmem:[%s4641_s1 + $0x10c] ss:$16 sps:$4 sm:$0xff]   ;;  %v2888_v34 = vld [vmem:[%s4641_s1 + $0x100] ss:$16 sps:$4 sm:$0xff]   ;;  %v2889_v35 = vld [vmem:[%s4641_s1 + $0x108] ss:$16 sps:$4 sm:$0xff]  }
   0xd   :  { %v2890_v36 = vld [vmem:[%s4641_s1 + $0x124] ss:$16 sps:$4 sm:$0xff]   ;;  %v2892_v37 = vld [vmem:[%s4641_s1 + $0x12c] ss:$16 sps:$4 sm:$0xff]   ;;  %v2894_v38 = vld [vmem:[%s4641_s1 + $0x120] ss:$16 sps:$4 sm:$0xff]  }
   0xe   :  { %v2895_v39 = vld [vmem:[%s4641_s1 + $0x128] ss:$16 sps:$4 sm:$0xff]   ;;  %v2896_v40 = vld [vmem:[%s4641_s1 + $0x144] ss:$16 sps:$4 sm:$0xff]   ;;  %v2898_v41 = vld [vmem:[%s4641_s1 + $0x14c] ss:$16 sps:$4 sm:$0xff]  }
   0xf   :  { %1121 = vmatpush1.bf16.msra.mxu0 %v2858_v14  ;;  %1347 = vmatpush1.bf16.msra.mxu1 %v2859_v15  ;;  %v2900_v42 = vld [vmem:[%s4641_s1 + $0x140] ss:$16 sps:$4 sm:$0xff]   ;;  %v2901_v43 = vld [vmem:[%s4641_s1 + $0x148] ss:$16 sps:$4 sm:$0xff]   ;;  %v2902_v44 = vld [vmem:[%s4641_s1 + $0x164] ss:$16 sps:$4 sm:$0xff]  }
  0x10   :  { %1122 = vmatprep.subr.bf16.mxu0 %v2860_v16  ;;  %1348 = vmatprep.subr.bf16.mxu1 %v2862_v17  ;;  %v2904_v45 = vld [vmem:[%s4641_s1 + $0x16c] ss:$16 sps:$4 sm:$0xff]   ;;  %v2906_v46 = vld [vmem:[%s4641_s1 + $0x160] ss:$16 sps:$4 sm:$0xff]   ;;  %v2907_v47 = vld [vmem:[%s4641_s1 + $0x168] ss:$16 sps:$4 sm:$0xff]  }
  0x11   :  { %v2934_v48 = vld [vmem:[%s4642_s0 + $0x4] ss:$16 sps:$4 sm:$0xff]   ;;  %v2910_v50 = vld [vmem:[%s4641_s1 + $0x18c] ss:$16 sps:$4 sm:$0xff]   ;;  %v2912_v51 = vld [vmem:[%s4641_s1 + $0x180] ss:$16 sps:$4 sm:$0xff]  }
  0x12   :  { %v2908_v49 = vld [vmem:[%s4641_s1 + $0x184] ss:$16 sps:$4 sm:$0xff]   ;;  %1146 = vmatprep.mubr.bf16.mxu0 %v2934_v48  ;;  %1372 = vmatprep.mubr.bf16.mxu1 %v2934_v48  ;;  %v2913_v52 = vld [vmem:[%s4641_s1 + $0x188] ss:$16 sps:$4 sm:$0xff]   ;;  %v2916_v54 = vld [vmem:[%s4641_s1 + $0x1ac] ss:$16 sps:$4 sm:$0xff]  }
  0x13   :  { %1123 = vmatpush1.bf16.msra.mxu0 %v2864_v18  ;;  %1349 = vmatpush1.bf16.msra.mxu1 %v2865_v19  ;;  %v2914_v53 = vld [vmem:[%s4641_s1 + $0x1a4] ss:$16 sps:$4 sm:$0xff]   ;;  %v2918_v55 = vld [vmem:[%s4641_s1 + $0x1a0] ss:$16 sps:$4 sm:$0xff]   ;;  %v2919_v56 = vld [vmem:[%s4641_s1 + $0x1a8] ss:$16 sps:$4 sm:$0xff]  }
  0x14   :  { %1124 = vmatprep.subr.bf16.mxu0 %v2866_v20  ;;  %1350 = vmatprep.subr.bf16.mxu1 %v2868_v21  ;;  %v2920_v57 = vld [vmem:[%s4641_s1 + $0x1c4] ss:$16 sps:$4 sm:$0xff]   ;;  %v2922_v58 = vld [vmem:[%s4641_s1 + $0x1cc] ss:$16 sps:$4 sm:$0xff]   ;;  %v2924_v59 = vld [vmem:[%s4641_s1 + $0x1c0] ss:$16 sps:$4 sm:$0xff]  }
  0x15   :  { %v2925_v60 = vld [vmem:[%s4641_s1 + $0x1c8] ss:$16 sps:$4 sm:$0xff]   ;;  %v2926_v61 = vld [vmem:[%s4641_s1 + $0x1e4] ss:$16 sps:$4 sm:$0xff]   ;;  %v2928_v62 = vld [vmem:[%s4641_s1 + $0x1ec] ss:$16 sps:$4 sm:$0xff]  }
  0x16   :  { %v2930_v63 = vld [vmem:[%s4641_s1 + $0x1e0] ss:$16 sps:$4 sm:$0xff]   ;;  %v2931_v0 = vld [vmem:[%s4641_s1 + $0x1e8] ss:$16 sps:$4 sm:$0xff]   ;;  %v2937_v1 = vld [vmem:[%s4641_s1 + $0x204] ss:$16 sps:$4 sm:$0xff]  }
  0x17   :  { %1125 = vmatpush1.bf16.msra.mxu0 %v2870_v22  ;;  %1351 = vmatpush1.bf16.msra.mxu1 %v2871_v23  ;;  %v2940_v2 = vld [vmem:[%s4641_s1 + $0x20c] ss:$16 sps:$4 sm:$0xff]   ;;  %v2932_v3 = vld [vmem:[%s4642_s0] ss:$16 sps:$4 sm:$0xff]   ;;  %v2938_v5 = vld [vmem:[%s4641_s1 + $0x208] ss:$16 sps:$4 sm:$0xff]  }
  0x18   :  { %1126 = vmatprep.subr.bf16.mxu0 %v2872_v24  ;;  %1352 = vmatprep.subr.bf16.mxu1 %v2874_v25  ;;  %v2935_v4 = vld [vmem:[%s4641_s1 + $0x200] ss:$16 sps:$4 sm:$0xff]   ;;  %v2943_v6 = vld [vmem:[%s4641_s1 + $0x224] ss:$16 sps:$4 sm:$0xff]   ;;  %v2946_v7 = vld [vmem:[%s4641_s1 + $0x22c] ss:$16 sps:$4 sm:$0xff]  }
  0x19   :  { %v2947_v8 = vld [vmem:[%s4642_s0 + $0x24] ss:$16 sps:$4 sm:$0xff]   ;;  %v2941_v9 = vld [vmem:[%s4641_s1 + $0x220] ss:$16 sps:$4 sm:$0xff]   ;;  %v2944_v10 = vld [vmem:[%s4641_s1 + $0x228] ss:$16 sps:$4 sm:$0xff]  }
  0x1a   :  { %v2952_v11 = vld [vmem:[%s4641_s1 + $0x244] ss:$16 sps:$4 sm:$0xff]   ;;  %v2955_v12 = vld [vmem:[%s4641_s1 + $0x24c] ss:$16 sps:$4 sm:$0xff]   ;;  %v2949_v13 = vld [vmem:[%s4642_s0 + $0x20] ss:$16 sps:$4 sm:$0xff]  }
  0x1b   :  { %1127 = vmatpush1.bf16.msra.mxu0 %v2876_v26  ;;  %1353 = vmatpush1.bf16.msra.mxu1 %v2877_v27  ;;  %v2950_v14 = vld [vmem:[%s4641_s1 + $0x240] ss:$16 sps:$4 sm:$0xff]   ;;  %v2953_v15 = vld [vmem:[%s4641_s1 + $0x248] ss:$16 sps:$4 sm:$0xff]   ;;  %v2958_v16 = vld [vmem:[%s4641_s1 + $0x264] ss:$16 sps:$4 sm:$0xff]  }
  0x1c   :  { %1128 = vmatprep.subr.bf16.mxu0 %v2878_v28  ;;  %1354 = vmatprep.subr.bf16.mxu1 %v2880_v29  ;;  %v2961_v17 = vld [vmem:[%s4641_s1 + $0x26c] ss:$16 sps:$4 sm:$0xff]   ;;  %v2962_v18 = vld [vmem:[%s4642_s0 + $0x44] ss:$16 sps:$4 sm:$0xff]   ;;  %v2956_v19 = vld [vmem:[%s4641_s1 + $0x260] ss:$16 sps:$4 sm:$0xff]  }
  0x1d   :  { %v2959_v20 = vld [vmem:[%s4641_s1 + $0x268] ss:$16 sps:$4 sm:$0xff]   ;;  %v2967_v21 = vld [vmem:[%s4641_s1 + $0x284] ss:$16 sps:$4 sm:$0xff]   ;;  %v2970_v22 = vld [vmem:[%s4641_s1 + $0x28c] ss:$16 sps:$4 sm:$0xff]  }
  0x1e   :  { %v2964_v23 = vld [vmem:[%s4642_s0 + $0x40] ss:$16 sps:$4 sm:$0xff]   ;;  %v2968_v25 = vld [vmem:[%s4641_s1 + $0x288] ss:$16 sps:$4 sm:$0xff]   ;;  %v2973_v26 = vld [vmem:[%s4641_s1 + $0x2a4] ss:$16 sps:$4 sm:$0xff]  }
  0x1f   :  { %1129 = vmatpush1.bf16.msra.mxu0 %v2882_v30  ;;  %1355 = vmatpush1.bf16.msra.mxu1 %v2883_v31  ;;  %v2965_v24 = vld [vmem:[%s4641_s1 + $0x280] ss:$16 sps:$4 sm:$0xff]   ;;  %v2976_v27 = vld [vmem:[%s4641_s1 + $0x2ac] ss:$16 sps:$4 sm:$0xff]   ;;  %v2977_v28 = vld [vmem:[%s4642_s0 + $0x64] ss:$16 sps:$4 sm:$0xff]  }
  0x20   :  { %1130 = vmatprep.subr.bf16.mxu0 %v2884_v32  ;;  %1356 = vmatprep.subr.bf16.mxu1 %v2886_v33  ;;  %v2971_v29 = vld [vmem:[%s4641_s1 + $0x2a0] ss:$16 sps:$4 sm:$0xff]   ;;  %v2974_v30 = vld [vmem:[%s4641_s1 + $0x2a8] ss:$16 sps:$4 sm:$0xff]   ;;  %v2982_v31 = vld [vmem:[%s4641_s1 + $0x2c4] ss:$16 sps:$4 sm:$0xff]  }
  0x21   :  { %v2985_v32 = vld [vmem:[%s4641_s1 + $0x2cc] ss:$16 sps:$4 sm:$0xff]   ;;  %v2979_v33 = vld [vmem:[%s4642_s0 + $0x60] ss:$16 sps:$4 sm:$0xff]   ;;  %v3007_v48 = vld [vmem:[%s4642_s0 + $0xa4] ss:$16 sps:$4 sm:$0xff]  }
  0x23   :  { %1131 = vmatpush1.bf16.msra.mxu0 %v2888_v34  ;;  %1357 = vmatpush1.bf16.msra.mxu1 %v2889_v35  ;;  %v2980_v34 = vld [vmem:[%s4641_s1 + $0x2c0] ss:$16 sps:$4 sm:$0xff]   ;;  %v2983_v35 = vld [vmem:[%s4641_s1 + $0x2c8] ss:$16 sps:$4 sm:$0xff]  }
  0x24   :  { %1132 = vmatprep.subr.bf16.mxu0 %v2890_v36  ;;  %1358 = vmatprep.subr.bf16.mxu1 %v2892_v37  ;;  %v2988_v36 = vld [vmem:[%s4641_s1 + $0x2e4] ss:$16 sps:$4 sm:$0xff]   ;;  %v2991_v37 = vld [vmem:[%s4641_s1 + $0x2ec] ss:$16 sps:$4 sm:$0xff]  }
  0x27   :  { %1133 = vmatpush1.bf16.msra.mxu0 %v2894_v38  ;;  %1359 = vmatpush1.bf16.msra.mxu1 %v2895_v39  ;;  %v2992_v38 = vld [vmem:[%s4642_s0 + $0x84] ss:$16 sps:$4 sm:$0xff]   ;;  %v2986_v39 = vld [vmem:[%s4641_s1 + $0x2e0] ss:$16 sps:$4 sm:$0xff]  }
  0x28   :  { %1134 = vmatprep.subr.bf16.mxu0 %v2896_v40  ;;  %1360 = vmatprep.subr.bf16.mxu1 %v2898_v41  ;;  %v2989_v40 = vld [vmem:[%s4641_s1 + $0x2e8] ss:$16 sps:$4 sm:$0xff]   ;;  %v2997_v41 = vld [vmem:[%s4641_s1 + $0x304] ss:$16 sps:$4 sm:$0xff]  }
  0x2b   :  { %1135 = vmatpush1.bf16.msra.mxu0 %v2900_v42  ;;  %1361 = vmatpush1.bf16.msra.mxu1 %v2901_v43  ;;  %v3000_v42 = vld [vmem:[%s4641_s1 + $0x30c] ss:$16 sps:$4 sm:$0xff]   ;;  %v2994_v43 = vld [vmem:[%s4642_s0 + $0x80] ss:$16 sps:$4 sm:$0xff]  }
  0x2c   :  { %1136 = vmatprep.subr.bf16.mxu0 %v2902_v44  ;;  %1362 = vmatprep.subr.bf16.mxu1 %v2904_v45  ;;  %v2995_v44 = vld [vmem:[%s4641_s1 + $0x300] ss:$16 sps:$4 sm:$0xff]   ;;  %v2998_v45 = vld [vmem:[%s4641_s1 + $0x308] ss:$16 sps:$4 sm:$0xff]  }
  0x2f   :  { %1137 = vmatpush1.bf16.msra.mxu0 %v2906_v46  ;;  %1363 = vmatpush1.bf16.msra.mxu1 %v2907_v47  ;;  %v3003_v46 = vld [vmem:[%s4641_s1 + $0x324] ss:$16 sps:$4 sm:$0xff]   ;;  %v3006_v47 = vld [vmem:[%s4641_s1 + $0x32c] ss:$16 sps:$4 sm:$0xff]  }
  0x30   :  { %1138 = vmatprep.subr.bf16.mxu0 %v2908_v49  ;;  %1364 = vmatprep.subr.bf16.mxu1 %v2910_v50  ;;  %v3001_v49 = vld [vmem:[%s4641_s1 + $0x320] ss:$16 sps:$4 sm:$0xff]   ;;  %v3004_v50 = vld [vmem:[%s4641_s1 + $0x328] ss:$16 sps:$4 sm:$0xff]  }
  0x33   :  { %1139 = vmatpush1.bf16.msra.mxu0 %v2912_v51  ;;  %1365 = vmatpush1.bf16.msra.mxu1 %v2913_v52  ;;  %v3012_v51 = vld [vmem:[%s4641_s1 + $0x344] ss:$16 sps:$4 sm:$0xff]   ;;  %v3015_v52 = vld [vmem:[%s4641_s1 + $0x34c] ss:$16 sps:$4 sm:$0xff]  }
  0x34   :  { %1140 = vmatprep.subr.bf16.mxu0 %v2914_v53  ;;  %1366 = vmatprep.subr.bf16.mxu1 %v2916_v54  ;;  %v3009_v53 = vld [vmem:[%s4642_s0 + $0xa0] ss:$16 sps:$4 sm:$0xff]  }
  0x35   :  { %v3010_v54 = vld [vmem:[%s4641_s1 + $0x340] ss:$16 sps:$4 sm:$0xff]  }
  0x37   :  { %1141 = vmatpush1.bf16.msra.mxu0 %v2918_v55  ;;  %1367 = vmatpush1.bf16.msra.mxu1 %v2919_v56  ;;  %v3013_v55 = vld [vmem:[%s4641_s1 + $0x348] ss:$16 sps:$4 sm:$0xff]   ;;  %v3018_v56 = vld [vmem:[%s4641_s1 + $0x364] ss:$16 sps:$4 sm:$0xff]  }
  0x38   :  { %1142 = vmatprep.subr.bf16.mxu0 %v2920_v57  ;;  %1368 = vmatprep.subr.bf16.mxu1 %v2922_v58  ;;  %v3021_v57 = vld [vmem:[%s4641_s1 + $0x36c] ss:$16 sps:$4 sm:$0xff]   ;;  %v3022_v58 = vld [vmem:[%s4642_s0 + $0xc4] ss:$16 sps:$4 sm:$0xff]  }
  0x3b   :  { %1143 = vmatpush1.bf16.msra.mxu0 %v2924_v59  ;;  %1369 = vmatpush1.bf16.msra.mxu1 %v2925_v60  ;;  %v3016_v59 = vld [vmem:[%s4641_s1 + $0x360] ss:$16 sps:$4 sm:$0xff]   ;;  %v3019_v60 = vld [vmem:[%s4641_s1 + $0x368] ss:$16 sps:$4 sm:$0xff]  }
  0x3c   :  { %1144 = vmatprep.subr.bf16.mxu0 %v2926_v61  ;;  %1370 = vmatprep.subr.bf16.mxu1 %v2928_v62  ;;  %v3027_v61 = vld [vmem:[%s4641_s1 + $0x384] ss:$16 sps:$4 sm:$0xff]   ;;  %v3030_v62 = vld [vmem:[%s4641_s1 + $0x38c] ss:$16 sps:$4 sm:$0xff]  }
  0x3f   :  { %1145 = vmatpush1.bf16.msra.mxu0 %v2930_v63  ;;  %1371 = vmatpush1.bf16.msra.mxu1 %v2931_v0  ;;  %v3024_v63 = vld [vmem:[%s4642_s0 + $0xc0] ss:$16 sps:$4 sm:$0xff]  }
  0x40   :  { %1227 = vmatprep.subr.bf16.mxu0 %v2937_v1  ;;  %1453 = vmatprep.subr.bf16.mxu1 %v2940_v2  ;;  %v3025_v0 = vld [vmem:[%s4641_s1 + $0x380] ss:$16 sps:$4 sm:$0xff]   ;;  %v3028_v1 = vld [vmem:[%s4641_s1 + $0x388] ss:$16 sps:$4 sm:$0xff]   ;;  %v3033_v2 = vld [vmem:[%s4641_s1 + $0x3a4] ss:$16 sps:$4 sm:$0xff]  }
  0x42   :  { %1147 = vmatmul.mubr.bf16.vlgmr.msra.gmra.mrb[0].mxu0 %v2932_v3  ;;  %1373 = vmatmul.mubr.bf16.vlgmr.msra.gmra.mrb[0].mxu1 %v2932_v3  ;;  %v3036_v3 = vld [vmem:[%s4641_s1 + $0x3ac] ss:$16 sps:$4 sm:$0xff]  }
  0x43   :  { %1228 = vmatpush1.bf16.msra.mxu0 %v2935_v4  ;;  %1454 = vmatpush1.bf16.msra.mxu1 %v2938_v5  ;;  %v3037_v4 = vld [vmem:[%s4642_s0 + $0xe4] ss:$16 sps:$4 sm:$0xff]   ;;  %v3031_v5 = vld [vmem:[%s4641_s1 + $0x3a0] ss:$16 sps:$4 sm:$0xff]  }
  0x44   :  { %1229 = vmatprep.subr.bf16.mxu0 %v2943_v6  ;;  %1455 = vmatprep.subr.bf16.mxu1 %v2946_v7  ;;  %v3034_v6 = vld [vmem:[%s4641_s1 + $0x3a8] ss:$16 sps:$4 sm:$0xff]   ;;  %v3042_v7 = vld [vmem:[%s4641_s1 + $0x3c4] ss:$16 sps:$4 sm:$0xff]  }
  0x45   :  { %1156 = vmatprep.mubr.bf16.mxu0 %v2947_v8  ;;  %1382 = vmatprep.mubr.bf16.mxu1 %v2947_v8  ;;  %v3045_v8 = vld [vmem:[%s4641_s1 + $0x3cc] ss:$16 sps:$4 sm:$0xff]  }
  0x47   :  { %1230 = vmatpush1.bf16.msra.mxu0 %v2941_v9  ;;  %1456 = vmatpush1.bf16.msra.mxu1 %v2944_v10  ;;  %v3039_v9 = vld [vmem:[%s4642_s0 + $0xe0] ss:$16 sps:$4 sm:$0xff]  }
  0x48   :  { %1231 = vmatprep.subr.bf16.mxu0 %v2952_v11  ;;  %1457 = vmatprep.subr.bf16.mxu1 %v2955_v12  ;;  %v3040_v10 = vld [vmem:[%s4641_s1 + $0x3c0] ss:$16 sps:$4 sm:$0xff]   ;;  %v3043_v11 = vld [vmem:[%s4641_s1 + $0x3c8] ss:$16 sps:$4 sm:$0xff]   ;;  %v3048_v12 = vld [vmem:[%s4641_s1 + $0x3e4] ss:$16 sps:$4 sm:$0xff]  }
  0x4a   :  { %1157 = vmatmul.mubr.bf16.gmra.mrb[4].mxu0 %v2949_v13  ;;  %1383 = vmatmul.mubr.bf16.gmra.mrb[4].mxu1 %v2949_v13  ;;  %v3051_v13 = vld [vmem:[%s4641_s1 + $0x3ec] ss:$16 sps:$4 sm:$0xff]  }
  0x4b   :  { %1232 = vmatpush1.bf16.msra.mxu0 %v2950_v14  ;;  %1458 = vmatpush1.bf16.msra.mxu1 %v2953_v15  ;;  %v3054_v14 = vld [vmem:[%s4642_s0 + $0xc] ss:$16 sps:$4 sm:$0xff]   ;;  %v3046_v15 = vld [vmem:[%s4641_s1 + $0x3e0] ss:$16 sps:$4 sm:$0xff]  }
  0x4c   :  { %1233 = vmatprep.subr.bf16.mxu0 %v2958_v16  ;;  %1459 = vmatprep.subr.bf16.mxu1 %v2961_v17  ;;  %v3049_v16 = vld [vmem:[%s4641_s1 + $0x3e8] ss:$16 sps:$4 sm:$0xff]  }
  0x4d   :  { %1166 = vmatprep.mubr.bf16.mxu0 %v2962_v18  ;;  %1392 = vmatprep.mubr.bf16.mxu1 %v2962_v18  ;;  %v3052_v17 = vld [vmem:[%s4642_s0 + $0x8] ss:$16 sps:$4 sm:$0xff]   ;;  %v3055_v18 = vld [vmem:[%s4642_s0 + $0x2c] ss:$16 sps:$4 sm:$0xff]  }
  0x4f   :  { %1234 = vmatpush1.bf16.msra.mxu0 %v2956_v19  ;;  %1460 = vmatpush1.bf16.msra.mxu1 %v2959_v20  ;;  %v3057_v19 = vld [vmem:[%s4642_s0 + $0x28] ss:$16 sps:$4 sm:$0xff]   ;;  %v3058_v20 = vld [vmem:[%s4642_s0 + $0x4c] ss:$16 sps:$4 sm:$0xff]  }
  0x50   :  { %1235 = vmatprep.subr.bf16.mxu0 %v2967_v21  ;;  %1461 = vmatprep.subr.bf16.mxu1 %v2970_v22  ;;  %v3060_v21 = vld [vmem:[%s4642_s0 + $0x48] ss:$16 sps:$4 sm:$0xff]   ;;  %v3061_v22 = vld [vmem:[%s4642_s0 + $0x6c] ss:$16 sps:$4 sm:$0xff]  }
  0x52   :  { %1167 = vmatmul.mubr.bf16.gmra.mrb[8].mxu0 %v2964_v23  ;;  %1393 = vmatmul.mubr.bf16.gmra.mrb[8].mxu1 %v2964_v23  ;;  %v3063_v23 = vld [vmem:[%s4642_s0 + $0x68] ss:$16 sps:$4 sm:$0xff]  }
  0x53   :  { %1236 = vmatpush1.bf16.msra.mxu0 %v2965_v24  ;;  %1462 = vmatpush1.bf16.msra.mxu1 %v2968_v25  ;;  %v3064_v24 = vld [vmem:[%s4642_s0 + $0x8c] ss:$16 sps:$4 sm:$0xff]   ;;  %v3066_v25 = vld [vmem:[%s4642_s0 + $0x88] ss:$16 sps:$4 sm:$0xff]  }
  0x54   :  { %1237 = vmatprep.subr.bf16.mxu0 %v2973_v26  ;;  %1463 = vmatprep.subr.bf16.mxu1 %v2976_v27  ;;  %v3067_v26 = vld [vmem:[%s4642_s0 + $0xac] ss:$16 sps:$4 sm:$0xff]   ;;  %v3069_v27 = vld [vmem:[%s4642_s0 + $0xa8] ss:$16 sps:$4 sm:$0xff]  }
  0x55   :  { %1176 = vmatprep.mubr.bf16.mxu0 %v2977_v28  ;;  %1402 = vmatprep.mubr.bf16.mxu1 %v2977_v28  ;;  %v3070_v28 = vld [vmem:[%s4642_s0 + $0xcc] ss:$16 sps:$4 sm:$0xff]  }
  0x57   :  { %1238 = vmatpush1.bf16.msra.mxu0 %v2971_v29  ;;  %1464 = vmatpush1.bf16.msra.mxu1 %v2974_v30  ;;  %v3072_v29 = vld [vmem:[%s4642_s0 + $0xc8] ss:$16 sps:$4 sm:$0xff]   ;;  %v3073_v30 = vld [vmem:[%s4642_s0 + $0xec] ss:$16 sps:$4 sm:$0xff]  }
  0x58   :  { %1239 = vmatprep.subr.bf16.mxu0 %v2982_v31  ;;  %1465 = vmatprep.subr.bf16.mxu1 %v2985_v32  ;;  %v3075_v31 = vld [vmem:[%s4642_s0 + $0xe8] ss:$16 sps:$4 sm:$0xff]  }
  0x5a   :  { %1177 = vmatmul.mubr.bf16.gmra.mrb[12].mxu0 %v2979_v33  ;;  %1403 = vmatmul.mubr.bf16.gmra.mrb[12].mxu1 %v2979_v33 }
  0x5b   :  { %1240 = vmatpush1.bf16.msra.mxu0 %v2980_v34  ;;  %1466 = vmatpush1.bf16.msra.mxu1 %v2983_v35 }
  0x5c   :  { %1241 = vmatprep.subr.bf16.mxu0 %v2988_v36  ;;  %1467 = vmatprep.subr.bf16.mxu1 %v2991_v37 }
  0x5d   :  { %1186 = vmatprep.mubr.bf16.mxu0 %v2992_v38  ;;  %1412 = vmatprep.mubr.bf16.mxu1 %v2992_v38 }
  0x5f   :  { %1242 = vmatpush1.bf16.msra.mxu0 %v2986_v39  ;;  %1468 = vmatpush1.bf16.msra.mxu1 %v2989_v40 }
  0x60   :  { %1243 = vmatprep.subr.bf16.mxu0 %v2997_v41  ;;  %1469 = vmatprep.subr.bf16.mxu1 %v3000_v42 }
  0x62   :  { %1187 = vmatmul.mubr.bf16.gmra.mrb[16].mxu0 %v2994_v43  ;;  %1413 = vmatmul.mubr.bf16.gmra.mrb[16].mxu1 %v2994_v43 }
  0x63   :  { %1244 = vmatpush1.bf16.msra.mxu0 %v2995_v44  ;;  %1470 = vmatpush1.bf16.msra.mxu1 %v2998_v45 }
  0x64   :  { %1245 = vmatprep.subr.bf16.mxu0 %v3003_v46  ;;  %1471 = vmatprep.subr.bf16.mxu1 %v3006_v47 }
  0x65   :  { %1196 = vmatprep.mubr.bf16.mxu0 %v3007_v48  ;;  %1422 = vmatprep.mubr.bf16.mxu1 %v3007_v48 }
  0x67   :  { %1246 = vmatpush1.bf16.msra.mxu0 %v3001_v49  ;;  %1472 = vmatpush1.bf16.msra.mxu1 %v3004_v50 }
  0x68   :  { %1247 = vmatprep.subr.bf16.mxu0 %v3012_v51  ;;  %1473 = vmatprep.subr.bf16.mxu1 %v3015_v52 }
  0x6a   :  { %1197 = vmatmul.mubr.bf16.gmra.mrb[20].mxu0 %v3009_v53  ;;  %1423 = vmatmul.mubr.bf16.gmra.mrb[20].mxu1 %v3009_v53 }
  0x6b   :  { %1248 = vmatpush1.bf16.msra.mxu0 %v3010_v54  ;;  %1474 = vmatpush1.bf16.msra.mxu1 %v3013_v55 }
  0x6c   :  { %1249 = vmatprep.subr.bf16.mxu0 %v3018_v56  ;;  %1475 = vmatprep.subr.bf16.mxu1 %v3021_v57 }
  0x6d   :  { %1206 = vmatprep.mubr.bf16.mxu0 %v3022_v58  ;;  %1432 = vmatprep.mubr.bf16.mxu1 %v3022_v58 }
  0x6f   :  { %1250 = vmatpush1.bf16.msra.mxu0 %v3016_v59  ;;  %1476 = vmatpush1.bf16.msra.mxu1 %v3019_v60 }
  0x70   :  { %1251 = vmatprep.subr.bf16.mxu0 %v3027_v61  ;;  %1477 = vmatprep.subr.bf16.mxu1 %v3030_v62 }
  0x72   :  { %1207 = vmatmul.mubr.bf16.gmra.mrb[24].mxu0 %v3024_v63  ;;  %1433 = vmatmul.mubr.bf16.gmra.mrb[24].mxu1 %v3024_v63 }
  0x73   :  { %1252 = vmatpush1.bf16.msra.mxu0 %v3025_v0  ;;  %1478 = vmatpush1.bf16.msra.mxu1 %v3028_v1 }
  0x74   :  { %1253 = vmatprep.subr.bf16.mxu0 %v3033_v2  ;;  %1479 = vmatprep.subr.bf16.mxu1 %v3036_v3 }
  0x75   :  { %1216 = vmatprep.mubr.bf16.mxu0 %v3037_v4  ;;  %1442 = vmatprep.mubr.bf16.mxu1 %v3037_v4 }
  0x77   :  { %1254 = vmatpush1.bf16.msra.mxu0 %v3031_v5  ;;  %1480 = vmatpush1.bf16.msra.mxu1 %v3034_v6 }
  0x78   :  { %1255 = vmatprep.subr.bf16.mxu0 %v3042_v7  ;;  %1481 = vmatprep.subr.bf16.mxu1 %v3045_v8 }
  0x7a   :  { %1217 = vmatmul.mubr.bf16.gmra.mrb[28].mxu0 %v3039_v9  ;;  %1443 = vmatmul.mubr.bf16.gmra.mrb[28].mxu1 %v3039_v9 }
  0x7b   :  { %1256 = vmatpush1.bf16.msra.mxu0 %v3040_v10  ;;  %1482 = vmatpush1.bf16.msra.mxu1 %v3043_v11 }
  0x7c   :  { %1257 = vmatprep.subr.bf16.mxu0 %v3048_v12  ;;  %1483 = vmatprep.subr.bf16.mxu1 %v3051_v13 }
  0x7d   :  { %1259 = vmatprep.mubr.bf16.mxu0 %v3054_v14  ;;  %1485 = vmatprep.mubr.bf16.mxu1 %v3054_v14 }
  0x7f   :  { %1258 = vmatpush1.bf16.msra.mxu0 %v3046_v15  ;;  %1484 = vmatpush1.bf16.msra.mxu1 %v3049_v16 }
  0x82   :  { %1260 = vmatmul.mubr.bf16.vlgmr.msra.gmra.mrb[0].mxu0 %v3052_v17  ;;  %1486 = vmatmul.mubr.bf16.vlgmr.msra.gmra.mrb[0].mxu1 %v3052_v17 }
  0x83   :  { %1269 = vmatprep.mubr.bf16.mxu0 %v3055_v18  ;;  %1495 = vmatprep.mubr.bf16.mxu1 %v3055_v18 }
  0x8a   :  { %1270 = vmatmul.mubr.bf16.gmra.mrb[4].mxu0 %v3057_v19  ;;  %1496 = vmatmul.mubr.bf16.gmra.mrb[4].mxu1 %v3057_v19 }
  0x8b   :  { %1279 = vmatprep.mubr.bf16.mxu0 %v3058_v20  ;;  %1505 = vmatprep.mubr.bf16.mxu1 %v3058_v20 }
  0x92   :  { %1280 = vmatmul.mubr.bf16.gmra.mrb[8].mxu0 %v3060_v21  ;;  %1506 = vmatmul.mubr.bf16.gmra.mrb[8].mxu1 %v3060_v21 }
  0x93   :  { %1289 = vmatprep.mubr.bf16.mxu0 %v3061_v22  ;;  %1515 = vmatprep.mubr.bf16.mxu1 %v3061_v22 }
  0x9a   :  { %1290 = vmatmul.mubr.bf16.gmra.mrb[12].mxu0 %v3063_v23  ;;  %1516 = vmatmul.mubr.bf16.gmra.mrb[12].mxu1 %v3063_v23 }
  0x9b   :  { %1299 = vmatprep.mubr.bf16.mxu0 %v3064_v24  ;;  %1525 = vmatprep.mubr.bf16.mxu1 %v3064_v24 }
  0xa2   :  { %1300 = vmatmul.mubr.bf16.gmra.mrb[16].mxu0 %v3066_v25  ;;  %1526 = vmatmul.mubr.bf16.gmra.mrb[16].mxu1 %v3066_v25 }
  0xa3   :  { %1309 = vmatprep.mubr.bf16.mxu0 %v3067_v26  ;;  %1535 = vmatprep.mubr.bf16.mxu1 %v3067_v26 }
  0xaa   :  { %1310 = vmatmul.mubr.bf16.gmra.mrb[20].mxu0 %v3069_v27  ;;  %1536 = vmatmul.mubr.bf16.gmra.mrb[20].mxu1 %v3069_v27 }
  0xab   :  { %1319 = vmatprep.mubr.bf16.mxu0 %v3070_v28  ;;  %1545 = vmatprep.mubr.bf16.mxu1 %v3070_v28 }
  0xb2   :  { %1320 = vmatmul.mubr.bf16.gmra.mrb[24].mxu0 %v3072_v29  ;;  %1546 = vmatmul.mubr.bf16.gmra.mrb[24].mxu1 %v3072_v29 }
  0xb3   :  { %1329 = vmatprep.mubr.bf16.mxu0 %v3073_v30  ;;  %1555 = vmatprep.mubr.bf16.mxu1 %v3073_v30 }
  0xba   :  { %1330 = vmatmul.mubr.bf16.gmra.mrb[28].mxu0 %v3075_v31  ;;  %1556 = vmatmul.mubr.bf16.gmra.mrb[28].mxu1 %v3075_v31 }
 0x155   :  { %v3590_v32 = vpop.f32.mrb[0].mxu0  ;;  %v3592_v33 = vpop.f32.mrb[0].mxu1 }
 0x156   :  { %v3594_v34 = vpop.f32.mrb[1].mxu0  ;;  %v3596_v35 = vpop.f32.mrb[1].mxu1  ;;  %v1845_v36 = vmul.f32 %v3590_v32, %v3590_v32  ;;  %v1847_v37 = vmul.f32 %v3592_v33, %v3592_v33 }
 0x157   :  { %v1846_v38 = vmul.f32 %v3594_v34, %v3594_v34  ;;  %v1848_v39 = vmul.f32 %v3596_v35, %v3596_v35  ;;  %v3606_v40 = vpop.f32.mrb[2].mxu0  ;;  %v3608_v41 = vpop.f32.mrb[2].mxu1 }
 0x158   :  { %v1761_v42 = vadd.f32 %v3606_v40, %v3590_v32  ;;  %v1849_v43 = vmul.f32 %v3606_v40, %v3606_v40  ;;  %v1803_v44 = vadd.f32 %v3608_v41, %v3592_v33  ;;  %v1851_v45 = vmul.f32 %v3608_v41, %v3608_v41  ;;  %v3618_v46 = vpop.f32.mrb[3].mxu0  ;;  %v3620_v47 = vpop.f32.mrb[3].mxu1 }
 0x159   :  { %v1782_v48 = vadd.f32 %v3618_v46, %v3594_v34  ;;  %v1850_v49 = vmul.f32 %v3618_v46, %v3618_v46  ;;  %v1824_v50 = vadd.f32 %v3620_v47, %v3596_v35  ;;  %v1852_v51 = vmul.f32 %v3620_v47, %v3620_v47 }
 0x15a   :  { %v1909_v52 = vadd.f32 %v1849_v43, %v1845_v36  ;;  %v1951_v53 = vadd.f32 %v1851_v45, %v1847_v37 }
 0x15b   :  { %v1930_v54 = vadd.f32 %v1850_v49, %v1846_v38  ;;  %v1972_v55 = vadd.f32 %v1852_v51, %v1848_v39 }
 0x15d   :  { %v3630_v56 = vpop.f32.mrb[4].mxu0  ;;  %v3632_v57 = vpop.f32.mrb[4].mxu1 }
 0x15e   :  { %v1762_v58 = vadd.f32 %v1761_v42, %v3630_v56  ;;  %v1853_v59 = vmul.f32 %v3630_v56, %v3630_v56  ;;  %v1804_v60 = vadd.f32 %v1803_v44, %v3632_v57  ;;  %v1855_v61 = vmul.f32 %v3632_v57, %v3632_v57  ;;  %v3640_v62 = vpop.f32.mrb[5].mxu0  ;;  %v3642_v63 = vpop.f32.mrb[5].mxu1 }
 0x15f   :  { %v1783_v0 = vadd.f32 %v1782_v48, %v3640_v62  ;;  %v1854_v1 = vmul.f32 %v3640_v62, %v3640_v62  ;;  %v1825_v2 = vadd.f32 %v1824_v50, %v3642_v63  ;;  %v1856_v3 = vmul.f32 %v3642_v63, %v3642_v63  ;;  %v3650_v4 = vpop.f32.mrb[6].mxu0  ;;  %v3652_v5 = vpop.f32.mrb[6].mxu1 }
 0x160   :  { %v1910_v6 = vadd.f32 %v1909_v52, %v1853_v59  ;;  %v1952_v7 = vadd.f32 %v1951_v53, %v1855_v61  ;;  %v1763_v8 = vadd.f32 %v1762_v58, %v3650_v4  ;;  %v1857_v9 = vmul.f32 %v3650_v4, %v3650_v4  ;;  %v3657_v10 = vpop.f32.mrb[7].mxu0  ;;  %v3659_v11 = vpop.f32.mrb[7].mxu1 }
 0x161   :  { %v1931_v12 = vadd.f32 %v1930_v54, %v1854_v1  ;;  %v1973_v13 = vadd.f32 %v1972_v55, %v1856_v3  ;;  %v1805_v14 = vadd.f32 %v1804_v60, %v3652_v5  ;;  %v1859_v15 = vmul.f32 %v3652_v5, %v3652_v5 }
 0x162   :  { %v1911_v16 = vadd.f32 %v1910_v6, %v1857_v9  ;;  %v1784_v17 = vadd.f32 %v1783_v0, %v3657_v10  ;;  %v1858_v18 = vmul.f32 %v3657_v10, %v3657_v10  ;;  %v1826_v19 = vadd.f32 %v1825_v2, %v3659_v11 }
 0x163   :  { %v1953_v20 = vadd.f32 %v1952_v7, %v1859_v15  ;;  %v1860_v21 = vmul.f32 %v3659_v11, %v3659_v11 }
 0x164   :  { %v1932_v22 = vadd.f32 %v1931_v12, %v1858_v18 }
 0x165   :  { %v1974_v23 = vadd.f32 %v1973_v13, %v1860_v21  ;;  %v3670_v24 = vpop.f32.mrb[8].mxu0  ;;  %v3672_v25 = vpop.f32.mrb[8].mxu1 }
 0x166   :  { %v1764_v26 = vadd.f32 %v1763_v8, %v3670_v24  ;;  %v1861_v27 = vmul.f32 %v3670_v24, %v3670_v24  ;;  %v1806_v28 = vadd.f32 %v1805_v14, %v3672_v25  ;;  %v1863_v29 = vmul.f32 %v3672_v25, %v3672_v25  ;;  %v3680_v30 = vpop.f32.mrb[9].mxu0  ;;  %v3682_v31 = vpop.f32.mrb[9].mxu1 }
 0x167   :  { %v1785_v36 = vadd.f32 %v1784_v17, %v3680_v30  ;;  %v1862_v37 = vmul.f32 %v3680_v30, %v3680_v30  ;;  %v1827_v38 = vadd.f32 %v1826_v19, %v3682_v31  ;;  %v1864_v39 = vmul.f32 %v3682_v31, %v3682_v31  ;;  %v3690_v42 = vpop.f32.mrb[10].mxu0  ;;  %v3692_v43 = vpop.f32.mrb[10].mxu1 }
 0x168   :  { %v1912_v44 = vadd.f32 %v1911_v16, %v1861_v27  ;;  %v1954_v45 = vadd.f32 %v1953_v20, %v1863_v29  ;;  %v1765_v48 = vadd.f32 %v1764_v26, %v3690_v42  ;;  %v1865_v49 = vmul.f32 %v3690_v42, %v3690_v42  ;;  %v3697_v50 = vpop.f32.mrb[11].mxu0  ;;  %v3699_v51 = vpop.f32.mrb[11].mxu1 }
 0x169   :  { %v1933_v52 = vadd.f32 %v1932_v22, %v1862_v37  ;;  %v1975_v53 = vadd.f32 %v1974_v23, %v1864_v39  ;;  %v1807_v54 = vadd.f32 %v1806_v28, %v3692_v43  ;;  %v1867_v55 = vmul.f32 %v3692_v43, %v3692_v43 }
 0x16a   :  { %v1913_v58 = vadd.f32 %v1912_v44, %v1865_v49  ;;  %v1786_v59 = vadd.f32 %v1785_v36, %v3697_v50  ;;  %v1866_v60 = vmul.f32 %v3697_v50, %v3697_v50  ;;  %v1828_v61 = vadd.f32 %v1827_v38, %v3699_v51 }
 0x16b   :  { %v1955_v0 = vadd.f32 %v1954_v45, %v1867_v55  ;;  %v1868_v1 = vmul.f32 %v3699_v51, %v3699_v51 }
 0x16c   :  { %v1934_v2 = vadd.f32 %v1933_v52, %v1866_v60 }
 0x16d   :  { %v1976_v3 = vadd.f32 %v1975_v53, %v1868_v1  ;;  %v3710_v6 = vpop.f32.mrb[12].mxu0  ;;  %v3712_v7 = vpop.f32.mrb[12].mxu1 }
 0x16e   :  { %v1766_v8 = vadd.f32 %v1765_v48, %v3710_v6  ;;  %v1869_v9 = vmul.f32 %v3710_v6, %v3710_v6  ;;  %v1808_v12 = vadd.f32 %v1807_v54, %v3712_v7  ;;  %v1871_v13 = vmul.f32 %v3712_v7, %v3712_v7  ;;  %v3720_v14 = vpop.f32.mrb[13].mxu0  ;;  %v3722_v15 = vpop.f32.mrb[13].mxu1 }
 0x16f   :  { %v1787_v16 = vadd.f32 %v1786_v59, %v3720_v14  ;;  %v1870_v17 = vmul.f32 %v3720_v14, %v3720_v14  ;;  %v1829_v18 = vadd.f32 %v1828_v61, %v3722_v15  ;;  %v1872_v19 = vmul.f32 %v3722_v15, %v3722_v15  ;;  %v3730_v20 = vpop.f32.mrb[14].mxu0  ;;  %v3732_v21 = vpop.f32.mrb[14].mxu1 }
 0x170   :  { %v1914_v22 = vadd.f32 %v1913_v58, %v1869_v9  ;;  %v1956_v23 = vadd.f32 %v1955_v0, %v1871_v13  ;;  %v1767_v26 = vadd.f32 %v1766_v8, %v3730_v20  ;;  %v1873_v27 = vmul.f32 %v3730_v20, %v3730_v20  ;;  %v3737_v28 = vpop.f32.mrb[15].mxu0  ;;  %v3739_v29 = vpop.f32.mrb[15].mxu1 }
 0x171   :  { %4688 = vst [vmem:[#allocation3_spill] sm:$0xff] %v3739_v29  ;;  %v1935_v36 = vadd.f32 %v1934_v2, %v1870_v17  ;;  %v1977_v37 = vadd.f32 %v1976_v3, %v1872_v19  ;;  %v1809_v38 = vadd.f32 %v1808_v12, %v3732_v21  ;;  %v1875_v39 = vmul.f32 %v3732_v21, %v3732_v21 }
 0x172   :  { %v1915_v44 = vadd.f32 %v1914_v22, %v1873_v27  ;;  %v1788_v45 = vadd.f32 %v1787_v16, %v3737_v28  ;;  %v1874_v48 = vmul.f32 %v3737_v28, %v3737_v28  ;;  %v1830_v49 = vadd.f32 %v1829_v18, %v3739_v29 }
 0x173   :  { %v1957_v52 = vadd.f32 %v1956_v23, %v1875_v39  ;;  %v1876_v53 = vmul.f32 %v3739_v29, %v3739_v29 }
 0x174   :  { %v1936_v54 = vadd.f32 %v1935_v36, %v1874_v48 }
 0x175   :  { %v1978_v55 = vadd.f32 %v1977_v37, %v1876_v53  ;;  %v3750_v58 = vpop.f32.mrb[16].mxu0  ;;  %v3752_v59 = vpop.f32.mrb[16].mxu1 }
 0x176   :  { %4689 = vst [vmem:[#allocation4_spill] sm:$0xff] %v3750_v58  ;;  %4690 = vst [vmem:[#allocation5_spill] sm:$0xff] %v3752_v59  ;;  %v1768_v60 = vadd.f32 %v1767_v26, %v3750_v58  ;;  %v1877_v61 = vmul.f32 %v3750_v58, %v3750_v58  ;;  %v1810_v0 = vadd.f32 %v1809_v38, %v3752_v59  ;;  %v3760_v2 = vpop.f32.mrb[17].mxu0  ;;  %v3762_v3 = vpop.f32.mrb[17].mxu1 }
 0x177   :  { %v1879_v1 = vmul.f32 %v3752_v59, %v3752_v59  ;;  %4691 = vst [vmem:[#allocation6_spill] sm:$0xff] %v3760_v2  ;;  %4692 = vst [vmem:[#allocation7_spill] sm:$0xff] %v3762_v3  ;;  %v1789_v8 = vadd.f32 %v1788_v45, %v3760_v2  ;;  %v1878_v9 = vmul.f32 %v3760_v2, %v3760_v2  ;;  %v3770_v16 = vpop.f32.mrb[18].mxu0  ;;  %v3772_v17 = vpop.f32.mrb[18].mxu1 }
 0x178   :  { %v1831_v12 = vadd.f32 %v1830_v49, %v3762_v3  ;;  %v1880_v13 = vmul.f32 %v3762_v3, %v3762_v3  ;;  %4693 = vst [vmem:[#allocation8_spill] sm:$0xff] %v3770_v16  ;;  %4694 = vst [vmem:[#allocation9_spill] sm:$0xff] %v3772_v17  ;;  %v1916_v18 = vadd.f32 %v1915_v44, %v1877_v61  ;;  %v3777_v26 = vpop.f32.mrb[19].mxu0  ;;  %v3779_v27 = vpop.f32.mrb[19].mxu1 }
 0x179   :  { %v1958_v19 = vadd.f32 %v1957_v52, %v1879_v1  ;;  %v1769_v22 = vadd.f32 %v1768_v60, %v3770_v16  ;;  %v1881_v23 = vmul.f32 %v3770_v16, %v3770_v16  ;;  %4695 = vst [vmem:[#allocation10_spill] sm:$0xff] %v3777_v26  ;;  %4696 = vst [vmem:[#allocation11_spill] sm:$0xff] %v3779_v27 }
 0x17a   :  { %v1937_v36 = vadd.f32 %v1936_v54, %v1878_v9  ;;  %v1979_v37 = vadd.f32 %v1978_v55, %v1880_v13  ;;  %v1811_v38 = vadd.f32 %v1810_v0, %v3772_v17  ;;  %v1883_v39 = vmul.f32 %v3772_v17, %v3772_v17 }
 0x17b   :  { %v1917_v45 = vadd.f32 %v1916_v18, %v1881_v23  ;;  %v1790_v44 = vadd.f32 %v1789_v8, %v3777_v26  ;;  %v1882_v48 = vmul.f32 %v3777_v26, %v3777_v26  ;;  %v1832_v49 = vadd.f32 %v1831_v12, %v3779_v27 }
 0x17c   :  { %v1959_v52 = vadd.f32 %v1958_v19, %v1883_v39  ;;  %v1884_v53 = vmul.f32 %v3779_v27, %v3779_v27 }
 0x17d   :  { %v1938_v60 = vadd.f32 %v1937_v36, %v1882_v48  ;;  %v3790_v55 = vpop.f32.mrb[20].mxu0  ;;  %v3792_v61 = vpop.f32.mrb[20].mxu1 }
 0x17e   :  { %v1980_v54 = vadd.f32 %v1979_v37, %v1884_v53  ;;  %4697 = vst [vmem:[#allocation12_spill] sm:$0xff] %v3790_v55  ;;  %4698 = vst [vmem:[#allocation13_spill] sm:$0xff] %v3792_v61  ;;  %v1770_v0 = vadd.f32 %v1769_v22, %v3790_v55  ;;  %v1885_v1 = vmul.f32 %v3790_v55, %v3790_v55  ;;  %v3800_v12 = vpop.f32.mrb[21].mxu0  ;;  %v3802_v13 = vpop.f32.mrb[21].mxu1 }
 0x17f   :  { %v1812_v8 = vadd.f32 %v1811_v38, %v3792_v61  ;;  %v1887_v9 = vmul.f32 %v3792_v61, %v3792_v61  ;;  %4699 = vst [vmem:[#allocation14_spill] sm:$0xff] %v3800_v12  ;;  %4700 = vst [vmem:[#allocation15_spill] sm:$0xff] %v3802_v13  ;;  %v1791_v18 = vadd.f32 %v1790_v44, %v3800_v12  ;;  %v3810_v36 = vpop.f32.mrb[22].mxu0  ;;  %v3812_v37 = vpop.f32.mrb[22].mxu1 }
 0x180   :  { %v1886_v19 = vmul.f32 %v3800_v12, %v3800_v12  ;;  %v1833_v23 = vadd.f32 %v1832_v49, %v3802_v13  ;;  %v1888_v22 = vmul.f32 %v3802_v13, %v3802_v13  ;;  %4701 = vst [vmem:[#allocation16_spill] sm:$0xff] %v3810_v36  ;;  %4702 = vst [vmem:[#allocation17_spill] sm:$0xff] %v3812_v37  ;;  %v3817_v44 = vpop.f32.mrb[23].mxu0  ;;  %v3819_v61 = vpop.f32.mrb[23].mxu1 }
 0x181   :  { %v1918_v38 = vadd.f32 %v1917_v45, %v1885_v1  ;;  %v1960_v39 = vadd.f32 %v1959_v52, %v1887_v9  ;;  %v1771_v48 = vadd.f32 %v1770_v0, %v3810_v36  ;;  %v1889_v53 = vmul.f32 %v3810_v36, %v3810_v36  ;;  %4703 = vst [vmem:[#allocation18_spill] sm:$0xff] %v3817_v44 }
 0x182   :  { %4704 = vst [vmem:[#allocation19_spill] sm:$0xff] %v3819_v61  ;;  %v1939_v12 = vadd.f32 %v1938_v60, %v1886_v19  ;;  %v1981_v49 = vadd.f32 %v1980_v54, %v1888_v22  ;;  %v1813_v55 = vadd.f32 %v1812_v8, %v3812_v37  ;;  %v1891_v13 = vmul.f32 %v3812_v37, %v3812_v37 }
 0x183   :  { %v1919_v27 = vadd.f32 %v1918_v38, %v1889_v53  ;;  %v1792_v45 = vadd.f32 %v1791_v18, %v3817_v44  ;;  %v1890_v52 = vmul.f32 %v3817_v44, %v3817_v44  ;;  %v1834_v0 = vadd.f32 %v1833_v23, %v3819_v61 }
 0x184   :  { %v1961_v1 = vadd.f32 %v1960_v39, %v1891_v13  ;;  %v1892_v9 = vmul.f32 %v3819_v61, %v3819_v61 }
 0x185   :  { %v1940_v36 = vadd.f32 %v1939_v12, %v1890_v52  ;;  %v3830_v54 = vpop.f32.mrb[24].mxu0  ;;  %v3832_v8 = vpop.f32.mrb[24].mxu1 }
 0x186   :  { %v1982_v60 = vadd.f32 %v1981_v49, %v1892_v9  ;;  %4705 = vst [vmem:[#allocation20_spill] sm:$0xff] %v3830_v54  ;;  %4706 = vst [vmem:[#allocation21_spill] sm:$0xff] %v3832_v8  ;;  %v1772_v19 = vadd.f32 %v1771_v48, %v3830_v54  ;;  %v1893_v18 = vmul.f32 %v3830_v54, %v3830_v54  ;;  %v3840_v13 = vpop.f32.mrb[25].mxu0  ;;  %v3842_v38 = vpop.f32.mrb[25].mxu1 }
 0x187   :  { %v1814_v22 = vadd.f32 %v1813_v55, %v3832_v8  ;;  %v1895_v23 = vmul.f32 %v3832_v8, %v3832_v8  ;;  %4707 = vst [vmem:[#allocation22_spill] sm:$0xff] %v3840_v13  ;;  %4708 = vst [vmem:[#allocation23_spill] sm:$0xff] %v3842_v38  ;;  %v1793_v12 = vadd.f32 %v1792_v45, %v3840_v13  ;;  %v3850_v49 = vpop.f32.mrb[26].mxu0  ;;  %v3852_v55 = vpop.f32.mrb[26].mxu1 }
 0x188   :  { %v1894_v39 = vmul.f32 %v3840_v13, %v3840_v13  ;;  %v1835_v53 = vadd.f32 %v1834_v0, %v3842_v38  ;;  %v1896_v48 = vmul.f32 %v3842_v38, %v3842_v38  ;;  %4709 = vst [vmem:[#allocation24_spill] sm:$0xff] %v3850_v49  ;;  %4710 = vst [vmem:[#allocation25_spill] sm:$0xff] %v3852_v55  ;;  %v3857_v45 = vpop.f32.mrb[27].mxu0  ;;  %v3859_v61 = vpop.f32.mrb[27].mxu1 }
 0x189   :  { %v1920_v52 = vadd.f32 %v1919_v27, %v1893_v18  ;;  %v1962_v9 = vadd.f32 %v1961_v1, %v1895_v23  ;;  %v1773_v8 = vadd.f32 %v1772_v19, %v3850_v49  ;;  %v1897_v54 = vmul.f32 %v3850_v49, %v3850_v49  ;;  %4711 = vst [vmem:[#allocation26_spill] sm:$0xff] %v3857_v45 }
 0x18a   :  { %4712 = vst [vmem:[#allocation27_spill] sm:$0xff] %v3859_v61  ;;  %v1941_v13 = vadd.f32 %v1940_v36, %v1894_v39  ;;  %v1983_v0 = vadd.f32 %v1982_v60, %v1896_v48  ;;  %v1815_v37 = vadd.f32 %v1814_v22, %v3852_v55  ;;  %v1899_v38 = vmul.f32 %v3852_v55, %v3852_v55 }
 0x18b   :  { %v1921_v44 = vadd.f32 %v1920_v52, %v1897_v54  ;;  %v1794_v27 = vadd.f32 %v1793_v12, %v3857_v45  ;;  %v1898_v1 = vmul.f32 %v3857_v45, %v3857_v45  ;;  %v1836_v19 = vadd.f32 %v1835_v53, %v3859_v61 }
 0x18c   :  { %v1963_v18 = vadd.f32 %v1962_v9, %v1899_v38  ;;  %v1900_v23 = vmul.f32 %v3859_v61, %v3859_v61 }
 0x18d   :  { %v1942_v49 = vadd.f32 %v1941_v13, %v1898_v1  ;;  %v3870_v60 = vpop.f32.mrb[28].mxu0  ;;  %v3872_v22 = vpop.f32.mrb[28].mxu1 }
 0x18e   :  { %v1984_v36 = vadd.f32 %v1983_v0, %v1900_v23  ;;  %4713 = vst [vmem:[#allocation28_spill] sm:$0xff] %v3870_v60  ;;  %4714 = vst [vmem:[#allocation29_spill] sm:$0xff] %v3872_v22  ;;  %v1774_v39 = vadd.f32 %v1773_v8, %v3870_v60  ;;  %v1901_v54 = vmul.f32 %v3870_v60, %v3870_v60  ;;  %v3880_v38 = vpop.f32.mrb[29].mxu0  ;;  %v3882_v48 = vpop.f32.mrb[29].mxu1 }
 0x18f   :  { %v1816_v12 = vadd.f32 %v1815_v37, %v3872_v22  ;;  %v1903_v53 = vmul.f32 %v3872_v22, %v3872_v22  ;;  %4715 = vst [vmem:[#allocation30_spill] sm:$0xff] %v3880_v38  ;;  %4716 = vst [vmem:[#allocation31_spill] sm:$0xff] %v3882_v48  ;;  %v1795_v13 = vadd.f32 %v1794_v27, %v3880_v38  ;;  %v3890_v0 = vpop.f32.mrb[30].mxu0  ;;  %v3892_v37 = vpop.f32.mrb[30].mxu1 }
 0x190   :  { %v1902_v52 = vmul.f32 %v3880_v38, %v3880_v38  ;;  %v1837_v9 = vadd.f32 %v1836_v19, %v3882_v48  ;;  %v1904_v8 = vmul.f32 %v3882_v48, %v3882_v48  ;;  %4717 = vst [vmem:[#allocation32_spill] sm:$0xff] %v3890_v0  ;;  %4718 = vst [vmem:[#allocation33_spill] sm:$0xff] %v3892_v37  ;;  %v3897_v27 = vpop.f32.mrb[31].mxu0  ;;  %v3899_v61 = vpop.f32.mrb[31].mxu1 }
 0x191   :  { %v1922_v1 = vadd.f32 %v1921_v44, %v1901_v54  ;;  %v1964_v23 = vadd.f32 %v1963_v18, %v1903_v53  ;;  %v1775_v22 = vadd.f32 %v1774_v39, %v3890_v0  ;;  %v1905_v60 = vmul.f32 %v3890_v0, %v3890_v0  ;;  %4719 = vst [vmem:[#allocation34_spill] sm:$0xff] %v3897_v27 }
 0x192   :  { %4720 = vst [vmem:[#allocation35_spill] sm:$0xff] %v3899_v61  ;;  %v1943_v38 = vadd.f32 %v1942_v49, %v1902_v52  ;;  %v1985_v19 = vadd.f32 %v1984_v36, %v1904_v8  ;;  %v1817_v55 = vadd.f32 %v1816_v12, %v3892_v37  ;;  %v1907_v48 = vmul.f32 %v3892_v37, %v3892_v37 }
 0x193   :  { %v1776_v45 = vrot.slane %v1775_v22, 4  ;;  %v1923_v17 = vadd.f32 %v1922_v1, %v1905_v60  ;;  %v1796_v44 = vadd.f32 %v1795_v13, %v3897_v27  ;;  %v1906_v18 = vmul.f32 %v3897_v27, %v3897_v27 }
 0x194   :  { %v1818_v39 = vrot.slane %v1817_v55, 4  ;;  %v1965_v54 = vadd.f32 %v1964_v23, %v1907_v48  ;;  %v1838_v53 = vadd.f32 %v1837_v9, %v3899_v61  ;;  %v1908_v49 = vmul.f32 %v3899_v61, %v3899_v61 }
 0x195   :  { %v1777_v36 = vadd.f32 %v1776_v45, %v1775_v22  ;;  %v1924_v52 = vrot.slane %v1923_v17, 4  ;;  %v1797_v12 = vrot.slane %v1796_v44, 4  ;;  %v1944_v8 = vadd.f32 %v1943_v38, %v1906_v18 }
 0x196   :  { %v1819_v0 = vadd.f32 %v1818_v39, %v1817_v55  ;;  %v1966_v37 = vrot.slane %v1965_v54, 4  ;;  %v1839_v26 = vrot.slane %v1838_v53, 4  ;;  %v1986_v60 = vadd.f32 %v1985_v19, %v1908_v49 }
 0x197   :  { %v1778_v1 = vrot.slane %v1777_v36, 2  ;;  %v1925_v13 = vadd.f32 %v1924_v52, %v1923_v17  ;;  %v1798_v16 = vadd.f32 %v1797_v12, %v1796_v44  ;;  %v1945_v3 = vrot.slane %v1944_v8, 4 }
 0x198   :  { %v1820_v27 = vrot.slane %v1819_v0, 2  ;;  %v1967_v59 = vadd.f32 %v1966_v37, %v1965_v54  ;;  %v1840_v48 = vadd.f32 %v1839_v26, %v1838_v53  ;;  %v1987_v23 = vrot.slane %v1986_v60, 4 }
 0x199   :  { %v1779_v9 = vadd.f32 %v1778_v1, %v1777_v36  ;;  %v1926_v2 = vrot.slane %v1925_v13, 2  ;;  %v1799_v58 = vrot.slane %v1798_v16, 2  ;;  %v1946_v61 = vadd.f32 %v1945_v3, %v1944_v8 }
 0x19a   :  { %v1821_v45 = vadd.f32 %v1820_v27, %v1819_v0  ;;  %v1968_v22 = vrot.slane %v1967_v59, 2  ;;  %v1841_v29 = vrot.slane %v1840_v48, 2  ;;  %v1988_v38 = vadd.f32 %v1987_v23, %v1986_v60 }
 0x19b   :  { %v1780_v55 = vrot.slane %v1779_v9, 1  ;;  %v1927_v18 = vadd.f32 %v1926_v2, %v1925_v13  ;;  %v1800_v39 = vadd.f32 %v1799_v58, %v1798_v16  ;;  %v1947_v19 = vrot.slane %v1946_v61, 2 }
 0x19c   :  { %v1822_v49 = vrot.slane %v1821_v45, 1  ;;  %v1969_v17 = vadd.f32 %v1968_v22, %v1967_v59  ;;  %v1842_v44 = vadd.f32 %v1841_v29, %v1840_v48  ;;  %v1989_v52 = vrot.slane %v1988_v38, 2 }
 0x19d   :  { %v1781_v12 = vadd.f32 %v1780_v55, %v1779_v9  ;;  %v1928_v37 = vrot.slane %v1927_v18, 1  ;;  %v1801_v26 = vrot.slane %v1800_v39, 1  ;;  %v1948_v54 = vadd.f32 %v1947_v19, %v1946_v61 }
 0x19e   :  { %v1823_v53 = vadd.f32 %v1822_v49, %v1821_v45  ;;  %v1970_v36 = vrot.slane %v1969_v17, 1  ;;  %v1843_v1 = vrot.slane %v1842_v44, 1  ;;  %v1990_v3 = vadd.f32 %v1989_v52, %v1988_v38 }
 0x19f   :  { %v1929_v0 = vadd.f32 %v1928_v37, %v1927_v18  ;;  %v1993_v27 = vmul.f32 0.0078125, %v1781_v12  ;;  %v1802_v8 = vadd.f32 %v1801_v26, %v1800_v39  ;;  %v1949_v60 = vrot.slane %v1948_v54, 1 }
 0x1a0   :  { %v1971_v23 = vadd.f32 %v1970_v36, %v1969_v17  ;;  %v1995_v2 = vmul.f32 0.0078125, %v1823_v53  ;;  %v1844_v58 = vadd.f32 %v1843_v1, %v1842_v44  ;;  %v1991_v16 = vrot.slane %v1990_v3, 1 }
 0x1a1   :  { %v1997_v13 = vmul.f32 0.0078125, %v1929_v0  ;;  %v2001_v59 = vmul.f32 %v1993_v27, %v1993_v27  ;;  %v1950_v29 = vadd.f32 %v1949_v60, %v1948_v54  ;;  %v1994_v48 = vmul.f32 0.0078125, %v1802_v8 }
 0x1a2   :  { %v1999_v9 = vmul.f32 0.0078125, %v1971_v23  ;;  %v2003_v22 = vmul.f32 %v1995_v2, %v1995_v2  ;;  %v1992_v55 = vadd.f32 %v1991_v16, %v1990_v3  ;;  %v1996_v61 = vmul.f32 0.0078125, %v1844_v58 }
 0x1a3   :  { %v2005_v45 = vsub.f32 %v1997_v13, %v2001_v59  ;;  %v1998_v19 = vmul.f32 0.0078125, %v1950_v29  ;;  %v2002_v49 = vmul.f32 %v1994_v48, %v1994_v48  ;;  %v3084_v54 = vmov 1966171168  }
 0x1a4   :  { %v2007_v38 = vsub.f32 %v1999_v9, %v2003_v22  ;;  %v2000_v18 = vmul.f32 0.0078125, %v1992_v55  ;;  %v2004_v52 = vmul.f32 %v1996_v61, %v1996_v61  ;;  %v2025_v53 = vunpack.c.l.s4 %v3084_v54  ;;  %v2009_v22 = vld [vmem:[%s4643_s2] sm:$0xf] }
 0x1a5   :  { %v2010_v39 = vadd.f32 1e-05, %v2005_v45  ;;  %v2006_v12 = vsub.f32 %v1998_v19, %v2002_v49  ;;  %v2027_v36 = vlaneseq }
 0x1a6   :  { %v2012_v17 = vadd.f32 1e-05, %v2007_v38  ;;  %v2008_v37 = vsub.f32 %v2000_v18, %v2004_v52  ;;  %v2026_v1 = vunpack.c.0.s8 %v2025_v53 }
 0x1a7   :  { %3076 = vrsqrt.f32 %v2010_v39  ;;  %v2011_v44 = vadd.f32 1e-05, %v2006_v12  ;;  %v3910_v3 = vshrl.u32 %v2027_v36, 7 }
 0x1a8   :  { %3078 = vrsqrt.f32 %v2012_v17  ;;  %v2013_v26 = vadd.f32 1e-05, %v2008_v37 }
 0x1a9   :  { %3080 = vrsqrt.f32 %v2011_v44  ;;  %v2029_v60 = vsub.s32 %v2026_v1, %v3910_v3  ;;  %v4682_v55 = vsub.s32 0, %v3910_v3  ;;  %v4681_v19 = vsub.s32 1, %v3910_v3 }
 0x1aa   :  { %3082 = vrsqrt.f32 %v2013_v26  ;;  %v4680_v49 = vsub.s32 2, %v3910_v3  ;;  %v4679_v38 = vsub.s32 3, %v3910_v3 }
 0x1b1   :  { %v3077_v0 = vpop.eup %3076 }
 0x1b2   :  { %v3079_v8 = vpop.eup %3078 }
 0x1b3   :  { %v3081_v23 = vpop.eup %3080 }
 0x1b4   :  { %v3083_v58 = vpop.eup %3082  ;;  %v2022_v16 = vcombine.low %v3077_v0, %v3081_v23 }
 0x1b5   :  { %v2023_v13 = vcombine.low %v3079_v8, %v3083_v58 }
 0x1b6   :  { %v2030_v59 = vrot.slane %v2022_v16, %v2029_v60 }
 0x1b7   :  { %v2037_v29 = vrot.slane %v2023_v13, %v2029_v60  ;;  %v4721_v13 = vld [vmem:[#allocation3_spill] sm:$0xff] }
 0x1b9   :  { %v2038_v9 = vcombine.low %v2030_v59, %v2037_v29  ;;  %v4722_v59 = vld [vmem:[#allocation4_spill] sm:$0xff]  ;;  %v4723_v29 = vld [vmem:[#allocation6_spill] sm:$0xff] }
 0x1bb   :  { %v2045_v45 = vrot.slane %v2038_v9, %v2029_v60  ;;  %v4724_v9 = vld [vmem:[#allocation5_spill] sm:$0xff] }
 0x1bd   :  { %v2047_v18 = vmul.f32 %v2045_v45, %v2009_v22  ;;  %v4725_v22 = vld [vmem:[#allocation7_spill] sm:$0xff]  ;;  %v4726_v45 = vld [vmem:[#allocation8_spill] sm:$0xff] }
 0x1bf   :  { %v3922_v52 = vrot.slane %v2047_v18, %v4682_v55  ;;  %v3926_v39 = vrot.slane %v2047_v18, %v4681_v19  ;;  %v3930_v12 = vrot.slane %v2047_v18, %v4680_v49  ;;  %v3934_v17 = vrot.slane %v2047_v18, %v4679_v38  ;;  %v4741_v38 = vld [vmem:[#allocation22_spill] sm:$0xff]  ;;  %v4743_v49 = vld [vmem:[#allocation21_spill] sm:$0xff]  ;;  %v4745_v19 = vld [vmem:[#allocation23_spill] sm:$0xff] }
 0x1c0   :  { %v4747_v55 = vld [vmem:[#allocation24_spill] sm:$0xff] }
 0x1c1   :  { %v2070_v37 = vmul.f32 %v3922_v52, %v1993_v27  ;;  %v2071_v44 = vmul.f32 %v3926_v39, %v1994_v48  ;;  %v2072_v26 = vmul.f32 %v3930_v12, %v1995_v2  ;;  %v2073_v54 = vmul.f32 %v3934_v17, %v1996_v61 }
 0x1c2   :  { %v3942_v53 = vmul.f32 %v3922_v52, %v3590_v32  ;;  %v3946_v36 = vmul.f32 %v3926_v39, %v3594_v34  ;;  %v3950_v1 = vmul.f32 %v3930_v12, %v3592_v33  ;;  %v3954_v27 = vmul.f32 %v3934_v17, %v3596_v35 }
 0x1c3   :  { %v2078_v48 = vcombine.low %v2070_v37, %v2071_v44  ;;  %v2079_v2 = vcombine.low %v2072_v26, %v2073_v54  ;;  %v3958_v61 = vmul.f32 %v3922_v52, %v3606_v40  ;;  %v3962_v32 = vmul.f32 %v3926_v39, %v3618_v46  ;;  %v4727_v37 = vld [vmem:[#allocation10_spill] sm:$0xff]  ;;  %v4728_v26 = vld [vmem:[#allocation9_spill] sm:$0xff] }
 0x1c4   :  { %v3966_v34 = vmul.f32 %v3930_v12, %v3608_v41  ;;  %v3970_v33 = vmul.f32 %v3934_v17, %v3620_v47  ;;  %v3974_v35 = vmul.f32 %v3922_v52, %v3630_v56  ;;  %v3978_v40 = vmul.f32 %v3926_v39, %v3640_v62 }
 0x1c5   :  { %v2086_v0 = vrot.slane %v2078_v48, %v2029_v60  ;;  %v2093_v8 = vrot.slane %v2079_v2, %v2029_v60  ;;  %v3982_v46 = vmul.f32 %v3930_v12, %v3632_v57  ;;  %v3986_v41 = vmul.f32 %v3934_v17, %v3642_v63  ;;  %v4729_v48 = vld [vmem:[#allocation11_spill] sm:$0xff] }
 0x1c6   :  { %v3990_v47 = vmul.f32 %v3922_v52, %v3650_v4  ;;  %v3994_v56 = vmul.f32 %v3926_v39, %v3657_v10  ;;  %v3998_v62 = vmul.f32 %v3930_v12, %v3652_v5  ;;  %v4002_v57 = vmul.f32 %v3934_v17, %v3659_v11  ;;  %v2048_v5 = vld [vmem:[%s4644_s3] sm:$0xf] }
 0x1c7   :  { %v2094_v23 = vcombine.low %v2086_v0, %v2093_v8  ;;  %v4006_v63 = vmul.f32 %v3922_v52, %v3670_v24  ;;  %v4010_v4 = vmul.f32 %v3926_v39, %v3680_v30  ;;  %v4014_v10 = vmul.f32 %v3930_v12, %v3672_v25  ;;  %v4730_v0 = vld [vmem:[#allocation12_spill] sm:$0xff] }
 0x1c8   :  { %v4021_v11 = vmul.f32 %v3934_v17, %v3682_v31  ;;  %v4025_v24 = vmul.f32 %v3922_v52, %v3690_v42  ;;  %v4029_v30 = vmul.f32 %v3926_v39, %v3697_v50  ;;  %v4033_v25 = vmul.f32 %v3930_v12, %v3692_v43 }
 0x1c9   :  { %v2101_v58 = vrot.slane %v2094_v23, %v2029_v60  ;;  %v4037_v16 = vmul.f32 %v3934_v17, %v3699_v51  ;;  %v4041_v31 = vmul.f32 %v3922_v52, %v3710_v6  ;;  %v4045_v42 = vmul.f32 %v3926_v39, %v3720_v14  ;;  %v4731_v23 = vld [vmem:[#allocation14_spill] sm:$0xff] }
 0x1ca   :  { %v4049_v50 = vmul.f32 %v3930_v12, %v3712_v7  ;;  %v4053_v43 = vmul.f32 %v3934_v17, %v3722_v15  ;;  %v4057_v51 = vmul.f32 %v3922_v52, %v3730_v20  ;;  %v4061_v6 = vmul.f32 %v3926_v39, %v3737_v28 }
 0x1cb   :  { %v2103_v60 = vsub.f32 %v2048_v5, %v2101_v58  ;;  %v4065_v14 = vmul.f32 %v3930_v12, %v3732_v21  ;;  %v4069_v7 = vmul.f32 %v3934_v17, %v4721_v13  ;;  %v4073_v15 = vmul.f32 %v3922_v52, %v4722_v59  ;;  %v4732_v58 = vld [vmem:[#allocation13_spill] sm:$0xff]  ;;  %v4733_v59 = vld [vmem:[#allocation15_spill] sm:$0xff] }
 0x1cc   :  { %v4077_v20 = vmul.f32 %v3926_v39, %v4723_v29  ;;  %v4081_v28 = vmul.f32 %v3930_v12, %v4724_v9  ;;  %v4085_v21 = vmul.f32 %v3934_v17, %v4725_v22  ;;  %v4089_v18 = vmul.f32 %v3922_v52, %v4726_v45  ;;  %v4734_v9 = vld [vmem:[#allocation16_spill] sm:$0xff]  ;;  %v4735_v45 = vld [vmem:[#allocation18_spill] sm:$0xff] }
 0x1cd   :  { %v4093_v44 = vmul.f32 %v3926_v39, %v4727_v37  ;;  %v4097_v54 = vmul.f32 %v3930_v12, %v4728_v26  ;;  %v4101_v2 = vmul.f32 %v3934_v17, %v4729_v48  ;;  %v4105_v8 = vmul.f32 %v3922_v52, %v4730_v0  ;;  %v4736_v26 = vld [vmem:[#allocation17_spill] sm:$0xff]  ;;  %v4737_v0 = vld [vmem:[#allocation19_spill] sm:$0xff] }
 0x1ce   :  { %v4109_v5 = vmul.f32 %v3926_v39, %v4731_v23  ;;  %v4113_v13 = vmul.f32 %v3930_v12, %v4732_v58  ;;  %v4117_v29 = vmul.f32 %v3934_v17, %v4733_v59  ;;  %v4121_v22 = vmul.f32 %v3922_v52, %v4734_v9  ;;  %v4739_v58 = vld [vmem:[#allocation20_spill] sm:$0xff] }
 0x1cf   :  { %v4125_v37 = vmul.f32 %v3926_v39, %v4735_v45  ;;  %v4129_v48 = vmul.f32 %v3930_v12, %v4736_v26  ;;  %v4133_v23 = vmul.f32 %v3934_v17, %v4737_v0  ;;  %v4137_v59 = vmul.f32 %v3922_v52, %v4739_v58 }
 0x1d0   :  { %v4141_v9 = vmul.f32 %v3926_v39, %v4741_v38  ;;  %v4145_v45 = vmul.f32 %v3930_v12, %v4743_v49  ;;  %v4149_v26 = vmul.f32 %v3934_v17, %v4745_v19  ;;  %v4153_v0 = vmul.f32 %v3922_v52, %v4747_v55 }
 0x1d1   :  { %4738 = vst [vmem:[#allocation3_spill] sm:$0xff] %v4133_v23  ;;  %4740 = vst [vmem:[#allocation4_spill] sm:$0xff] %v4137_v59  ;;  %v4749_v23 = vld [vmem:[#allocation26_spill] sm:$0xff]  ;;  %v4751_v59 = vld [vmem:[#allocation25_spill] sm:$0xff] }
 0x1d2   :  { %4742 = vst [vmem:[#allocation6_spill] sm:$0xff] %v4141_v9  ;;  %4744 = vst [vmem:[#allocation5_spill] sm:$0xff] %v4145_v45  ;;  %v4157_v58 = vmul.f32 %v3926_v39, %v4749_v23  ;;  %v4161_v38 = vmul.f32 %v3930_v12, %v4751_v59  ;;  %v4753_v9 = vld [vmem:[#allocation27_spill] sm:$0xff]  ;;  %v4755_v45 = vld [vmem:[#allocation28_spill] sm:$0xff] }
 0x1d3   :  { %4746 = vst [vmem:[#allocation7_spill] sm:$0xff] %v4149_v26  ;;  %4748 = vst [vmem:[#allocation8_spill] sm:$0xff] %v4153_v0  ;;  %v4165_v49 = vmul.f32 %v3934_v17, %v4753_v9  ;;  %v4169_v19 = vmul.f32 %v3922_v52, %v4755_v45  ;;  %v4757_v26 = vld [vmem:[#allocation30_spill] sm:$0xff]  ;;  %v4759_v0 = vld [vmem:[#allocation29_spill] sm:$0xff] }
 0x1d4   :  { %4750 = vst [vmem:[#allocation10_spill] sm:$0xff] %v4157_v58  ;;  %4752 = vst [vmem:[#allocation9_spill] sm:$0xff] %v4161_v38  ;;  %v4173_v55 = vmul.f32 %v3926_v39, %v4757_v26  ;;  %v4177_v23 = vmul.f32 %v3930_v12, %v4759_v0  ;;  %v4761_v58 = vld [vmem:[#allocation31_spill] sm:$0xff]  ;;  %v4763_v38 = vld [vmem:[#allocation32_spill] sm:$0xff] }
 0x1d5   :  { %4754 = vst [vmem:[#allocation11_spill] sm:$0xff] %v4165_v49  ;;  %4756 = vst [vmem:[#allocation12_spill] sm:$0xff] %v4169_v19  ;;  %v4181_v59 = vmul.f32 %v3934_v17, %v4761_v58  ;;  %v4185_v9 = vmul.f32 %v3922_v52, %v4763_v38  ;;  %v4764_v49 = vld [vmem:[#allocation34_spill] sm:$0xff]  ;;  %v4765_v19 = vld [vmem:[#allocation33_spill] sm:$0xff]  ;;  %v4769_v38 = vsub.s32 2, %v3910_v3 }
 0x1d6   :  { %4758 = vst [vmem:[#allocation14_spill] sm:$0xff] %v4173_v55  ;;  %4760 = vst [vmem:[#allocation13_spill] sm:$0xff] %v4177_v23  ;;  %v4189_v45 = vmul.f32 %v3926_v39, %v4764_v49  ;;  %v4193_v26 = vmul.f32 %v3930_v12, %v4765_v19  ;;  %v4766_v55 = vld [vmem:[#allocation35_spill] sm:$0xff]  ;;  %v4767_v23 = vsub.s32 0, %v3910_v3  ;;  %v4770_v49 = vsub.s32 3, %v3910_v3 }
 0x1d7   :  { %4762 = vst [vmem:[#allocation15_spill] sm:$0xff] %v4181_v59  ;;  %v4197_v0 = vmul.f32 %v3934_v17, %v4766_v55  ;;  %v4768_v59 = vsub.s32 1, %v3910_v3  ;;  %v4209_v39 = vrot.slane %v2103_v60, %v4769_v38 }
 0x1d8   :  { %v4201_v58 = vrot.slane %v2103_v60, %v4767_v23  ;;  %v4213_v12 = vrot.slane %v2103_v60, %v4770_v49 }
 0x1d9   :  { %v4205_v52 = vrot.slane %v2103_v60, %v4768_v59  ;;  %v4780_v59 = vld [vmem:[#allocation4_spill] sm:$0xff]  ;;  %v4782_v38 = vld [vmem:[#allocation6_spill] sm:$0xff]  ;;  %v4784_v49 = vld [vmem:[#allocation5_spill] sm:$0xff] }
 0x1da   :  { %v4217_v17 = vadd.f32 %v4201_v58, %v3942_v53  ;;  %v4221_v19 = vadd.f32 %v4201_v58, %v3958_v61  ;;  %v4225_v55 = vadd.f32 %v4201_v58, %v3974_v35  ;;  %v4229_v23 = vadd.f32 %v4201_v58, %v3990_v47 }
 0x1db   :  { %v4233_v3 = vadd.f32 %v4205_v52, %v3946_v36  ;;  %v4237_v53 = vadd.f32 %v4209_v39, %v3950_v1  ;;  %v4241_v61 = vadd.f32 %v4213_v12, %v3954_v27  ;;  %v4245_v35 = vadd.f32 %v4205_v52, %v3962_v32 }
 0x1dc   :  { %4771 = vst [vmem:[#allocation16_spill] sm:$0xff] %v4217_v17  ;;  %4772 = vst [vmem:[#allocation18_spill] sm:$0xff] %v4221_v19  ;;  %v4249_v47 = vadd.f32 %v4209_v39, %v3966_v34  ;;  %v4253_v36 = vadd.f32 %v4213_v12, %v3970_v33  ;;  %v4257_v1 = vadd.f32 %v4205_v52, %v3978_v40 }
 0x1dd   :  { %4773 = vst [vmem:[#allocation17_spill] sm:$0xff] %v4233_v3  ;;  %4774 = vst [vmem:[#allocation19_spill] sm:$0xff] %v4237_v53  ;;  %v4261_v27 = vadd.f32 %v4209_v39, %v3982_v46  ;;  %v4265_v32 = vadd.f32 %v4213_v12, %v3986_v41  ;;  %v4269_v34 = vadd.f32 %v4205_v52, %v3994_v56 }
 0x1de   :  { %4775 = vst [vmem:[#allocation20_spill] sm:$0xff] %v4241_v61  ;;  %v4273_v33 = vadd.f32 %v4209_v39, %v3998_v62  ;;  %v4277_v40 = vadd.f32 %v4213_v12, %v4002_v57  ;;  %v4281_v46 = vadd.f32 %v4201_v58, %v4006_v63  ;;  %v4285_v41 = vadd.f32 %v4205_v52, %v4010_v4 }
 0x1df   :  { %v4289_v56 = vadd.f32 %v4209_v39, %v4014_v10  ;;  %v4293_v62 = vadd.f32 %v4213_v12, %v4021_v11  ;;  %v4297_v57 = vadd.f32 %v4201_v58, %v4025_v24  ;;  %v4301_v63 = vadd.f32 %v4205_v52, %v4029_v30 }
 0x1e0   :  { %v4305_v4 = vadd.f32 %v4209_v39, %v4033_v25  ;;  %v4309_v10 = vadd.f32 %v4213_v12, %v4037_v16  ;;  %v4313_v11 = vadd.f32 %v4201_v58, %v4041_v31  ;;  %v4317_v24 = vadd.f32 %v4205_v52, %v4045_v42 }
 0x1e1   :  { %v4321_v30 = vadd.f32 %v4209_v39, %v4049_v50  ;;  %v4325_v25 = vadd.f32 %v4213_v12, %v4053_v43  ;;  %v4329_v16 = vadd.f32 %v4201_v58, %v4057_v51  ;;  %v4333_v31 = vadd.f32 %v4205_v52, %v4061_v6 }
 0x1e2   :  { %v4337_v42 = vadd.f32 %v4209_v39, %v4065_v14  ;;  %v4341_v50 = vadd.f32 %v4213_v12, %v4069_v7  ;;  %v4345_v43 = vadd.f32 %v4201_v58, %v4073_v15  ;;  %v4349_v51 = vadd.f32 %v4205_v52, %v4077_v20 }
 0x1e3   :  { %v4353_v6 = vadd.f32 %v4209_v39, %v4081_v28  ;;  %v4357_v60 = vadd.f32 %v4213_v12, %v4085_v21  ;;  %v4361_v14 = vadd.f32 %v4201_v58, %v4089_v18  ;;  %v4365_v7 = vadd.f32 %v4205_v52, %v4093_v44 }
 0x1e4   :  { %v4369_v15 = vadd.f32 %v4209_v39, %v4097_v54  ;;  %v4373_v20 = vadd.f32 %v4213_v12, %v4101_v2  ;;  %v4377_v28 = vadd.f32 %v4201_v58, %v4105_v8  ;;  %v4381_v21 = vadd.f32 %v4205_v52, %v4109_v5  ;;  %v4778_v5 = vld [vmem:[#allocation3_spill] sm:$0xff] }
 0x1e5   :  { %v4385_v18 = vadd.f32 %v4209_v39, %v4113_v13  ;;  %v4389_v44 = vadd.f32 %v4213_v12, %v4117_v29  ;;  %v4393_v54 = vadd.f32 %v4201_v58, %v4121_v22  ;;  %v4397_v2 = vadd.f32 %v4205_v52, %v4125_v37 }
 0x1e6   :  { %v4401_v8 = vadd.f32 %v4209_v39, %v4129_v48  ;;  %v4405_v13 = vadd.f32 %v4213_v12, %v4778_v5  ;;  %v4409_v29 = vadd.f32 %v4201_v58, %v4780_v59  ;;  %v4413_v22 = vadd.f32 %v4205_v52, %v4782_v38 }
 0x1e7   :  { %4776 = vst [vmem:[#allocation22_spill] sm:$0xff] %v4397_v2  ;;  %v4417_v37 = vadd.f32 %v4209_v39, %v4784_v49  ;;  %v4786_v2 = vld [vmem:[#allocation7_spill] sm:$0xff] }
 0x1e8   :  { %4777 = vst [vmem:[#allocation21_spill] sm:$0xff] %v4401_v8  ;;  %4779 = vst [vmem:[#allocation23_spill] sm:$0xff] %v4405_v13  ;;  %v4421_v48 = vadd.f32 %v4213_v12, %v4786_v2  ;;  %v4788_v8 = vld [vmem:[#allocation8_spill] sm:$0xff]  ;;  %v4790_v13 = vld [vmem:[#allocation10_spill] sm:$0xff] }
 0x1e9   :  { %4781 = vst [vmem:[#allocation24_spill] sm:$0xff] %v4409_v29  ;;  %4783 = vst [vmem:[#allocation26_spill] sm:$0xff] %v4413_v22  ;;  %v4425_v5 = vadd.f32 %v4201_v58, %v4788_v8  ;;  %v4429_v59 = vadd.f32 %v4205_v52, %v4790_v13  ;;  %v4792_v29 = vld [vmem:[#allocation9_spill] sm:$0xff]  ;;  %v4793_v22 = vld [vmem:[#allocation11_spill] sm:$0xff] }
 0x1ea   :  { %4785 = vst [vmem:[#allocation25_spill] sm:$0xff] %v4417_v37  ;;  %4787 = vst [vmem:[#allocation27_spill] sm:$0xff] %v4421_v48  ;;  %v4433_v38 = vadd.f32 %v4209_v39, %v4792_v29  ;;  %v4437_v49 = vadd.f32 %v4213_v12, %v4793_v22  ;;  %v4794_v37 = vld [vmem:[#allocation12_spill] sm:$0xff]  ;;  %v4795_v48 = vld [vmem:[#allocation14_spill] sm:$0xff]  ;;  %v4457_v22 = vadd.f32 %v4201_v58, %v4185_v9  ;;  %v2266_v9 = vmax.f32 %v4269_v34, 0.0 }
 0x1eb   :  { %4789 = vst [vmem:[#allocation28_spill] sm:$0xff] %v4425_v5  ;;  %4791 = vst [vmem:[#allocation30_spill] sm:$0xff] %v4429_v59  ;;  %v4441_v2 = vadd.f32 %v4201_v58, %v4794_v37  ;;  %v4445_v8 = vadd.f32 %v4205_v52, %v4795_v48  ;;  %v4796_v5 = vld [vmem:[#allocation13_spill] sm:$0xff]  ;;  %v4798_v59 = vld [vmem:[#allocation15_spill] sm:$0xff]  ;;  %v4461_v37 = vadd.f32 %v4205_v52, %v4189_v45  ;;  %v2258_v45 = vmax.f32 %v4245_v35, 0.0 }
 0x1ec   :  { %v4449_v13 = vadd.f32 %v4209_v39, %v4796_v5  ;;  %v4453_v29 = vadd.f32 %v4213_v12, %v4798_v59  ;;  %4800 = vst [vmem:[#allocation32_spill] sm:$0xff] %v4457_v22  ;;  %v4465_v48 = vadd.f32 %v4209_v39, %v4193_v26  ;;  %v4469_v5 = vadd.f32 %v4213_v12, %v4197_v0 }
 0x1ed   :  { %4801 = vst [vmem:[#allocation34_spill] sm:$0xff] %v4461_v37  ;;  %v2259_v52 = vmax.f32 %v4249_v47, 0.0  ;;  %v2260_v26 = vmax.f32 %v4253_v36, 0.0  ;;  %v2261_v39 = vmax.f32 %v4225_v55, 0.0  ;;  %v2262_v0 = vmax.f32 %v4257_v1, 0.0 }
 0x1ee   :  { %4797 = vst [vmem:[#allocation29_spill] sm:$0xff] %v4449_v13  ;;  %4799 = vst [vmem:[#allocation31_spill] sm:$0xff] %v4453_v29  ;;  %v2263_v12 = vmax.f32 %v4261_v27, 0.0  ;;  %v2264_v59 = vmax.f32 %v4265_v32, 0.0  ;;  %v2265_v29 = vmax.f32 %v4229_v23, 0.0  ;;  %v2267_v58 = vmax.f32 %v4273_v33, 0.0 }
 0x1ef   :  { %4802 = vst [vmem:[#allocation33_spill] sm:$0xff] %v4465_v48  ;;  %4803 = vst [vmem:[#allocation35_spill] sm:$0xff] %v4469_v5  ;;  %v2268_v35 = vmax.f32 %v4277_v40, 0.0  ;;  %v2269_v47 = vmax.f32 %v4281_v46, 0.0  ;;  %v2270_v36 = vmax.f32 %v4285_v41, 0.0  ;;  %v2271_v55 = vmax.f32 %v4289_v56, 0.0 }
 0x1f0   :  { %v2272_v1 = vmax.f32 %v4293_v62, 0.0  ;;  %v2273_v27 = vmax.f32 %v4297_v57, 0.0  ;;  %v2274_v32 = vmax.f32 %v4301_v63, 0.0  ;;  %v2275_v23 = vmax.f32 %v4305_v4, 0.0  ;;  %v4804_v13 = vld [vmem:[#allocation22_spill] sm:$0xff]  ;;  %v4805_v19 = vld [vmem:[#allocation21_spill] sm:$0xff] }
 0x1f1   :  { %v2276_v34 = vmax.f32 %v4309_v10, 0.0  ;;  %v2277_v33 = vmax.f32 %v4313_v11, 0.0  ;;  %v2278_v40 = vmax.f32 %v4317_v24, 0.0  ;;  %v2279_v46 = vmax.f32 %v4321_v30, 0.0  ;;  %v4806_v61 = vld [vmem:[#allocation23_spill] sm:$0xff]  ;;  %v4807_v53 = vld [vmem:[#allocation24_spill] sm:$0xff] }
 0x1f2   :  { %v2280_v41 = vmax.f32 %v4325_v25, 0.0  ;;  %v2281_v56 = vmax.f32 %v4329_v16, 0.0  ;;  %v2282_v62 = vmax.f32 %v4333_v31, 0.0  ;;  %v2283_v57 = vmax.f32 %v4337_v42, 0.0  ;;  %v4808_v3 = vld [vmem:[#allocation26_spill] sm:$0xff]  ;;  %v4809_v17 = vld [vmem:[#allocation25_spill] sm:$0xff] }
 0x1f3   :  { %v2284_v63 = vmax.f32 %v4341_v50, 0.0  ;;  %v2285_v4 = vmax.f32 %v4345_v43, 0.0  ;;  %v2286_v10 = vmax.f32 %v4349_v51, 0.0  ;;  %v2287_v11 = vmax.f32 %v4353_v6, 0.0  ;;  %v4810_v5 = vld [vmem:[#allocation27_spill] sm:$0xff]  ;;  %v4811_v48 = vld [vmem:[#allocation28_spill] sm:$0xff] }
 0x1f4   :  { %v2288_v24 = vmax.f32 %v4357_v60, 0.0  ;;  %v2289_v30 = vmax.f32 %v4361_v14, 0.0  ;;  %v2290_v25 = vmax.f32 %v4365_v7, 0.0  ;;  %v2291_v16 = vmax.f32 %v4369_v15, 0.0  ;;  %v4812_v37 = vld [vmem:[#allocation30_spill] sm:$0xff] }
 0x1f5   :  { %v2292_v31 = vmax.f32 %v4373_v20, 0.0  ;;  %v2293_v42 = vmax.f32 %v4377_v28, 0.0  ;;  %v2294_v50 = vmax.f32 %v4381_v21, 0.0  ;;  %v2295_v43 = vmax.f32 %v4385_v18, 0.0  ;;  %v4813_v22 = vld [vmem:[#allocation29_spill] sm:$0xff] }
 0x1f6   :  { %v2296_v51 = vmax.f32 %v4389_v44, 0.0  ;;  %v2297_v6 = vmax.f32 %v4393_v54, 0.0  ;;  %v2298_v60 = vmax.f32 %v4804_v13, 0.0  ;;  %v2299_v14 = vmax.f32 %v4805_v19, 0.0 }
 0x1f7   :  { %v2300_v7 = vmax.f32 %v4806_v61, 0.0  ;;  %v2301_v15 = vmax.f32 %v4807_v53, 0.0  ;;  %v2302_v20 = vmax.f32 %v4808_v3, 0.0  ;;  %v2303_v28 = vmax.f32 %v4809_v17, 0.0  ;;  %v4814_v3 = vld [vmem:[#allocation31_spill] sm:$0xff] }
 0x1f8   :  { %v2304_v21 = vmax.f32 %v4810_v5, 0.0  ;;  %v2305_v18 = vmax.f32 %v4811_v48, 0.0  ;;  %v2306_v44 = vmax.f32 %v4812_v37, 0.0  ;;  %v2307_v54 = vmax.f32 %v4433_v38, 0.0  ;;  %v4815_v5 = vld [vmem:[#allocation32_spill] sm:$0xff]  ;;  %v4816_v37 = vld [vmem:[#allocation34_spill] sm:$0xff] }
 0x1f9   :  { %v2308_v13 = vmax.f32 %v4437_v49, 0.0  ;;  %v2309_v19 = vmax.f32 %v4441_v2, 0.0  ;;  %v2310_v61 = vmax.f32 %v4445_v8, 0.0  ;;  %v2311_v53 = vmax.f32 %v4813_v22, 0.0  ;;  %v4817_v49 = vld [vmem:[#allocation33_spill] sm:$0xff]  ;;  %v4818_v8 = vld [vmem:[#allocation35_spill] sm:$0xff] }
 0x1fa   :  { %v2312_v17 = vmax.f32 %v4814_v3, 0.0  ;;  %v2313_v48 = vmax.f32 %v4815_v5, 0.0  ;;  %v2314_v38 = vmax.f32 %v4816_v37, 0.0  ;;  %v2315_v2 = vmax.f32 %v4817_v49, 0.0  ;;  %v4819_v3 = vld [vmem:[#allocation16_spill] sm:$0xff]  ;;  %v4821_v37 = vld [vmem:[#allocation17_spill] sm:$0xff] }
 0x1fb   :  { %v2316_v22 = vmax.f32 %v4818_v8, 0.0  ;;  %v4820_v5 = vmax.f32 %v4819_v3, 0.0  ;;  %v4822_v49 = vmax.f32 %v4821_v37, 0.0  ;;  %v4823_v3 = vld [vmem:[#allocation19_spill] sm:$0xff] }
 0x1fc   :  { %v4824_v37 = vmax.f32 %v4823_v3, 0.0 }
 0x1fd   :  { %v2739_v8 = vpack.c.bf16 %v4822_v49, %v4820_v5  ;;  %v4825_v5 = vld [vmem:[#allocation20_spill] sm:$0xff] }
 0x1fe   :  { %v4826_v49 = vmax.f32 %v4825_v5, 0.0  ;;  %v4827_v5 = vld [vmem:[#allocation18_spill] sm:$0xff] }
 0x1ff   :  { %2509 = vst [vmem:[%s4645_s4] sm:$0xff] %v2739_v8 }
 0x200   :  { %v2740_v3 = vpack.c.bf16 %v4826_v49, %v4824_v37  ;;  %v4828_v37 = vmax.f32 %v4827_v5, 0.0  ;;  %v2742_v5 = vpack.c.bf16 %v2260_v26, %v2259_v52  ;;  %v2745_v26 = vpack.c.bf16 %v2266_v9, %v2265_v29 }
 0x201   :  { %v2746_v52 = vpack.c.bf16 %v2268_v35, %v2267_v58  ;;  %v2751_v29 = vpack.c.bf16 %v2278_v40, %v2277_v33  ;;  %v2752_v9 = vpack.c.bf16 %v2280_v41, %v2279_v46  ;;  %v2753_v58 = vpack.c.bf16 %v2282_v62, %v2281_v56 }
 0x202   :  { %v2741_v49 = vpack.c.bf16 %v2258_v45, %v4828_v37  ;;  %v2743_v37 = vpack.c.bf16 %v2262_v0, %v2261_v39  ;;  %v2744_v45 = vpack.c.bf16 %v2264_v59, %v2263_v12  ;;  %v2747_v0 = vpack.c.bf16 %v2270_v36, %v2269_v47  ;;  %2510 = vst [vmem:[%s4645_s4 + $0x8] sm:$0xff] %v2740_v3 }
 0x203   :  { %v2748_v39 = vpack.c.bf16 %v2272_v1, %v2271_v55  ;;  %v2749_v12 = vpack.c.bf16 %v2274_v32, %v2273_v27  ;;  %v2750_v59 = vpack.c.bf16 %v2276_v34, %v2275_v23  ;;  %2512 = vst [vmem:[%s4645_s4 + $0x18] sm:$0xff] %v2742_v5  ;;  %v2754_v35 = vpack.c.bf16 %v2284_v63, %v2283_v57 }
 0x204   :  { %2511 = vst [vmem:[%s4645_s4 + $0x10] sm:$0xff] %v2741_v49  ;;  %2513 = vst [vmem:[%s4645_s4 + $0x20] sm:$0xff] %v2743_v37  ;;  %v2755_v47 = vpack.c.bf16 %v2286_v10, %v2285_v4  ;;  %v2756_v36 = vpack.c.bf16 %v2288_v24, %v2287_v11  ;;  %v2757_v55 = vpack.c.bf16 %v2290_v25, %v2289_v30 }
 0x205   :  { %2514 = vst [vmem:[%s4645_s4 + $0x28] sm:$0xff] %v2744_v45  ;;  %2515 = vst [vmem:[%s4645_s4 + $0x30] sm:$0xff] %v2745_v26  ;;  %v2758_v1 = vpack.c.bf16 %v2292_v31, %v2291_v16  ;;  %v2759_v27 = vpack.c.bf16 %v2294_v50, %v2293_v42  ;;  %v2760_v32 = vpack.c.bf16 %v2296_v51, %v2295_v43 }
 0x206   :  { %2516 = vst [vmem:[%s4645_s4 + $0x38] sm:$0xff] %v2746_v52  ;;  %2517 = vst [vmem:[%s4645_s4 + $0x40] sm:$0xff] %v2747_v0  ;;  %v2761_v23 = vpack.c.bf16 %v2298_v60, %v2297_v6  ;;  %v2762_v34 = vpack.c.bf16 %v2300_v7, %v2299_v14  ;;  %v2763_v33 = vpack.c.bf16 %v2302_v20, %v2301_v15 }
 0x207   :  { %2518 = vst [vmem:[%s4645_s4 + $0x48] sm:$0xff] %v2748_v39  ;;  %2519 = vst [vmem:[%s4645_s4 + $0x50] sm:$0xff] %v2749_v12  ;;  %v2764_v40 = vpack.c.bf16 %v2304_v21, %v2303_v28  ;;  %v2765_v46 = vpack.c.bf16 %v2306_v44, %v2305_v18  ;;  %v2766_v41 = vpack.c.bf16 %v2308_v13, %v2307_v54 }
 0x208   :  { %2520 = vst [vmem:[%s4645_s4 + $0x58] sm:$0xff] %v2750_v59  ;;  %2521 = vst [vmem:[%s4645_s4 + $0x60] sm:$0xff] %v2751_v29  ;;  %v2767_v56 = vpack.c.bf16 %v2310_v61, %v2309_v19  ;;  %v2768_v62 = vpack.c.bf16 %v2312_v17, %v2311_v53  ;;  %v2769_v57 = vpack.c.bf16 %v2314_v38, %v2313_v48 }
 0x209   :  { %2522 = vst [vmem:[%s4645_s4 + $0x68] sm:$0xff] %v2752_v9  ;;  %2523 = vst [vmem:[%s4645_s4 + $0x70] sm:$0xff] %v2753_v58  ;;  %v2770_v63 = vpack.c.bf16 %v2316_v22, %v2315_v2 }
 0x20a   :  { %2524 = vst [vmem:[%s4645_s4 + $0x78] sm:$0xff] %v2754_v35  ;;  %2525 = vst [vmem:[%s4645_s4 + $0x80] sm:$0xff] %v2755_v47 }
 0x20b   :  { %2526 = vst [vmem:[%s4645_s4 + $0x88] sm:$0xff] %v2756_v36  ;;  %2527 = vst [vmem:[%s4645_s4 + $0x90] sm:$0xff] %v2757_v55 }
 0x20c   :  { %2528 = vst [vmem:[%s4645_s4 + $0x98] sm:$0xff] %v2758_v1  ;;  %2529 = vst [vmem:[%s4645_s4 + $0xa0] sm:$0xff] %v2759_v27 }
 0x20d   :  { %2530 = vst [vmem:[%s4645_s4 + $0xa8] sm:$0xff] %v2760_v32  ;;  %2531 = vst [vmem:[%s4645_s4 + $0xb0] sm:$0xff] %v2761_v23 }
 0x20e   :  { %2532 = vst [vmem:[%s4645_s4 + $0xb8] sm:$0xff] %v2762_v34  ;;  %2533 = vst [vmem:[%s4645_s4 + $0xc0] sm:$0xff] %v2763_v33 }
 0x20f   :  { %2534 = vst [vmem:[%s4645_s4 + $0xc8] sm:$0xff] %v2764_v40  ;;  %2535 = vst [vmem:[%s4645_s4 + $0xd0] sm:$0xff] %v2765_v46 }
 0x210   :  { %2536 = vst [vmem:[%s4645_s4 + $0xd8] sm:$0xff] %v2766_v41  ;;  %2537 = vst [vmem:[%s4645_s4 + $0xe0] sm:$0xff] %v2767_v56 }
 0x211   :  { %2538 = vst [vmem:[%s4645_s4 + $0xe8] sm:$0xff] %v2768_v62  ;;  %2539 = vst [vmem:[%s4645_s4 + $0xf0] sm:$0xff] %v2769_v57 }
 0x212   :  { %2540 = vst [vmem:[%s4645_s4 + $0xf8] sm:$0xff] %v2770_v63 }

</bundles_post_ra>
